<compile_context>
chip_gen: v6e
topology: v6e:2x2x1
jax: 0.10.0
libtpu: 0.0.40
codegen_flags: <defaults>
</compile_context>

<pallas_src>
import functools

import jax
import jax.numpy as jnp
from jax.experimental import pallas as pl
from jax.experimental.pallas import tpu as pltpu


# ----------------------------- config ("cfg") --------------------------------
class Cfg:
    NUM_CLASSES = 8
    IS_CLASS_AGNOSTIC = False
    TEST_POOLING_METHOD = "align"
    TEST_POOLING_SIZE = 4
    TEST_POOLING_SAMPLE_NUM = 2


FEATURE_STRIDE = 1          # base conv keeps spatial resolution
C_IN = 4                    # input image channels
C_BASE = 32                 # base_model output channels
C_TOP = 64                  # top_model output channels
NUM_ROIS = 8                # proposals per image


# --------------------- the single fused Pallas kernel -------------------------
# 1) base_model : 3x3 conv (pad=1) + ReLU, as ONE banded matmul over the batch
# 2) roi_align  : column (x) interp for all rois  -> one matmul  (constant cbig)
#                 row (y) interp + batch select   -> one matmul  (constant rowb)
#                 per-roi block extraction        -> mask + 128-lane block sum
# 3) top_model  : 1x1 conv + ReLU, px-block-diagonal channel matmul
# 4) mean(3).mean(2) + fc_cls/fc_reg : px-mean folded into the head weights,
#                 py-mean as a block-averaging matmul, then softmax on logits.
def _fused_frcnn_kernel(xk_ref, wconv_ref, bconv_ref, cbig_ref, rowb_ref,
                        mask_ref, wtop_ref, btop_ref, whead_ref, avgr_ref,
                        bhead_ref, o_ref, *, num_classes, block, num_blocks):
    f32 = jnp.float32
    bf16 = jnp.bfloat16

    # --- 1) base_model: single (N*H, 3*W*Cin) x (3*W*Cin, W*Cb) matmul + ReLU
    feat = jnp.dot(xk_ref[...], wconv_ref[...], preferred_element_type=f32)
    feat = jnp.maximum(feat + bconv_ref[...], 0.0)              # (N*H, W*Cb)

    # --- 2a) roi_align, column (x) interpolation for every (roi, px) at once
    u = jnp.dot(feat.astype(bf16), cbig_ref[...],
                preferred_element_type=f32)                     # (N*H, R*P*Cb)

    # --- 2b) roi_align, row (y) interpolation + batch selection
    big = jnp.dot(rowb_ref[...], u.astype(bf16),
                  preferred_element_type=f32)                   # (R*P, R*P*Cb)
    big = big * mask_ref[...]            # keep only each roi's diagonal block

    # --- 2c) extract the roi-diagonal 128-lane blocks (mask zeroed the rest)
    pooled = big[:, 0:block]
    for j in range(1, num_blocks):
        pooled = pooled + big[:, j * block:(j + 1) * block]     # (R*P, P*Cb)

    # --- 3) top_model (1x1 conv as px-block-diagonal channel matmul) + ReLU
    h = jnp.dot(pooled.astype(bf16), wtop_ref[...],
                preferred_element_type=f32)                     # (R*P, P*Ct)
    h = jnp.maximum(h + btop_ref[...], 0.0)

    # --- 4) fc head: px-mean folded into whead, py-mean via avgr block matmul
    hm = jnp.dot(h.astype(bf16), whead_ref[...],
                 preferred_element_type=f32)                    # (R*P, NC+NR)
    out = jnp.dot(avgr_ref[...], hm.astype(bf16),
                  preferred_element_type=f32) + bhead_ref[...]  # (R,   NC+NR)

    # softmax over the class logits (exact reciprocal -> rows sum to 1)
    logits = out[:, :num_classes]
    m = jnp.max(logits, axis=-1, keepdims=True)
    e = jnp.exp(logits - m)
    probs = e / jnp.sum(e, axis=-1, keepdims=True)

    # merged store without an in-kernel concatenate: full store of (logits|reg),
    # then overwrite the leading class lanes with the softmax probabilities.
    o_ref[...] = out.astype(o_ref.dtype)
    o_ref[:, :num_classes] = probs.astype(o_ref.dtype)


def pallas_fused_forward(xk, consts, num_classes):
    """xk: (N*H, 3*W*Cin) bf16 dy-tap slab -> (R, NC + NR) [probs | reg]."""
    c = consts
    NH, K3 = xk.shape
    WCB = c["w_conv"].shape[1]
    RPC = c["cbig"].shape[1]
    RP = c["rowb"].shape[0]
    PCB, PCT = c["w_top"].shape
    R = c["avgr"].shape[0]
    NOUT = c["w_head"].shape[1]

    kernel = functools.partial(_fused_frcnn_kernel, num_classes=num_classes,
                               block=PCB, num_blocks=R)
    return pl.pallas_call(
        kernel,
        out_shape=jax.ShapeDtypeStruct((R, NOUT), jnp.float32),
        grid_spec=pltpu.PrefetchScalarGridSpec(
            num_scalar_prefetch=0,
            grid=(1,),                       # dispatch-bound problem: one step
            in_specs=[
                pl.BlockSpec((NH, K3), lambda i: (0, 0)),    # xk slab
                pl.BlockSpec((K3, WCB), lambda i: (0, 0)),   # banded conv W
                pl.BlockSpec((1, WCB), lambda i: (0, 0)),    # conv bias row
                pl.BlockSpec((WCB, RPC), lambda i: (0, 0)),  # col-interp
                pl.BlockSpec((RP, NH), lambda i: (0, 0)),    # row-interp+onehot
                pl.BlockSpec((RP, RPC), lambda i: (0, 0)),   # roi diag mask
                pl.BlockSpec((PCB, PCT), lambda i: (0, 0)),  # top W (block-diag)
                pl.BlockSpec((1, PCT), lambda i: (0, 0)),    # top bias row
                pl.BlockSpec((PCT, NOUT), lambda i: (0, 0)),  # head W (px-mean)
                pl.BlockSpec((R, RP), lambda i: (0, 0)),     # py-mean matrix
                pl.BlockSpec((1, NOUT), lambda i: (0, 0)),   # head bias row
            ],
            out_specs=pl.BlockSpec((R, NOUT), lambda i: (0, 0)),
        ),
        compiler_params=pltpu.CompilerParams(
            dimension_semantics=("arbitrary",)),
    )(xk, c["w_conv"], c["b_conv"], c["cbig"], c["rowb"], c["mask"],
      c["w_top"], c["b_top"], c["w_head"], c["avgr"], c["b_head"])


# ----------------------------- plain-JAX glue ---------------------------------
def _stub_proposals(batch_size):
    base_boxes = jnp.array(
        [[0, 0, 7, 7], [8, 0, 15, 7], [0, 8, 7, 15], [8, 8, 15, 15],
         [2, 2, 13, 13], [0, 0, 15, 15], [4, 1, 10, 12], [1, 5, 14, 11]],
        dtype=jnp.float32)                                    # (NUM_ROIS, 4)
    bidx = jnp.broadcast_to(
        jnp.arange(batch_size, dtype=jnp.float32)[:, None, None],
        (batch_size, NUM_ROIS, 1))
    boxes = jnp.broadcast_to(base_boxes[None], (batch_size, NUM_ROIS, 4))
    return jnp.concatenate([bidx, boxes], axis=-1)            # (N, NUM_ROIS, 5)


def rpn_net(gt_boxes, img_info, num_gt_boxes, batch_size):
    """Deterministic proposals (batch_idx, x1, y1, x2, y2) and zero rpn losses."""
    # TODO(synk): real RPN (anchor generation + NMS) has no clean Pallas
    # equivalent; proposals are generated deterministically here (TEST mode).
    return _stub_proposals(batch_size), jnp.float32(0.0), jnp.float32(0.0)


def _interp_matrix(coords, size):
    """coords: (R, PS) sample positions -> (R, PS, size) bilinear weight rows."""
    valid = ((coords >= -1.0) & (coords <= size)).astype(jnp.float32)
    c = jnp.clip(coords, 0.0, size - 1)
    c0 = jnp.clip(jnp.floor(c).astype(jnp.int32), 0, size - 1)
    c1 = jnp.clip(c0 + 1, 0, size - 1)
    l = c - c0.astype(jnp.float32)
    h = 1.0 - l
    grid = jnp.arange(size)[None, None, :]
    m = (h[..., None] * (grid == c0[..., None])
         + l[..., None] * (grid == c1[..., None]))
    return m * valid[..., None]


def _roi_box_samples(rois_flat, p, s, spatial_scale):
    x1 = rois_flat[:, 1] * spatial_scale
    y1 = rois_flat[:, 2] * spatial_scale
    x2 = rois_flat[:, 3] * spatial_scale
    y2 = rois_flat[:, 4] * spatial_scale
    roi_w = jnp.maximum(x2 - x1, 1.0)
    roi_h = jnp.maximum(y2 - y1, 1.0)
    off = (jnp.arange(p)[:, None] + (jnp.arange(s)[None, :] + 0.5) / s).reshape(-1)
    ys = y1[:, None] + off[None, :] * (roi_h / p)[:, None]     # (R, P*S)
    xs = x1[:, None] + off[None, :] * (roi_w / p)[:, None]     # (R, P*S)
    return ys, xs


def roi_align_matmul(feat, rois, out_size, spatial_scale, sampling_ratio):
    """Reference-only ROI-align. feat: (N,H,W,C); rois: (R,5) -> (R,P,P,C)."""
    N, H, W, C = feat.shape
    R = rois.shape[0]
    P, S = out_size, sampling_ratio
    ys, xs = _roi_box_samples(rois, P, S, spatial_scale)
    row_m = _interp_matrix(ys, H)                              # (R, PS, H)
    col_m = _interp_matrix(xs, W)                              # (R, PS, W)
    onehot_b = (rois[:, 0].astype(jnp.int32)[:, None]
                == jnp.arange(N)[None, :]).astype(feat.dtype)  # (R, N)
    feat_r = jnp.einsum("rn,nhwc->rhwc", onehot_b, feat)
    tmp = jnp.einsum("rph,rhwc->rpwc", row_m, feat_r)
    sampled = jnp.einsum("rqw,rpwc->rpqc", col_m, tmp)
    return sampled.reshape(R, P, S, P, S, C).mean(axis=(2, 4))  # (R, P, P, C)


# --------------- one-time param transform (all kernel constants) --------------
def prepare_constants(params, cfg, batch_size, height, width):
    """Build every constant matrix the fused kernel consumes.  Called once."""
    n, h, w = batch_size, height, width
    cin, cb, ct = C_IN, C_BASE, C_TOP
    p = cfg.TEST_POOLING_SIZE
    s = cfg.TEST_POOLING_SAMPLE_NUM
    nc = cfg.NUM_CLASSES
    nr = 4 if cfg.IS_CLASS_AGNOSTIC else 4 * nc

    # -- banded conv weights: dx handled inside the band (clipped at the width
    #    edges == zero padding), dy handled by 3 height taps concatenated on K,
    #    so K = 3*W*Cin (no width padding -> less K waste on the MXU).
    # NOTE(scaling): this inflates as 3*W^2*Cin*Cb; tile W with an extra grid
    # axis (W_tile*Cb a multiple of 128 lanes) before growing the spatial size,
    # first limit is v7x's 64 MiB VMEM.
    dx = jnp.arange(3)
    place = (jnp.arange(w)[None, :, None]
             == (jnp.arange(w)[None, None, :] + dx[:, None, None] - 1))
    w_band = jnp.einsum("xvw,yxio->yviwo", place.astype(jnp.float32),
                        params["w_base"])
    w_band = w_band.reshape(3 * w * cin, w * cb).astype(jnp.bfloat16)
    b_conv = jnp.tile(params["b_base"].astype(jnp.float32), w).reshape(1, w * cb)

    # -- deterministic TEST-mode proposals -> constant roi-align matrices
    rois = _stub_proposals(n)
    rois_flat = rois.reshape(-1, 5)
    R = rois_flat.shape[0]
    ys, xs = _roi_box_samples(rois_flat, p, s, 1.0 / FEATURE_STRIDE)
    row_avg = _interp_matrix(ys, h).reshape(R, p, s, h).mean(axis=2)   # (R,P,H)
    col_avg = _interp_matrix(xs, w).reshape(R, p, s, w).mean(axis=2)   # (R,P,W)
    onehot_b = (rois_flat[:, 0].astype(jnp.int32)[:, None]
                == jnp.arange(n)[None, :]).astype(jnp.float32)         # (R,N)

    rowb = jnp.einsum("rn,rph->rpnh", onehot_b, row_avg)
    rowb = rowb.reshape(R * p, n * h).astype(jnp.bfloat16)             # (R*P, N*H)
    cbig = jnp.einsum("rpw,cd->wcrpd", col_avg, jnp.eye(cb, dtype=jnp.float32))
    cbig = cbig.reshape(w * cb, R * p * cb).astype(jnp.bfloat16)       # (W*Cb, R*P*Cb)
    mask = jnp.kron(jnp.eye(R, dtype=jnp.float32),
                    jnp.ones((p, p * cb), jnp.float32))                # (R*P, R*P*Cb)

    # -- top_model as a px-block-diagonal channel matmul, fc head with the px
    #    spatial mean folded in, py mean as a block-averaging matmul.
    w_top_blk = jnp.einsum("pq,io->piqo", jnp.eye(p, dtype=jnp.float32),
                           params["w_top"])
    w_top_blk = w_top_blk.reshape(p * cb, p * ct).astype(jnp.bfloat16)
    b_top = jnp.tile(params["b_top"].astype(jnp.float32), p).reshape(1, p * ct)
    w_head = jnp.concatenate([params["w_cls"], params["w_reg"]], axis=1)
    w_head = (jnp.tile(w_head, (p, 1)) / p).astype(jnp.bfloat16)       # (P*Ct, NC+NR)
    b_head = jnp.concatenate([params["b_cls"], params["b_reg"]])
    b_head = b_head.astype(jnp.float32).reshape(1, nc + nr)
    avgr = (jnp.kron(jnp.eye(R, dtype=jnp.float32),
                     jnp.ones((1, p), jnp.float32)) / p).astype(jnp.bfloat16)

    return {"w_conv": w_band, "b_conv": b_conv, "cbig": cbig, "rowb": rowb,
            "mask": mask, "w_top": w_top_blk, "b_top": b_top,
            "w_head": w_head, "b_head": b_head, "avgr": avgr}


# ------------------------------ full forward ----------------------------------
def faster_rcnn_forward(consts, x_nchw, gt_boxes, img_info, num_gt_boxes, cfg):
    batch_size, _, height, width = x_nchw.shape
    nc = cfg.NUM_CLASSES

    # one fused XLA input op: NCHW->NHWC, height pad, dy-tap concat, bf16 cast
    # (3x dy "im2col" is only ~12 KB here; it turns the conv into one matmul)
    x = jnp.transpose(x_nchw, (0, 2, 3, 1))                    # (N,H,W,Cin)
    xp = jnp.pad(x, ((0, 0), (1, 1), (0, 0), (0, 0)))
    xp = xp.reshape(batch_size, height + 2, width * C_IN)
    xk = jnp.concatenate(
        [xp[:, 0:height], xp[:, 1:height + 1], xp[:, 2:height + 2]], axis=-1)
    xk = xk.reshape(batch_size * height, 3 * width * C_IN).astype(jnp.bfloat16)

    # rpn_net (deterministic proposals, zero rpn losses)
    rois, rpn_cls_loss, rpn_reg_loss = rpn_net(gt_boxes, img_info,
                                               num_gt_boxes, batch_size)

    # fused kernel: conv+ReLU, roi_align, top_model+ReLU, spatial mean,
    # fc_cls + softmax, fc_reg
    out = pallas_fused_forward(xk, consts, nc)                 # (R, NC+NR)

    cls_probs = out[:, :nc].reshape(batch_size, NUM_ROIS, nc)
    bbox_preds = out[:, nc:].reshape(batch_size, NUM_ROIS, -1)

    loss_cls = jnp.zeros((1,), jnp.float32)
    loss_reg = jnp.zeros((1,), jnp.float32)
    return (rois, cls_probs, bbox_preds, rpn_cls_loss, rpn_reg_loss,
            loss_cls, loss_reg)


# ------------------------ plain-JAX f32 reference ------------------------------
def reference_forward(params, x_nchw, cfg):
    p = cfg.TEST_POOLING_SIZE
    s = cfg.TEST_POOLING_SAMPLE_NUM
    x = jnp.transpose(x_nchw, (0, 2, 3, 1))
    feat = jax.lax.conv_general_dilated(
        x, params["w_base"], window_strides=(1, 1), padding="SAME",
        dimension_numbers=("NHWC", "HWIO", "NHWC"))
    feat = jnp.maximum(feat + params["b_base"], 0.0)
    rois = _stub_proposals(x.shape[0]).reshape(-1, 5)
    pooled = roi_align_matmul(feat, rois, p, 1.0 / FEATURE_STRIDE, s)
    h = jnp.einsum("rpqc,ct->rpqt", pooled, params["w_top"]) + params["b_top"]
    h = jnp.maximum(h, 0.0).mean(axis=(1, 2))
    logits = h @ params["w_cls"] + params["b_cls"]
    probs = jax.nn.softmax(logits, axis=-1)
    reg = h @ params["w_reg"] + params["b_reg"]
    return probs, reg


def init_params(key, cfg):
    nc = cfg.NUM_CLASSES
    reg_out = 4 if cfg.IS_CLASS_AGNOSTIC else 4 * nc
    keys = jax.random.split(key, 8)
    return {
        "w_base": 0.1 * jax.random.normal(keys[0], (3, 3, C_IN, C_BASE), jnp.float32),
        "b_base": 0.01 * jax.random.normal(keys[1], (C_BASE,), jnp.float32),
        "w_top": 0.1 * jax.random.normal(keys[2], (C_BASE, C_TOP), jnp.float32),
        "b_top": 0.01 * jax.random.normal(keys[3], (C_TOP,), jnp.float32),
        "w_cls": 0.1 * jax.random.normal(keys[4], (C_TOP, nc), jnp.float32),
        "b_cls": 0.01 * jax.random.normal(keys[5], (nc,), jnp.float32),
        "w_reg": 0.1 * jax.random.normal(keys[6], (C_TOP, reg_out), jnp.float32),
        "b_reg": 0.01 * jax.random.normal(keys[7], (reg_out,), jnp.float32),
    }


if __name__ == "__main__":
    cfg = Cfg()
    key = jax.random.PRNGKey(0)
    k_img, k_gt, k_param = jax.random.split(key, 3)

    N, H, W = 2, 16, 16
    x = jax.random.normal(k_img, (N, C_IN, H, W), jnp.float32)        # NCHW input
    gt_boxes = jax.random.uniform(k_gt, (N, 3, 5), jnp.float32) * 15.0
    img_info = jnp.array([[16.0, 16.0, 1.0]] * N, jnp.float32)
    num_gt_boxes = jnp.array([3] * N, jnp.int32)

    params = init_params(k_param, cfg)
    consts = prepare_constants(params, cfg, N, H, W)   # one-time param transform

    fwd = jax.jit(functools.partial(faster_rcnn_forward, cfg=cfg))
    out = jax.block_until_ready(fwd(consts, x, gt_boxes, img_info, num_gt_boxes))

    rois, cls_probs, bbox_preds = out[0], out[1], out[2]
    assert rois.shape == (N, NUM_ROIS, 5)
    assert cls_probs.shape == (N, NUM_ROIS, cfg.NUM_CLASSES)
    assert bbox_preds.shape == (N, NUM_ROIS, 4 * cfg.NUM_CLASSES)
    assert bool(jnp.all(jnp.isfinite(cls_probs)))
    assert bool(jnp.all(jnp.isfinite(bbox_preds)))
    assert bool(jnp.allclose(cls_probs.sum(-1), 1.0, atol=1e-4))

    # plain-JAX f32 reference (kernel uses bf16 MXU operands -> loose tolerance)
    ref_probs, ref_reg = reference_forward(params, x, cfg)
    assert bool(jnp.allclose(cls_probs.reshape(-1, cfg.NUM_CLASSES), ref_probs,
                             atol=0.05))
    assert bool(jnp.allclose(bbox_preds.reshape(ref_reg.shape), ref_reg,
                             atol=0.1, rtol=0.1))
    print("KERNEL_OK")
</pallas_src>

<mosaic_0001>
module attributes {stable_mosaic.version = 11 : i64} {
  func.func @_fused_frcnn_kernel(%arg0: i32, %arg1: memref<32x192xbf16, #tpu.memory_space<vmem>>, %arg2: memref<192x512xbf16, #tpu.memory_space<vmem>>, %arg3: memref<1x512xf32, #tpu.memory_space<vmem>>, %arg4: memref<512x2048xbf16, #tpu.memory_space<vmem>>, %arg5: memref<64x32xbf16, #tpu.memory_space<vmem>>, %arg6: memref<64x2048xf32, #tpu.memory_space<vmem>>, %arg7: memref<128x256xbf16, #tpu.memory_space<vmem>>, %arg8: memref<1x256xf32, #tpu.memory_space<vmem>>, %arg9: memref<256x40xbf16, #tpu.memory_space<vmem>>, %arg10: memref<16x64xbf16, #tpu.memory_space<vmem>>, %arg11: memref<1x40xf32, #tpu.memory_space<vmem>>, %arg12: memref<16x40xf32, #tpu.memory_space<vmem>>) attributes {dimension_semantics = [#tpu.dimension_semantics<arbitrary>], iteration_bounds = array<i64: 1>, scalar_prefetch = 0 : i64, scratch_operands = 0 : i64, tpu.core_type = #tpu.core_type<tc>, window_params = [{pipeline_mode = #tpu.pipeline_mode<synchronous>, transform_indices = @transform_0, window_bounds = array<i64: 32, 192>}, {pipeline_mode = #tpu.pipeline_mode<synchronous>, transform_indices = @transform_1, window_bounds = array<i64: 192, 512>}, {pipeline_mode = #tpu.pipeline_mode<synchronous>, transform_indices = @transform_2, window_bounds = array<i64: 1, 512>}, {pipeline_mode = #tpu.pipeline_mode<synchronous>, transform_indices = @transform_3, window_bounds = array<i64: 512, 2048>}, {pipeline_mode = #tpu.pipeline_mode<synchronous>, transform_indices = @transform_4, window_bounds = array<i64: 64, 32>}, {pipeline_mode = #tpu.pipeline_mode<synchronous>, transform_indices = @transform_5, window_bounds = array<i64: 64, 2048>}, {pipeline_mode = #tpu.pipeline_mode<synchronous>, transform_indices = @transform_6, window_bounds = array<i64: 128, 256>}, {pipeline_mode = #tpu.pipeline_mode<synchronous>, transform_indices = @transform_7, window_bounds = array<i64: 1, 256>}, {pipeline_mode = #tpu.pipeline_mode<synchronous>, transform_indices = @transform_8, window_bounds = array<i64: 256, 40>}, {pipeline_mode = #tpu.pipeline_mode<synchronous>, transform_indices = @transform_9, window_bounds = array<i64: 16, 64>}, {pipeline_mode = #tpu.pipeline_mode<synchronous>, transform_indices = @transform_10, window_bounds = array<i64: 1, 40>}, {pipeline_mode = #tpu.pipeline_mode<synchronous>, transform_indices = @transform_11, window_bounds = array<i64: 16, 40>}]} {
    %c0 = arith.constant 0 : index
    %c0_0 = arith.constant 0 : index
    %0 = vector.load %arg1[%c0, %c0_0] : memref<32x192xbf16, #tpu.memory_space<vmem>>, vector<32x192xbf16>
    %c0_1 = arith.constant 0 : index
    %c0_2 = arith.constant 0 : index
    %1 = vector.load %arg2[%c0_1, %c0_2] : memref<192x512xbf16, #tpu.memory_space<vmem>>, vector<192x512xbf16>
    %cst = arith.constant dense<0.000000e+00> : vector<32x512xf32>
    %2 = tpu.matmul %0, %1, %cst {dimension_numbers = #tpu.dot_dimension_numbers<[1], [0], [0], [1], [0, 0, 1, 1], [], []>} : vector<32x192xbf16>, vector<192x512xbf16>, vector<32x512xf32> -> vector<32x512xf32>
    %c0_3 = arith.constant 0 : index
    %c0_4 = arith.constant 0 : index
    %3 = vector.load %arg3[%c0_3, %c0_4] : memref<1x512xf32, #tpu.memory_space<vmem>>, vector<1x512xf32>
    %4 = vector.broadcast %3 : vector<1x512xf32> to vector<32x512xf32>
    %5 = arith.addf %2, %4 : vector<32x512xf32>
    %cst_5 = arith.constant 0.000000e+00 : f32
    %6 = vector.broadcast %cst_5 : f32 to vector<32x512xf32>
    %7 = arith.maximumf %5, %6 : vector<32x512xf32>
    %8 = arith.truncf %7 : vector<32x512xf32> to vector<32x512xbf16>
    %c0_6 = arith.constant 0 : index
    %c0_7 = arith.constant 0 : index
    %9 = vector.load %arg4[%c0_6, %c0_7] : memref<512x2048xbf16, #tpu.memory_space<vmem>>, vector<512x2048xbf16>
    %cst_8 = arith.constant dense<0.000000e+00> : vector<32x2048xf32>
    %10 = tpu.matmul %8, %9, %cst_8 {dimension_numbers = #tpu.dot_dimension_numbers<[1], [0], [0], [1], [0, 0, 1, 1], [], []>} : vector<32x512xbf16>, vector<512x2048xbf16>, vector<32x2048xf32> -> vector<32x2048xf32>
    %c0_9 = arith.constant 0 : index
    %c0_10 = arith.constant 0 : index
    %11 = vector.load %arg5[%c0_9, %c0_10] : memref<64x32xbf16, #tpu.memory_space<vmem>>, vector<64x32xbf16>
    %12 = arith.truncf %10 : vector<32x2048xf32> to vector<32x2048xbf16>
    %cst_11 = arith.constant dense<0.000000e+00> : vector<64x2048xf32>
    %13 = tpu.matmul %11, %12, %cst_11 {dimension_numbers = #tpu.dot_dimension_numbers<[1], [0], [0], [1], [0, 0, 1, 1], [], []>} : vector<64x32xbf16>, vector<32x2048xbf16>, vector<64x2048xf32> -> vector<64x2048xf32>
    %c0_12 = arith.constant 0 : index
    %c0_13 = arith.constant 0 : index
    %14 = vector.load %arg6[%c0_12, %c0_13] : memref<64x2048xf32, #tpu.memory_space<vmem>>, vector<64x2048xf32>
    %15 = arith.mulf %13, %14 : vector<64x2048xf32>
    %16 = vector.extract_strided_slice %15 {offsets = [0, 0], sizes = [64, 128], strides = [1, 1]} : vector<64x2048xf32> to vector<64x128xf32>
    %17 = vector.extract_strided_slice %15 {offsets = [0, 128], sizes = [64, 128], strides = [1, 1]} : vector<64x2048xf32> to vector<64x128xf32>
    %18 = arith.addf %16, %17 : vector<64x128xf32>
    %19 = vector.extract_strided_slice %15 {offsets = [0, 256], sizes = [64, 128], strides = [1, 1]} : vector<64x2048xf32> to vector<64x128xf32>
    %20 = arith.addf %18, %19 : vector<64x128xf32>
    %21 = vector.extract_strided_slice %15 {offsets = [0, 384], sizes = [64, 128], strides = [1, 1]} : vector<64x2048xf32> to vector<64x128xf32>
    %22 = arith.addf %20, %21 : vector<64x128xf32>
    %23 = vector.extract_strided_slice %15 {offsets = [0, 512], sizes = [64, 128], strides = [1, 1]} : vector<64x2048xf32> to vector<64x128xf32>
    %24 = arith.addf %22, %23 : vector<64x128xf32>
    %25 = vector.extract_strided_slice %15 {offsets = [0, 640], sizes = [64, 128], strides = [1, 1]} : vector<64x2048xf32> to vector<64x128xf32>
    %26 = arith.addf %24, %25 : vector<64x128xf32>
    %27 = vector.extract_strided_slice %15 {offsets = [0, 768], sizes = [64, 128], strides = [1, 1]} : vector<64x2048xf32> to vector<64x128xf32>
    %28 = arith.addf %26, %27 : vector<64x128xf32>
    %29 = vector.extract_strided_slice %15 {offsets = [0, 896], sizes = [64, 128], strides = [1, 1]} : vector<64x2048xf32> to vector<64x128xf32>
    %30 = arith.addf %28, %29 : vector<64x128xf32>
    %31 = vector.extract_strided_slice %15 {offsets = [0, 1024], sizes = [64, 128], strides = [1, 1]} : vector<64x2048xf32> to vector<64x128xf32>
    %32 = arith.addf %30, %31 : vector<64x128xf32>
    %33 = vector.extract_strided_slice %15 {offsets = [0, 1152], sizes = [64, 128], strides = [1, 1]} : vector<64x2048xf32> to vector<64x128xf32>
    %34 = arith.addf %32, %33 : vector<64x128xf32>
    %35 = vector.extract_strided_slice %15 {offsets = [0, 1280], sizes = [64, 128], strides = [1, 1]} : vector<64x2048xf32> to vector<64x128xf32>
    %36 = arith.addf %34, %35 : vector<64x128xf32>
    %37 = vector.extract_strided_slice %15 {offsets = [0, 1408], sizes = [64, 128], strides = [1, 1]} : vector<64x2048xf32> to vector<64x128xf32>
    %38 = arith.addf %36, %37 : vector<64x128xf32>
    %39 = vector.extract_strided_slice %15 {offsets = [0, 1536], sizes = [64, 128], strides = [1, 1]} : vector<64x2048xf32> to vector<64x128xf32>
    %40 = arith.addf %38, %39 : vector<64x128xf32>
    %41 = vector.extract_strided_slice %15 {offsets = [0, 1664], sizes = [64, 128], strides = [1, 1]} : vector<64x2048xf32> to vector<64x128xf32>
    %42 = arith.addf %40, %41 : vector<64x128xf32>
    %43 = vector.extract_strided_slice %15 {offsets = [0, 1792], sizes = [64, 128], strides = [1, 1]} : vector<64x2048xf32> to vector<64x128xf32>
    %44 = arith.addf %42, %43 : vector<64x128xf32>
    %45 = vector.extract_strided_slice %15 {offsets = [0, 1920], sizes = [64, 128], strides = [1, 1]} : vector<64x2048xf32> to vector<64x128xf32>
    %46 = arith.addf %44, %45 : vector<64x128xf32>
    %47 = arith.truncf %46 : vector<64x128xf32> to vector<64x128xbf16>
    %c0_14 = arith.constant 0 : index
    %c0_15 = arith.constant 0 : index
    %48 = vector.load %arg7[%c0_14, %c0_15] : memref<128x256xbf16, #tpu.memory_space<vmem>>, vector<128x256xbf16>
    %cst_16 = arith.constant dense<0.000000e+00> : vector<64x256xf32>
    %49 = tpu.matmul %47, %48, %cst_16 {dimension_numbers = #tpu.dot_dimension_numbers<[1], [0], [0], [1], [0, 0, 1, 1], [], []>} : vector<64x128xbf16>, vector<128x256xbf16>, vector<64x256xf32> -> vector<64x256xf32>
    %c0_17 = arith.constant 0 : index
    %c0_18 = arith.constant 0 : index
    %50 = vector.load %arg8[%c0_17, %c0_18] : memref<1x256xf32, #tpu.memory_space<vmem>>, vector<1x256xf32>
    %51 = vector.broadcast %50 : vector<1x256xf32> to vector<64x256xf32>
    %52 = arith.addf %49, %51 : vector<64x256xf32>
    %cst_19 = arith.constant 0.000000e+00 : f32
    %53 = vector.broadcast %cst_19 : f32 to vector<64x256xf32>
    %54 = arith.maximumf %52, %53 : vector<64x256xf32>
    %55 = arith.truncf %54 : vector<64x256xf32> to vector<64x256xbf16>
    %c0_20 = arith.constant 0 : index
    %c0_21 = arith.constant 0 : index
    %56 = vector.load %arg9[%c0_20, %c0_21] : memref<256x40xbf16, #tpu.memory_space<vmem>>, vector<256x40xbf16>
    %cst_22 = arith.constant dense<0.000000e+00> : vector<64x40xf32>
    %57 = tpu.matmul %55, %56, %cst_22 {dimension_numbers = #tpu.dot_dimension_numbers<[1], [0], [0], [1], [0, 0, 1, 1], [], []>} : vector<64x256xbf16>, vector<256x40xbf16>, vector<64x40xf32> -> vector<64x40xf32>
    %c0_23 = arith.constant 0 : index
    %c0_24 = arith.constant 0 : index
    %58 = vector.load %arg10[%c0_23, %c0_24] : memref<16x64xbf16, #tpu.memory_space<vmem>>, vector<16x64xbf16>
    %59 = arith.truncf %57 : vector<64x40xf32> to vector<64x40xbf16>
    %cst_25 = arith.constant dense<0.000000e+00> : vector<16x40xf32>
    %60 = tpu.matmul %58, %59, %cst_25 {dimension_numbers = #tpu.dot_dimension_numbers<[1], [0], [0], [1], [0, 0, 1, 1], [], []>} : vector<16x64xbf16>, vector<64x40xbf16>, vector<16x40xf32> -> vector<16x40xf32>
    %c0_26 = arith.constant 0 : index
    %c0_27 = arith.constant 0 : index
    %61 = vector.load %arg11[%c0_26, %c0_27] : memref<1x40xf32, #tpu.memory_space<vmem>>, vector<1x40xf32>
    %62 = vector.broadcast %61 : vector<1x40xf32> to vector<16x40xf32>
    %63 = arith.addf %60, %62 : vector<16x40xf32>
    %64 = vector.extract_strided_slice %63 {offsets = [0, 0], sizes = [16, 8], strides = [1, 1]} : vector<16x40xf32> to vector<16x8xf32>
    %cst_28 = arith.constant dense<0xFF800000> : vector<16xf32>
    %65 = vector.multi_reduction <maximumf>, %64, %cst_28 [1] : vector<16x8xf32> to vector<16xf32>
    %66 = vector.shape_cast %65 : vector<16xf32> to vector<16x1xf32>
    %67 = vector.broadcast %66 : vector<16x1xf32> to vector<16x8xf32>
    %68 = arith.subf %64, %67 : vector<16x8xf32>
    %69 = math.exp %68 : vector<16x8xf32>
    %cst_29 = arith.constant dense<0.000000e+00> : vector<16xf32>
    %70 = vector.multi_reduction <add>, %69, %cst_29 [1] : vector<16x8xf32> to vector<16xf32>
    %71 = vector.shape_cast %70 : vector<16xf32> to vector<16x1xf32>
    %72 = vector.broadcast %71 : vector<16x1xf32> to vector<16x8xf32>
    %73 = arith.divf %69, %72 : vector<16x8xf32>
    %c0_30 = arith.constant 0 : index
    %c0_31 = arith.constant 0 : index
    %74 = vector.load %arg12[%c0_30, %c0_31] : memref<16x40xf32, #tpu.memory_space<vmem>>, vector<16x40xf32>
    tpu.vector_store %arg12[%c0_30, %c0_31], %63 {strides = array<i32>} : memref<16x40xf32, #tpu.memory_space<vmem>>, vector<16x40xf32>,
    %c0_32 = arith.constant 0 : index
    %c0_33 = arith.constant 0 : index
    %75 = vector.load %arg12[%c0_32, %c0_33] : memref<16x40xf32, #tpu.memory_space<vmem>>, vector<16x8xf32>
    tpu.vector_store %arg12[%c0_32, %c0_33], %73 {strides = array<i32>} : memref<16x40xf32, #tpu.memory_space<vmem>>, vector<16x8xf32>,
    return
  }
  func.func @transform_0(%arg0: i32) -> (i32, i32) {
    %c0_i32 = arith.constant 0 : i32
    %c0_i32_0 = arith.constant 0 : i32
    %c0_i32_1 = arith.constant 0 : i32
    return %c0_i32, %c0_i32_0 : i32, i32
  }
  func.func @transform_1(%arg0: i32) -> (i32, i32) {
    %c0_i32 = arith.constant 0 : i32
    %c0_i32_0 = arith.constant 0 : i32
    %c0_i32_1 = arith.constant 0 : i32
    return %c0_i32, %c0_i32_0 : i32, i32
  }
  func.func @transform_2(%arg0: i32) -> (i32, i32) {
    %c0_i32 = arith.constant 0 : i32
    %c0_i32_0 = arith.constant 0 : i32
    %c0_i32_1 = arith.constant 0 : i32
    return %c0_i32, %c0_i32_0 : i32, i32
  }
  func.func @transform_3(%arg0: i32) -> (i32, i32) {
    %c0_i32 = arith.constant 0 : i32
    %c0_i32_0 = arith.constant 0 : i32
    %c0_i32_1 = arith.constant 0 : i32
    return %c0_i32, %c0_i32_0 : i32, i32
  }
  func.func @transform_4(%arg0: i32) -> (i32, i32) {
    %c0_i32 = arith.constant 0 : i32
    %c0_i32_0 = arith.constant 0 : i32
    %c0_i32_1 = arith.constant 0 : i32
    return %c0_i32, %c0_i32_0 : i32, i32
  }
  func.func @transform_5(%arg0: i32) -> (i32, i32) {
    %c0_i32 = arith.constant 0 : i32
    %c0_i32_0 = arith.constant 0 : i32
    %c0_i32_1 = arith.constant 0 : i32
    return %c0_i32, %c0_i32_0 : i32, i32
  }
  func.func @transform_6(%arg0: i32) -> (i32, i32) {
    %c0_i32 = arith.constant 0 : i32
    %c0_i32_0 = arith.constant 0 : i32
    %c0_i32_1 = arith.constant 0 : i32
    return %c0_i32, %c0_i32_0 : i32, i32
  }
  func.func @transform_7(%arg0: i32) -> (i32, i32) {
    %c0_i32 = arith.constant 0 : i32
    %c0_i32_0 = arith.constant 0 : i32
    %c0_i32_1 = arith.constant 0 : i32
    return %c0_i32, %c0_i32_0 : i32, i32
  }
  func.func @transform_8(%arg0: i32) -> (i32, i32) {
    %c0_i32 = arith.constant 0 : i32
    %c0_i32_0 = arith.constant 0 : i32
    %c0_i32_1 = arith.constant 0 : i32
    return %c0_i32, %c0_i32_0 : i32, i32
  }
  func.func @transform_9(%arg0: i32) -> (i32, i32) {
    %c0_i32 = arith.constant 0 : i32
    %c0_i32_0 = arith.constant 0 : i32
    %c0_i32_1 = arith.constant 0 : i32
    return %c0_i32, %c0_i32_0 : i32, i32
  }
  func.func @transform_10(%arg0: i32) -> (i32, i32) {
    %c0_i32 = arith.constant 0 : i32
    %c0_i32_0 = arith.constant 0 : i32
    %c0_i32_1 = arith.constant 0 : i32
    return %c0_i32, %c0_i32_0 : i32, i32
  }
  func.func @transform_11(%arg0: i32) -> (i32, i32) {
    %c0_i32 = arith.constant 0 : i32
    %c0_i32_0 = arith.constant 0 : i32
    %c0_i32_1 = arith.constant 0 : i32
    return %c0_i32, %c0_i32_0 : i32, i32
  }
}

</mosaic_0001>

<bundles_post_ra>
// kernel: faster_rcnn_forward.1
= control target key start
LH: loop header
LB: loop body
LE: loop exit
PB: predicated region body
PF: predicated region fallthrough
CT: control target
= control target key end

     0   :  { %16 = vsyncpa [#allocation3], 0  ;;  %s7994_s0 = inlined_call_operand.vmem [shape: bf16[32,192], index: 0, kind: input, shape index: {}]   ;;  %s7995_s1 = inlined_call_operand.hbm [shape: bf16[192,512], index: 1, kind: input, shape index: {}]   ;;  %s7996_s2 = inlined_call_operand.hbm [shape: f32[1,512], index: 2, kind: input, shape index: {}]   ;;  %s7997_s3 = inlined_call_operand.hbm [shape: bf16[512,2048], index: 3, kind: input, shape index: {}]   ;;  %s7998_s4 = inlined_call_operand.vmem [shape: bf16[64,32], index: 4, kind: input, shape index: {}]   ;;  %s7999_s5 = inlined_call_operand.hbm [shape: f32[64,2048], index: 5, kind: input, shape index: {}]   ;;  %s8000_s6 = inlined_call_operand.hbm [shape: bf16[128,256], index: 6, kind: input, shape index: {}]   ;;  %s8001_s7 = inlined_call_operand.hbm [shape: f32[1,256], index: 7, kind: input, shape index: {}]   ;;  %s8002_s8 = inlined_call_operand.vmem [shape: bf16[256,40], index: 8, kind: input, shape index: {}]   ;;  %s8003_s9 = inlined_call_operand.hbm [shape: bf16[16,64], index: 9, kind: input, shape index: {}]   ;;  %s8004_s10 = inlined_call_operand.hbm [shape: f32[1,40], index: 10, kind: input, shape index: {}]   ;;  %s8005_s11 = inlined_call_operand.vmem [shape: f32[16,40], index: 11, kind: output, shape index: {}]  }
   0x1   :  { %17 = vsyncpa [#allocation5], 0 }
   0x2   :  { %18 = vsyncpa [#allocation8], 0 }
   0x3   :  { %19 = vsyncpa [#allocation11], 0 }
   0x4   :  { %20 = vsyncpa [#allocation14], 0  ;;  %s7081_s17 = smov [#allocation4]   ;;  %s7082_s19 = smov [#allocation7]  }
   0x5   :  { %s41_s18 = sshll.u32 %s7081_s17, 4  ;;  %s64_s20 = sshll.u32 %s7082_s19, 4  ;;  %s42_s18 = int_to_ptr.vmem [resolvable:$true] %s41_s18  ;;  %s65_s20 = int_to_ptr.vmem [resolvable:$true] %s64_s20 }
   0x6   :  { %s6919_s21 = scalar_lea.vmem %s42_s18, 64  ;;  %p6924_p1 = scmp.lt.s32.totalorder %s42_s18, %s42_s18 }
   0x7   :  { %p6920_p0 = scmp.ne.s32.totalorder %s42_s18, %s6919_s21  ;;  %p6925_p2 = scmp.lt.s32.totalorder %s6919_s21, %s6919_s21 }
   0x9   :  { %p6926_p3 = por %p6925_p2, %p6924_p1 }
   0xb   :  { %p6927_p4 = pnand %p6926_p3, %p6920_p0 }
   0xd   :  { %6930 = shalt.err (!%p6927_p4)
}
   0xe   :  { %44 = dma.hbm_to_vmem [thread:$0]  %s7996_s2, 64, %s42_s18, [#allocation5]  }
   0xf   :  { %s6939_s24 = scalar_lea.vmem %s65_s20, 16384  ;;  %p6944_p6 = scmp.lt.s32.totalorder %s65_s20, %s65_s20 }
  0x10   :  { %p6940_p5 = scmp.ne.s32.totalorder %s65_s20, %s6939_s24  ;;  %p6945_p7 = scmp.lt.s32.totalorder %s6939_s24, %s6939_s24 }
  0x12   :  { %p6946_p8 = por %p6945_p7, %p6944_p6 }
  0x14   :  { %p6947_p9 = pnand %p6946_p8, %p6940_p5 }
  0x16   :  { %6950 = shalt.err (!%p6947_p9)
}
  0x17   :  { %s7083_s25 = smov 2048   ;;  %s7084_s26 = smov 128  }
  0x18   :  { %70 = dma.hbm_to_vmem [thread:$0]  %s7999_s5, 16384, %s65_s20, [#allocation8], %s7083_s25, %s7083_s25, %s7084_s26  }
  0x19   :  { %s7085_s29 = smov [#allocation10]   ;;  %s7086_s12 = smov [#allocation2]  }
  0x1a   :  { %s89_s30 = sshll.u32 %s7085_s29, 4  ;;  %s28_s13 = sshll.u32 %s7086_s12, 4  ;;  %s90_s30 = int_to_ptr.vmem [resolvable:$true] %s89_s30  ;;  %s29_s13 = int_to_ptr.vmem [resolvable:$true] %s28_s13 }
  0x1b   :  { %s6959_s2 = scalar_lea.vmem %s90_s30, 32  ;;  %p6964_p11 = scmp.lt.s32.totalorder %s90_s30, %s90_s30 }
  0x1c   :  { %p6960_p10 = scmp.ne.s32.totalorder %s90_s30, %s6959_s2  ;;  %p6965_p12 = scmp.lt.s32.totalorder %s6959_s2, %s6959_s2 }
  0x1e   :  { %p6966_p13 = por %p6965_p12, %p6964_p11 }
  0x20   :  { %p6967_p0 = pnand %p6966_p13, %p6960_p10 }
  0x22   :  { %6970 = shalt.err (!%p6967_p0)
}
  0x23   :  { %92 = dma.hbm_to_vmem [thread:$0]  %s8001_s7, 32, %s90_s30, [#allocation11]  }
  0x24   :  { %s6979_s16 = scalar_lea.vmem %s29_s13, 6144  ;;  %p6984_p2 = scmp.lt.s32.totalorder %s29_s13, %s29_s13 }
  0x25   :  { %p6980_p1 = scmp.ne.s32.totalorder %s29_s13, %s6979_s16  ;;  %p6985_p3 = scmp.lt.s32.totalorder %s6979_s16, %s6979_s16 }
  0x27   :  { %p6986_p4 = por %p6985_p3, %p6984_p2 }
  0x29   :  { %p6987_p5 = pnand %p6986_p4, %p6980_p1 }
  0x2b   :  { %6990 = shalt.err (!%p6987_p5)
}
  0x2c   :  { %s7087_s5 = smov 256   ;;  %s7088_s17 = smov 16  }
  0x2d   :  { %34 = dma.hbm_to_vmem [thread:$0]  %s7995_s1, 6144, %s29_s13, [#allocation3], %s7087_s5, %s7087_s5, %s7088_s17  }
  0x2e   :  { %s7089_s20 = smov [#allocation6]  }
  0x2f   :  { %s50_s21 = sshll.u32 %s7089_s20, 4  ;;  %s51_s21 = int_to_ptr.vmem [resolvable:$true] %s50_s21 }
  0x30   :  { %s6999_s22 = scalar_lea.vmem %s51_s21, 65536  ;;  %p7004_p7 = scmp.lt.s32.totalorder %s51_s21, %s51_s21 }
  0x31   :  { %p7000_p6 = scmp.ne.s32.totalorder %s51_s21, %s6999_s22  ;;  %p7005_p8 = scmp.lt.s32.totalorder %s6999_s22, %s6999_s22 }
  0x33   :  { %p7006_p9 = por %p7005_p8, %p7004_p7 }
  0x35   :  { %p7007_p10 = pnand %p7006_p9, %p7000_p6 }
  0x37   :  { %7010 = shalt.err (!%p7007_p10)
}
  0x38   :  { %s7090_s7 = smov 1024   ;;  %s7091_s23 = smov 64  }
  0x39   :  { %56 = dma.hbm_to_vmem [thread:$0]  %s7997_s3, 65536, %s51_s21, [#allocation5], %s7090_s7, %s7090_s7, %s7091_s23  }
  0x3a   :  { %s7092_s27 = smov [#allocation9]  }
  0x3b   :  { %s76_s28 = sshll.u32 %s7092_s27, 4  ;;  %s77_s28 = int_to_ptr.vmem [resolvable:$true] %s76_s28 }
  0x3c   :  { %s7019_s1 = scalar_lea.vmem %s77_s28, 2048  ;;  %p7024_p12 = scmp.lt.s32.totalorder %s77_s28, %s77_s28 }
  0x3d   :  { %p7020_p11 = scmp.ne.s32.totalorder %s77_s28, %s7019_s1  ;;  %p7025_p13 = scmp.lt.s32.totalorder %s7019_s1, %s7019_s1 }
  0x3f   :  { %p7026_p0 = por %p7025_p13, %p7024_p12 }
  0x41   :  { %p7027_p1 = pnand %p7026_p0, %p7020_p11 }
  0x43   :  { %7030 = shalt.err (!%p7027_p1)
}
  0x44   :  { %s7093_s29 = smov 8   ;;  %s7094_s13 = smov [#allocation12]  }
  0x45   :  { %82 = dma.hbm_to_vmem [thread:$0]  %s8000_s6, 2048, %s77_s28, [#allocation8], %s7084_s26, %s7084_s26, %s7093_s29  }
  0x46   :  { %s100_s2 = sshll.u32 %s7094_s13, 4  ;;  %s101_s2 = int_to_ptr.vmem [resolvable:$true] %s100_s2 }
  0x47   :  { %s7039_s3 = scalar_lea.vmem %s101_s2, 128  ;;  %p7044_p3 = scmp.lt.s32.totalorder %s101_s2, %s101_s2 }
  0x48   :  { %p7040_p2 = scmp.ne.s32.totalorder %s101_s2, %s7039_s3  ;;  %p7045_p4 = scmp.lt.s32.totalorder %s7039_s3, %s7039_s3 }
  0x4a   :  { %p7046_p5 = por %p7045_p4, %p7044_p3 }
  0x4c   :  { %p7047_p6 = pnand %p7046_p5, %p7040_p2 }
  0x4e   :  { %7050 = shalt.err (!%p7047_p6)
}
  0x4f   :  { %s7095_s14 = smov 4   ;;  %s7096_s5 = smov [#allocation13]  }
  0x50   :  { %106 = dma.hbm_to_vmem [thread:$0]  %s8003_s9, 128, %s101_s2, [#allocation11], %s7091_s23, %s7091_s23, %s7095_s14  }
  0x51   :  { %s113_s17 = sshll.u32 %s7096_s5, 4  ;;  %s114_s17 = int_to_ptr.vmem [resolvable:$true] %s113_s17 }
  0x52   :  { %s7059_s18 = scalar_lea.vmem %s114_s17, 16  ;;  %s7063_s6 = scalar_lea.vmem %s114_s17, 32 }
  0x53   :  { %p7060_p7 = scmp.ne.s32.totalorder %s114_s17, %s7059_s18  ;;  %p7064_p8 = scmp.lt.s32.totalorder %s114_s17, %s114_s17 }
  0x54   :  { %p7065_p9 = scmp.lt.s32.totalorder %s7063_s6, %s7059_s18 }
  0x56   :  { %p7066_p10 = por %p7065_p9, %p7064_p8 }
  0x58   :  { %p7067_p11 = pnand %p7066_p10, %p7060_p7 }
  0x5a   :  { %7070 = shalt.err (!%p7067_p11)
}
  0x5b   :  { %116 = dma.hbm_to_vmem [thread:$0]  %s8004_s10, 16, %s114_s17, [#allocation14]  }
  0x5c   :  { %7071 = dma.done.wait [#allocation3], 6144  }
  0x5d   :  { %7072 = vsyncadd [#allocation3], 4294961152 }
  0x5e   :  { %7073 = dma.done.wait [#allocation5], 65600  }
  0x5f   :  { %7074 = vsyncadd [#allocation5], 4294901696 }
  0x60   :  { %7075 = dma.done.wait [#allocation8], 18432  }
  0x61   :  { %7076 = vsyncadd [#allocation8], 4294948864 }
  0x62   :  { %7077 = dma.done.wait [#allocation11], 160  }
  0x63   :  { %7078 = vsyncadd [#allocation11], 4294967136 }
  0x64   :  { %7079 = dma.done.wait [#allocation14], 16  }
  0x65   :  { %7080 = vsyncadd [#allocation14], 4294967280  ;;  %v6780_v0 = vld [vmem:[#allocation2 + $0xe4] ss:$16 sps:$4 sm:$0xff]   ;;  %v6782_v1 = vld [vmem:[#allocation2 + $0xec] ss:$16 sps:$4 sm:$0xff]  }
  0x66   :  { %481 = vmatprep.subr.bf16.mxu0 %v6780_v0  ;;  %v6784_v2 = vld [vmem:[#allocation2 + $0xe0] ss:$16 sps:$4 sm:$0xff]   ;;  %v6785_v3 = vld [vmem:[#allocation2 + $0xe8] ss:$16 sps:$4 sm:$0xff]   ;;  %534 = vmatprep.subr.bf16.mxu1 %v6782_v1  ;;  %v6786_v4 = vld [vmem:[#allocation2 + $0xc4] ss:$16 sps:$4 sm:$0xff]  }
  0x67   :  { %482 = vmatpush1.bf16.msra.mxu0 %v6784_v2  ;;  %535 = vmatpush1.bf16.msra.mxu1 %v6785_v3  ;;  %v6788_v5 = vld [vmem:[#allocation2 + $0xcc] ss:$16 sps:$4 sm:$0xff]   ;;  %v6790_v6 = vld [vmem:[#allocation2 + $0xc0] ss:$16 sps:$4 sm:$0xff]   ;;  %v6791_v7 = vld [vmem:[#allocation2 + $0xc8] ss:$16 sps:$4 sm:$0xff]  }
  0x68   :  { %483 = vmatprep.subr.bf16.mxu0 %v6786_v4  ;;  %536 = vmatprep.subr.bf16.mxu1 %v6788_v5  ;;  %v6792_v8 = vld [vmem:[#allocation2 + $0xa4] ss:$16 sps:$4 sm:$0xff]   ;;  %v6794_v9 = vld [vmem:[#allocation2 + $0xac] ss:$16 sps:$4 sm:$0xff]   ;;  %v6796_v10 = vld [vmem:[#allocation2 + $0xa0] ss:$16 sps:$4 sm:$0xff]  }
  0x69   :  { %v6797_v11 = vld [vmem:[#allocation2 + $0xa8] ss:$16 sps:$4 sm:$0xff]   ;;  %v6798_v12 = vld [vmem:[#allocation2 + $0x84] ss:$16 sps:$4 sm:$0xff]   ;;  %v6800_v13 = vld [vmem:[#allocation2 + $0x8c] ss:$16 sps:$4 sm:$0xff]  }
  0x6a   :  { %v6802_v14 = vld [vmem:[#allocation2 + $0x80] ss:$16 sps:$4 sm:$0xff]   ;;  %v6803_v15 = vld [vmem:[#allocation2 + $0x88] ss:$16 sps:$4 sm:$0xff]   ;;  %v6804_v16 = vld [vmem:[#allocation2 + $0x64] ss:$16 sps:$4 sm:$0xff]  }
  0x6b   :  { %484 = vmatpush1.bf16.msra.mxu0 %v6790_v6  ;;  %537 = vmatpush1.bf16.msra.mxu1 %v6791_v7  ;;  %v6806_v17 = vld [vmem:[#allocation2 + $0x6c] ss:$16 sps:$4 sm:$0xff]   ;;  %v6808_v18 = vld [vmem:[#allocation2 + $0x60] ss:$16 sps:$4 sm:$0xff]   ;;  %v6809_v19 = vld [vmem:[#allocation2 + $0x68] ss:$16 sps:$4 sm:$0xff]  }
  0x6c   :  { %485 = vmatprep.subr.bf16.mxu0 %v6792_v8  ;;  %538 = vmatprep.subr.bf16.mxu1 %v6794_v9  ;;  %v6810_v20 = vld [vmem:[#allocation2 + $0x44] ss:$16 sps:$4 sm:$0xff]   ;;  %v6812_v21 = vld [vmem:[#allocation2 + $0x4c] ss:$16 sps:$4 sm:$0xff]   ;;  %v6814_v22 = vld [vmem:[#allocation2 + $0x40] ss:$16 sps:$4 sm:$0xff]  }
  0x6d   :  { %v6815_v23 = vld [vmem:[#allocation2 + $0x48] ss:$16 sps:$4 sm:$0xff]   ;;  %v6816_v24 = vld [vmem:[#allocation2 + $0x24] ss:$16 sps:$4 sm:$0xff]   ;;  %v6818_v25 = vld [vmem:[#allocation2 + $0x2c] ss:$16 sps:$4 sm:$0xff]  }
  0x6e   :  { %v6820_v26 = vld [vmem:[#allocation2 + $0x20] ss:$16 sps:$4 sm:$0xff]   ;;  %v6821_v27 = vld [vmem:[#allocation2 + $0x28] ss:$16 sps:$4 sm:$0xff]   ;;  %v6822_v28 = vld [vmem:[#allocation2 + $0x4] ss:$16 sps:$4 sm:$0xff]  }
  0x6f   :  { %486 = vmatpush1.bf16.msra.mxu0 %v6796_v10  ;;  %539 = vmatpush1.bf16.msra.mxu1 %v6797_v11  ;;  %v6824_v29 = vld [vmem:[#allocation2 + $0xc] ss:$16 sps:$4 sm:$0xff]   ;;  %v6826_v30 = vld [vmem:[#allocation2] ss:$16 sps:$4 sm:$0xff]   ;;  %v6827_v31 = vld [vmem:[#allocation2 + $0x8] ss:$16 sps:$4 sm:$0xff]  }
  0x70   :  { %487 = vmatprep.subr.bf16.mxu0 %v6798_v12  ;;  %540 = vmatprep.subr.bf16.mxu1 %v6800_v13  ;;  %v6828_v32 = vld [vmem:[#allocation2 + $0x164] ss:$16 sps:$4 sm:$0xff]   ;;  %v6830_v33 = vld [vmem:[#allocation2 + $0x16c] ss:$16 sps:$4 sm:$0xff]   ;;  %v6832_v34 = vld [vmem:[#allocation2 + $0x160] ss:$16 sps:$4 sm:$0xff]  }
  0x71   :  { %v6833_v35 = vld [vmem:[#allocation2 + $0x168] ss:$16 sps:$4 sm:$0xff]   ;;  %v6834_v36 = vld [vmem:[#allocation2 + $0x144] ss:$16 sps:$4 sm:$0xff]   ;;  %v6836_v37 = vld [vmem:[#allocation2 + $0x14c] ss:$16 sps:$4 sm:$0xff]  }
  0x72   :  { %vm474_vm0 = vcmask 523264   ;;  %v6854_v38 = vld [vmem:[%s7994_s0 + $0x4] ss:$8 sps:$4 sm:$0xff]   ;;  %v6838_v39 = vld [vmem:[#allocation2 + $0x140] ss:$16 sps:$4 sm:$0xff]   ;;  %vm4591_vm1 = vcmask 261120  }
  0x73   :  { %488 = vmatpush1.bf16.msra.mxu0 %v6802_v14  ;;  %541 = vmatpush1.bf16.msra.mxu1 %v6803_v15  ;;  %v6839_v40 = vld [vmem:[#allocation2 + $0x148] ss:$16 sps:$4 sm:$0xff]   ;;  %v6840_v41 = vld [vmem:[#allocation2 + $0x124] ss:$16 sps:$4 sm:$0xff]   ;;  %v6842_v42 = vld [vmem:[#allocation2 + $0x12c] ss:$16 sps:$4 sm:$0xff]  }
  0x74   :  { %489 = vmatprep.subr.bf16.mxu0 %v6804_v16  ;;  %542 = vmatprep.subr.bf16.mxu1 %v6806_v17  ;;  %v6844_v43 = vld [vmem:[#allocation2 + $0x120] ss:$16 sps:$4 sm:$0xff]   ;;  %v6845_v44 = vld [vmem:[#allocation2 + $0x128] ss:$16 sps:$4 sm:$0xff]   ;;  %v6846_v45 = vld [vmem:[#allocation2 + $0x104] ss:$16 sps:$4 sm:$0xff]  }
  0x75   :  { %6117 = vmatprep.mubr.msk.bf16.mxu0 %vm474_vm0, %v6854_v38  ;;  %6119 = vmatprep.mubr.msk.bf16.mxu1 %vm474_vm0, %v6854_v38  ;;  %v6848_v46 = vld [vmem:[#allocation2 + $0x10c] ss:$16 sps:$4 sm:$0xff]   ;;  %v723_v47 = vld [vmem:[#allocation6 + $0x380] sm:$0xff]  ;;  %v6850_v51 = vld [vmem:[#allocation2 + $0x100] ss:$16 sps:$4 sm:$0xff]   ;;  %vm7099_vm2 = vmmov 0  }
  0x76   :  { %v731_v48 = vld [vmem:[#allocation6 + $0x3c0] sm:$0xff]  ;;  %v6855_v60 = vld [vmem:[%s7994_s0 + $0x14] ss:$8 sps:$4 sm:$0xff]   ;;  %v6857_v5 = vld [vmem:[%s7994_s0 + $0x10] ss:$8 sps:$4 sm:$0xff]   ;;  %vm6051_vm3 = vcmask 326656  }
  0x77   :  { %490 = vmatpush1.bf16.msra.mxu0 %v6808_v18  ;;  %543 = vmatpush1.bf16.msra.mxu1 %v6809_v19  ;;  %v979_v49 = vld [vmem:[#allocation6 + $0xb80] sm:$0xff]  ;;  %v6234_v53 = vcombine.high %v723_v47, %v731_v48  ;;  %v6233_v61 = vcombine.low %v723_v47, %v731_v48  ;;  %vm6028_vm4 = vcmask 64512  }
  0x78   :  { %491 = vmatprep.subr.bf16.mxu0 %v6810_v20  ;;  %544 = vmatprep.subr.bf16.mxu1 %v6812_v21  ;;  %v987_v50 = vld [vmem:[#allocation6 + $0xbc0] sm:$0xff] }
  0x79   :  { %v6851_v52 = vld [vmem:[#allocation2 + $0x108] ss:$16 sps:$4 sm:$0xff]   ;;  %v6490_v54 = vcombine.high %v979_v49, %v987_v50  ;;  %v6489_v62 = vcombine.low %v979_v49, %v987_v50 }
  0x7a   :  { %v6852_v55 = vld [vmem:[%s7994_s0] ss:$8 sps:$4 sm:$0xff]  }
  0x7b   :  { %492 = vmatpush1.bf16.msra.mxu0 %v6814_v22  ;;  %545 = vmatpush1.bf16.msra.mxu1 %v6815_v23  ;;  %v707_v56 = vld [vmem:[#allocation6 + $0x300] sm:$0xff] }
  0x7c   :  { %493 = vmatprep.subr.bf16.mxu0 %v6816_v24  ;;  %546 = vmatprep.subr.bf16.mxu1 %v6818_v25  ;;  %v715_v57 = vld [vmem:[#allocation6 + $0x340] sm:$0xff] }
  0x7d   :  { %v963_v58 = vld [vmem:[#allocation6 + $0xb00] sm:$0xff]  ;;  %v6218_v63 = vcombine.high %v707_v56, %v715_v57  ;;  %v6217_v6 = vcombine.low %v707_v56, %v715_v57 }
  0x7e   :  { %v971_v59 = vld [vmem:[#allocation6 + $0xb40] sm:$0xff] }
  0x7f   :  { %494 = vmatpush1.bf16.msra.mxu0 %v6820_v26  ;;  %547 = vmatpush1.bf16.msra.mxu1 %v6821_v27  ;;  %v6474_v0 = vcombine.high %v963_v58, %v971_v59  ;;  %v691_v1 = vld [vmem:[#allocation6 + $0x280] sm:$0xff]  ;;  %v6473_v7 = vcombine.low %v963_v58, %v971_v59 }
  0x80   :  { %495 = vmatprep.subr.bf16.mxu0 %v6822_v28  ;;  %548 = vmatprep.subr.bf16.mxu1 %v6824_v29  ;;  %v699_v2 = vld [vmem:[#allocation6 + $0x2c0] sm:$0xff] }
  0x81   :  { %v947_v3 = vld [vmem:[#allocation6 + $0xa80] sm:$0xff]  ;;  %v6202_v12 = vcombine.high %v691_v1, %v699_v2  ;;  %v6201_v14 = vcombine.low %v691_v1, %v699_v2 }
  0x82   :  { %v955_v4 = vld [vmem:[#allocation6 + $0xac0] sm:$0xff] }
  0x83   :  { %496 = vmatpush1.bf16.msra.mxu0 %v6826_v30  ;;  %549 = vmatpush1.bf16.msra.mxu1 %v6827_v31  ;;  %v675_v8 = vld [vmem:[#allocation6 + $0x200] sm:$0xff]  ;;  %v6458_v13 = vcombine.high %v947_v3, %v955_v4  ;;  %v6457_v15 = vcombine.low %v947_v3, %v955_v4 }
  0x84   :  { %505 = vmatprep.subr.bf16.mxu0 %v6828_v32  ;;  %558 = vmatprep.subr.bf16.mxu1 %v6830_v33  ;;  %v683_v9 = vld [vmem:[#allocation6 + $0x240] sm:$0xff] }
  0x85   :  { %v931_v10 = vld [vmem:[#allocation6 + $0xa00] sm:$0xff]  ;;  %v6186_v20 = vcombine.high %v675_v8, %v683_v9  ;;  %v6185_v22 = vcombine.low %v675_v8, %v683_v9 }
  0x86   :  { %v939_v11 = vld [vmem:[#allocation6 + $0xa40] sm:$0xff] }
  0x87   :  { %506 = vmatpush2.bf16.msra.mxu0 %v6832_v34  ;;  %559 = vmatpush2.bf16.msra.mxu1 %v6833_v35  ;;  %v659_v16 = vld [vmem:[#allocation6 + $0x180] sm:$0xff]  ;;  %v6442_v21 = vcombine.high %v931_v10, %v939_v11  ;;  %v6441_v23 = vcombine.low %v931_v10, %v939_v11 }
  0x88   :  { %507 = vmatprep.subr.bf16.mxu0 %v6834_v36  ;;  %560 = vmatprep.subr.bf16.mxu1 %v6836_v37  ;;  %v667_v17 = vld [vmem:[#allocation6 + $0x1c0] sm:$0xff] }
  0x89   :  { %v915_v18 = vld [vmem:[#allocation6 + $0x980] sm:$0xff]  ;;  %v6170_v28 = vcombine.high %v659_v16, %v667_v17  ;;  %v6169_v30 = vcombine.low %v659_v16, %v667_v17 }
  0x8a   :  { %v923_v19 = vld [vmem:[#allocation6 + $0x9c0] sm:$0xff] }
  0x8b   :  { %508 = vmatpush2.bf16.msra.mxu0 %v6838_v39  ;;  %561 = vmatpush2.bf16.msra.mxu1 %v6839_v40  ;;  %v643_v24 = vld [vmem:[#allocation6 + $0x100] sm:$0xff]  ;;  %v6426_v29 = vcombine.high %v915_v18, %v923_v19  ;;  %v6425_v31 = vcombine.low %v915_v18, %v923_v19 }
  0x8c   :  { %509 = vmatprep.subr.bf16.mxu0 %v6840_v41  ;;  %562 = vmatprep.subr.bf16.mxu1 %v6842_v42  ;;  %v651_v25 = vld [vmem:[#allocation6 + $0x140] sm:$0xff] }
  0x8d   :  { %v899_v26 = vld [vmem:[#allocation6 + $0x900] sm:$0xff]  ;;  %v6154_v36 = vcombine.high %v643_v24, %v651_v25  ;;  %v6153_v38 = vcombine.low %v643_v24, %v651_v25 }
  0x8e   :  { %v907_v27 = vld [vmem:[#allocation6 + $0x940] sm:$0xff] }
  0x8f   :  { %510 = vmatpush2.bf16.msra.mxu0 %v6844_v43  ;;  %563 = vmatpush2.bf16.msra.mxu1 %v6845_v44  ;;  %v627_v32 = vld [vmem:[#allocation6 + $0x80] sm:$0xff]  ;;  %v6410_v37 = vcombine.high %v899_v26, %v907_v27  ;;  %v6409_v39 = vcombine.low %v899_v26, %v907_v27 }
  0x90   :  { %511 = vmatprep.subr.bf16.mxu0 %v6846_v45  ;;  %564 = vmatprep.subr.bf16.mxu1 %v6848_v46  ;;  %v635_v33 = vld [vmem:[#allocation6 + $0xc0] sm:$0xff] }
  0x91   :  { %v883_v34 = vld [vmem:[#allocation6 + $0x880] sm:$0xff]  ;;  %v6138_v43 = vcombine.high %v627_v32, %v635_v33  ;;  %v6137_v46 = vcombine.low %v627_v32, %v635_v33 }
  0x92   :  { %v891_v35 = vld [vmem:[#allocation6 + $0x8c0] sm:$0xff] }
  0x93   :  { %512 = vmatpush2.bf16.msra.mxu0 %v6850_v51  ;;  %565 = vmatpush2.bf16.msra.mxu1 %v6851_v52  ;;  %v611_v40 = vld [vmem:[#allocation6] sm:$0xff]  ;;  %v6394_v44 = vcombine.high %v883_v34, %v891_v35  ;;  %v6393_v47 = vcombine.low %v883_v34, %v891_v35 }
  0x94   :  { %3683 = vmatprep.subr.bf16.mxu0 %v6234_v53  ;;  %3736 = vmatprep.subr.bf16.mxu1 %v6490_v54  ;;  %v619_v41 = vld [vmem:[#allocation6 + $0x40] sm:$0xff] }
  0x95   :  { %v867_v42 = vld [vmem:[#allocation6 + $0x800] sm:$0xff]  ;;  %v6122_v48 = vcombine.high %v611_v40, %v619_v41  ;;  %v6121_v54 = vcombine.low %v611_v40, %v619_v41 }
  0x96   :  { %514 = vmatmul.mubr.bf16.vlgmr.msra.gmra.mxu0 %v6852_v55  ;;  %567 = vmatmul.mubr.bf16.vlgmr.msra.gmra.mxu1 %v6852_v55  ;;  %v875_v45 = vld [vmem:[#allocation6 + $0x840] sm:$0xff] }
  0x97   :  { %6118 = vmatprep.mubr.msk.bf16.mxu0 %vm474_vm0, %v6855_v60  ;;  %6120 = vmatprep.mubr.msk.bf16.mxu1 %vm474_vm0, %v6855_v60  ;;  %v6378_v49 = vcombine.high %v867_v42, %v875_v45  ;;  %v851_v50 = vld [vmem:[#allocation6 + $0x780] sm:$0xff]  ;;  %v6377_v55 = vcombine.low %v867_v42, %v875_v45 }
  0x98   :  { %3684 = vmatpush1.bf16.msra.mxu0 %v6233_v61  ;;  %3737 = vmatpush1.bf16.msra.mxu1 %v6489_v62  ;;  %v859_v51 = vld [vmem:[#allocation6 + $0x7c0] sm:$0xff] }
  0x99   :  { %3685 = vmatprep.subr.bf16.mxu0 %v6218_v63  ;;  %3738 = vmatprep.subr.bf16.mxu1 %v6474_v0  ;;  %v1107_v52 = vld [vmem:[#allocation6 + $0xf80] sm:$0xff]  ;;  %v6362_v56 = vcombine.high %v851_v50, %v859_v51  ;;  %v6361_v62 = vcombine.low %v851_v50, %v859_v51 }
  0x9a   :  { %v1115_v53 = vld [vmem:[#allocation6 + $0xfc0] sm:$0xff] }
  0x9b   :  { %v6618_v57 = vcombine.high %v1107_v52, %v1115_v53  ;;  %v835_v58 = vld [vmem:[#allocation6 + $0x700] sm:$0xff]  ;;  %v6617_v63 = vcombine.low %v1107_v52, %v1115_v53  ;;  %v7203_v52 = vld [vmem:[#allocation6 + $0x388] sm:$0xff] }
  0x9c   :  { %3686 = vmatpush1.bf16.msra.mxu0 %v6217_v6  ;;  %3739 = vmatpush1.bf16.msra.mxu1 %v6473_v7  ;;  %v843_v59 = vld [vmem:[#allocation6 + $0x740] sm:$0xff]  ;;  %v7205_v53 = vld [vmem:[#allocation6 + $0x3c8] sm:$0xff] }
  0x9d   :  { %3687 = vmatprep.subr.bf16.mxu0 %v6202_v12  ;;  %3740 = vmatprep.subr.bf16.mxu1 %v6458_v13  ;;  %v1091_v60 = vld [vmem:[#allocation6 + $0xf00] sm:$0xff]  ;;  %v6346_v0 = vcombine.high %v835_v58, %v843_v59  ;;  %v6345_v6 = vcombine.low %v835_v58, %v843_v59 }
  0x9e   :  { %524 = vmatmul.mubr.bf16.gmra.mxu0 %v6857_v5  ;;  %577 = vmatmul.mubr.bf16.gmra.mxu1 %v6857_v5  ;;  %v1099_v61 = vld [vmem:[#allocation6 + $0xf40] sm:$0xff] }
  0x9f   :  { %v6602_v1 = vcombine.high %v1091_v60, %v1099_v61  ;;  %v819_v2 = vld [vmem:[#allocation6 + $0x680] sm:$0xff]  ;;  %v6601_v7 = vcombine.low %v1091_v60, %v1099_v61  ;;  %v196_v60 = vlaneseq }
  0xa0   :  { %3688 = vmatpush1.bf16.msra.mxu0 %v6201_v14  ;;  %3741 = vmatpush1.bf16.msra.mxu1 %v6457_v15  ;;  %v827_v3 = vld [vmem:[#allocation6 + $0x6c0] sm:$0xff] }
  0xa1   :  { %3689 = vmatprep.subr.bf16.mxu0 %v6186_v20  ;;  %3742 = vmatprep.subr.bf16.mxu1 %v6442_v21  ;;  %v1075_v4 = vld [vmem:[#allocation6 + $0xe80] sm:$0xff]  ;;  %v6330_v8 = vcombine.high %v819_v2, %v827_v3  ;;  %v6329_v14 = vcombine.low %v819_v2, %v827_v3  ;;  %v7219_v61 = vshrl.u32 %v196_v60, 7  ;;  %v194_v2 = vld [vmem:[#allocation4] sm:$0xf] }
  0xa2   :  { %v1083_v5 = vld [vmem:[#allocation6 + $0xec0] sm:$0xff] }
  0xa3   :  { %v6586_v9 = vcombine.high %v1075_v4, %v1083_v5  ;;  %v803_v10 = vld [vmem:[#allocation6 + $0x600] sm:$0xff]  ;;  %v6585_v15 = vcombine.low %v1075_v4, %v1083_v5  ;;  %8014 = vst [vmem:[#allocation20_spill] sm:$0xff] %v7219_v61 }
  0xa4   :  { %3690 = vmatpush1.bf16.msra.mxu0 %v6185_v22  ;;  %3743 = vmatpush1.bf16.msra.mxu1 %v6441_v23  ;;  %v811_v11 = vld [vmem:[#allocation6 + $0x640] sm:$0xff] }
  0xa5   :  { %3691 = vmatprep.subr.bf16.mxu0 %v6170_v28  ;;  %3744 = vmatprep.subr.bf16.mxu1 %v6426_v29  ;;  %v1059_v12 = vld [vmem:[#allocation6 + $0xe00] sm:$0xff]  ;;  %v6314_v16 = vcombine.high %v803_v10, %v811_v11  ;;  %v6313_v22 = vcombine.low %v803_v10, %v811_v11 }
  0xa6   :  { %v1067_v13 = vld [vmem:[#allocation6 + $0xe40] sm:$0xff] }
  0xa7   :  { %v6570_v17 = vcombine.high %v1059_v12, %v1067_v13  ;;  %v787_v18 = vld [vmem:[#allocation6 + $0x580] sm:$0xff]  ;;  %v6569_v23 = vcombine.low %v1059_v12, %v1067_v13 }
  0xa8   :  { %3692 = vmatpush1.bf16.msra.mxu0 %v6169_v30  ;;  %3745 = vmatpush1.bf16.msra.mxu1 %v6425_v31  ;;  %v795_v19 = vld [vmem:[#allocation6 + $0x5c0] sm:$0xff] }
  0xa9   :  { %3693 = vmatprep.subr.bf16.mxu0 %v6154_v36  ;;  %3746 = vmatprep.subr.bf16.mxu1 %v6410_v37  ;;  %v1043_v20 = vld [vmem:[#allocation6 + $0xd80] sm:$0xff]  ;;  %v6298_v24 = vcombine.high %v787_v18, %v795_v19  ;;  %v6297_v26 = vcombine.low %v787_v18, %v795_v19  ;;  %v7237_v18 = vld [vmem:[#allocation6 + $0x348] sm:$0xff] }
  0xaa   :  { %v1051_v21 = vld [vmem:[#allocation6 + $0xdc0] sm:$0xff] }
  0xab   :  { %v6554_v25 = vcombine.high %v1043_v20, %v1051_v21  ;;  %v6553_v27 = vcombine.low %v1043_v20, %v1051_v21  ;;  %v771_v28 = vld [vmem:[#allocation6 + $0x500] sm:$0xff] }
  0xac   :  { %3694 = vmatpush1.bf16.msra.mxu0 %v6153_v38  ;;  %3747 = vmatpush1.bf16.msra.mxu1 %v6409_v39  ;;  %v779_v29 = vld [vmem:[#allocation6 + $0x540] sm:$0xff] }
  0xad   :  { %3695 = vmatprep.subr.bf16.mxu0 %v6138_v43  ;;  %3748 = vmatprep.subr.bf16.mxu1 %v6394_v44  ;;  %v1027_v30 = vld [vmem:[#allocation6 + $0xd00] sm:$0xff]  ;;  %v6282_v31 = vcombine.high %v771_v28, %v779_v29  ;;  %v6281_v33 = vcombine.low %v771_v28, %v779_v29 }
  0xae   :  { %v1035_v32 = vld [vmem:[#allocation6 + $0xd40] sm:$0xff] }
  0xaf   :  { %v6537_v34 = vcombine.low %v1027_v30, %v1035_v32  ;;  %v6538_v35 = vcombine.high %v1027_v30, %v1035_v32  ;;  %v755_v36 = vld [vmem:[#allocation6 + $0x480] sm:$0xff] }
  0xb0   :  { %3696 = vmatpush1.bf16.msra.mxu0 %v6137_v46  ;;  %3749 = vmatpush1.bf16.msra.mxu1 %v6393_v47  ;;  %v763_v37 = vld [vmem:[#allocation6 + $0x4c0] sm:$0xff] }
  0xb1   :  { %3697 = vmatprep.subr.bf16.mxu0 %v6122_v48  ;;  %3750 = vmatprep.subr.bf16.mxu1 %v6378_v49  ;;  %v1011_v38 = vld [vmem:[#allocation6 + $0xc80] sm:$0xff]  ;;  %v6266_v39 = vcombine.high %v755_v36, %v763_v37  ;;  %v6265_v41 = vcombine.low %v755_v36, %v763_v37 }
  0xb2   :  { %v1019_v40 = vld [vmem:[#allocation6 + $0xcc0] sm:$0xff] }
  0xb3   :  { %v6521_v42 = vcombine.low %v1011_v38, %v1019_v40  ;;  %v6522_v43 = vcombine.high %v1011_v38, %v1019_v40  ;;  %v739_v44 = vld [vmem:[#allocation6 + $0x400] sm:$0xff] }
  0xb4   :  { %3698 = vmatpush1.bf16.msra.mxu0 %v6121_v54  ;;  %3751 = vmatpush1.bf16.msra.mxu1 %v6377_v55  ;;  %v747_v45 = vld [vmem:[#allocation6 + $0x440] sm:$0xff]  ;;  %v7207_v54 = vld [vmem:[#allocation6 + $0xb88] sm:$0xff]  ;;  %v6236_v55 = vcombine.high %v7203_v52, %v7205_v53 }
  0xb5   :  { %3699 = vmatprep.subr.bf16.mxu0 %v6362_v56  ;;  %3752 = vmatprep.subr.bf16.mxu1 %v6618_v57  ;;  %v995_v46 = vld [vmem:[#allocation6 + $0xc00] sm:$0xff]  ;;  %v6250_v47 = vcombine.high %v739_v44, %v747_v45  ;;  %v6249_v49 = vcombine.low %v739_v44, %v747_v45  ;;  %v7211_v56 = vld [vmem:[#allocation6 + $0xbc8] sm:$0xff]  ;;  %v6235_v57 = vcombine.low %v7203_v52, %v7205_v53 }
  0xb6   :  { %v1003_v48 = vld [vmem:[#allocation6 + $0xc40] sm:$0xff]  ;;  %v6491_v58 = vcombine.low %v7207_v54, %v7211_v56  ;;  %v6492_v59 = vcombine.high %v7207_v54, %v7211_v56  ;;  %v940_v52 = vld [vmem:[#allocation6 + $0xa48] sm:$0xff] }
  0xb7   :  { %v6505_v50 = vcombine.low %v995_v46, %v1003_v48  ;;  %v6506_v51 = vcombine.high %v995_v46, %v1003_v48  ;;  %v660_v56 = vld [vmem:[#allocation6 + $0x188] sm:$0xff] }
  0xb8   :  { %3700 = vmatpush2.bf16.msra.mxu0 %v6361_v62  ;;  %3753 = vmatpush2.bf16.msra.mxu1 %v6617_v63  ;;  %v8007_v62 = vsub.s32 1, %v7219_v61  ;;  %v210_v63 = vsub.s32 3, %v7219_v61 }
  0xb9   :  { %3701 = vmatprep.subr.bf16.mxu0 %v6346_v0  ;;  %3754 = vmatprep.subr.bf16.mxu1 %v6602_v1  ;;  %v8006_v0 = vsub.s32 0, %v7219_v61  ;;  %v206_v1 = vsub.s32 2, %v7219_v61 }
  0xba   :  { %v7227_v5 = vrot.slane %v194_v2, %v8007_v62 }
  0xbc   :  { %3702 = vmatpush2.bf16.msra.mxu0 %v6345_v6  ;;  %3755 = vmatpush2.bf16.msra.mxu1 %v6601_v7  ;;  %v7229_v6 = vrot.slane %v194_v2, %v210_v63  ;;  %v199_v7 = vrot.slane %v194_v2, %v8006_v0  ;;  %v946_v0 = vld [vmem:[#allocation6 + $0xa78] sm:$0xff] }
  0xbd   :  { %3703 = vmatprep.subr.bf16.mxu0 %v6330_v8  ;;  %3756 = vmatprep.subr.bf16.mxu1 %v6586_v9  ;;  %v207_v8 = vrot.slane %v194_v2, %v206_v1  ;;  %v700_v1 = vld [vmem:[#allocation6 + $0x2c8] sm:$0xff] }
  0xbe   :  { %v948_v2 = vld [vmem:[#allocation6 + $0xa88] sm:$0xff] }
  0xc0   :  { %3704 = vmatpush2.bf16.msra.mxu0 %v6329_v14  ;;  %3757 = vmatpush2.bf16.msra.mxu1 %v6585_v15 }
  0xc1   :  { %3705 = vmatprep.subr.bf16.mxu0 %v6314_v16  ;;  %3758 = vmatprep.subr.bf16.mxu1 %v6570_v17  ;;  %v7235_v17 = vld [vmem:[#allocation6 + $0x308] sm:$0xff] }
  0xc2   :  { %v6220_v29 = vcombine.high %v7235_v17, %v7237_v18 }
  0xc4   :  { %3706 = vmatpush2.bf16.msra.mxu0 %v6313_v22  ;;  %3759 = vmatpush2.bf16.msra.mxu1 %v6569_v23 }
  0xc5   :  { %3707 = vmatprep.subr.bf16.mxu0 %v6298_v24  ;;  %3760 = vmatprep.subr.bf16.mxu1 %v6554_v25 }
  0xc8   :  { %3708 = vmatpush2.bf16.msra.mxu0 %v6297_v26  ;;  %3761 = vmatpush2.bf16.msra.mxu1 %v6553_v27 }
  0xc9   :  { %3709 = vmatprep.subr.bf16.mxu0 %v6282_v31  ;;  %3762 = vmatprep.subr.bf16.mxu1 %v6538_v35  ;;  %v972_v35 = vld [vmem:[#allocation6 + $0xb48] sm:$0xff] }
  0xcc   :  { %3710 = vmatpush2.bf16.msra.mxu0 %v6281_v33  ;;  %3763 = vmatpush2.bf16.msra.mxu1 %v6537_v34  ;;  %v964_v34 = vld [vmem:[#allocation6 + $0xb08] sm:$0xff] }
  0xcd   :  { %3711 = vmatprep.subr.bf16.mxu0 %v6266_v39  ;;  %3764 = vmatprep.subr.bf16.mxu1 %v6522_v43  ;;  %v6475_v63 = vcombine.low %v964_v34, %v972_v35 }
  0xd0   :  { %3712 = vmatpush2.bf16.msra.mxu0 %v6265_v41  ;;  %3765 = vmatpush2.bf16.msra.mxu1 %v6521_v42 }
  0xd1   :  { %3713 = vmatprep.subr.bf16.mxu0 %v6250_v47  ;;  %3766 = vmatprep.subr.bf16.mxu1 %v6506_v51  ;;  %v6476_v51 = vcombine.high %v964_v34, %v972_v35  ;;  %v900_v34 = vld [vmem:[#allocation6 + $0x908] sm:$0xff] }
  0xd2   :  { %v908_v35 = vld [vmem:[#allocation6 + $0x948] sm:$0xff] }
  0xd4   :  { %3714 = vmatpush2.bf16.msra.mxu0 %v6249_v49  ;;  %3767 = vmatpush2.bf16.msra.mxu1 %v6505_v50  ;;  %v6219_v50 = vcombine.low %v7235_v17, %v7237_v18 }
  0xd5   :  { %3789 = vmatprep.subr.bf16.mxu0 %v6236_v55  ;;  %3842 = vmatprep.subr.bf16.mxu1 %v6492_v59  ;;  %v692_v55 = vld [vmem:[#allocation6 + $0x288] sm:$0xff] }
 0x156   :  { %v515_v3 = vpop.f32.mrf.mxu0  ;;  %v568_v4 = vpop.f32.mrf.mxu1 }
 0x157   :  { %v516_v19 = vadd.f32 %v515_v3, %v199_v7  ;;  %v569_v20 = vadd.f32 %v568_v4, %v207_v8  ;;  %v956_v3 = vld [vmem:[#allocation6 + $0xac8] sm:$0xff] }
 0x158   :  { %v517_v9 = vpop.f32.mrf.mxu0  ;;  %v570_v10 = vpop.f32.mrf.mxu1  ;;  %v6460_v17 = vcombine.high %v948_v2, %v956_v3  ;;  %v6459_v54 = vcombine.low %v948_v2, %v956_v3 }
 0x159   :  { %v518_v13 = vadd.f32 %v517_v9, %v7227_v5  ;;  %v571_v14 = vadd.f32 %v570_v10, %v7229_v6  ;;  %v587_v36 = vmax.f32 %v516_v19, 0.0  ;;  %v589_v37 = vmax.f32 %v569_v20, 0.0  ;;  %v676_v20 = vld [vmem:[#allocation6 + $0x208] sm:$0xff] }
 0x15a   :  { %v519_v11 = vpop.f32.mrf.mxu0  ;;  %v572_v12 = vpop.f32.mrf.mxu1 }
 0x15b   :  { %v520_v15 = vadd.f32 %v519_v11, %v199_v7  ;;  %v573_v16 = vadd.f32 %v572_v12, %v207_v8  ;;  %v588_v30 = vmax.f32 %v518_v13, 0.0  ;;  %v590_v31 = vmax.f32 %v571_v14, 0.0 }
 0x15c   :  { %v521_v21 = vpop.f32.mrf.mxu0  ;;  %v574_v22 = vpop.f32.mrf.mxu1 }
 0x15d   :  { %v522_v23 = vadd.f32 %v521_v21, %v7227_v5  ;;  %v575_v24 = vadd.f32 %v574_v22, %v7229_v6  ;;  %v591_v25 = vmax.f32 %v520_v15, 0.0  ;;  %v593_v26 = vmax.f32 %v573_v16, 0.0  ;;  %v684_v22 = vld [vmem:[#allocation6 + $0x248] sm:$0xff] }
 0x15e   :  { %v525_v27 = vpop.f32.mrf.mxu0  ;;  %v578_v28 = vpop.f32.mrf.mxu1  ;;  %v6204_v16 = vcombine.high %v692_v55, %v700_v1 }
 0x15f   :  { %v592_v32 = vmax.f32 %v522_v23, 0.0  ;;  %v594_v33 = vmax.f32 %v575_v24, 0.0  ;;  %v526_v38 = vadd.f32 %v525_v27, %v199_v7  ;;  %v579_v39 = vadd.f32 %v578_v28, %v207_v8  ;;  %v932_v23 = vld [vmem:[#allocation6 + $0xa08] sm:$0xff] }
 0x160   :  { %v527_v40 = vpop.f32.mrf.mxu0  ;;  %v580_v41 = vpop.f32.mrf.mxu1  ;;  %v7249_v46 = vpack.c.bf16 %v591_v25, %v587_v36  ;;  %v7251_v47 = vpack.c.bf16 %v593_v26, %v589_v37  ;;  %v6444_v24 = vcombine.high %v932_v23, %v940_v52  ;;  %v668_v25 = vld [vmem:[#allocation6 + $0x1c8] sm:$0xff]  ;;  %v6187_v28 = vcombine.low %v676_v20, %v684_v22 }
 0x161   :  { %v7243_v42 = vpack.c.bf16 %v592_v32, %v588_v30  ;;  %v7245_v43 = vpack.c.bf16 %v594_v33, %v590_v31  ;;  %v528_v44 = vadd.f32 %v527_v40, %v7227_v5  ;;  %v581_v45 = vadd.f32 %v580_v41, %v7229_v6  ;;  %v916_v26 = vld [vmem:[#allocation6 + $0x988] sm:$0xff] }
 0x162   :  { %v529_v48 = vpop.f32.mrf.mxu0  ;;  %v582_v49 = vpop.f32.mrf.mxu1  ;;  %v595_v4 = vmax.f32 %v526_v38, 0.0  ;;  %v597_v9 = vmax.f32 %v579_v39, 0.0  ;;  %v924_v27 = vld [vmem:[#allocation6 + $0x9c8] sm:$0xff]  ;;  %v6172_v30 = vcombine.high %v660_v56, %v668_v25  ;;  %v6171_v36 = vcombine.low %v660_v56, %v668_v25 }
 0x163   :  { %v530_v59 = vadd.f32 %v529_v48, %v199_v7  ;;  %v583_v60 = vadd.f32 %v582_v49, %v207_v8  ;;  %3715 = vmatprep.mubr.bf16.mxu0 %v7243_v42  ;;  %3768 = vmatprep.mubr.bf16.mxu1 %v7245_v43  ;;  %v596_v10 = vmax.f32 %v528_v44, 0.0  ;;  %v598_v11 = vmax.f32 %v581_v45, 0.0  ;;  %v644_v32 = vld [vmem:[#allocation6 + $0x108] sm:$0xff] }
 0x164   :  { %v531_v12 = vpop.f32.mrf.mxu0  ;;  %v584_v13 = vpop.f32.mrf.mxu1  ;;  %3716 = vmatmul.mubr.bf16.vlgmr.msra.gmra.mxu0 %v7249_v46  ;;  %3769 = vmatmul.mubr.bf16.vlgmr.msra.gmra.mxu1 %v7251_v47  ;;  %v6428_v31 = vcombine.high %v916_v26, %v924_v27  ;;  %v652_v33 = vld [vmem:[#allocation6 + $0x148] sm:$0xff]  ;;  %v6427_v37 = vcombine.low %v916_v26, %v924_v27  ;;  %v6412_v39 = vcombine.high %v900_v34, %v908_v35 }
 0x165   :  { %v599_v7 = vmax.f32 %v530_v59, 0.0  ;;  %v601_v8 = vmax.f32 %v583_v60, 0.0  ;;  %v532_v14 = vadd.f32 %v531_v12, %v7227_v5  ;;  %v585_v15 = vadd.f32 %v584_v13, %v7229_v6  ;;  %3790 = vmatpush1.bf16.msra.mxu0 %v6235_v57  ;;  %3843 = vmatpush1.bf16.msra.mxu1 %v6491_v58  ;;  %v628_v40 = vld [vmem:[#allocation6 + $0x88] sm:$0xff] }
 0x166   :  { %3791 = vmatprep.subr.bf16.mxu0 %v6220_v29  ;;  %3844 = vmatprep.subr.bf16.mxu1 %v6476_v51  ;;  %v6203_v6 = vcombine.low %v692_v55, %v700_v1  ;;  %v6188_v58 = vcombine.high %v676_v20, %v684_v22  ;;  %v6443_v29 = vcombine.low %v932_v23, %v940_v52  ;;  %v636_v41 = vld [vmem:[#allocation6 + $0xc8] sm:$0xff] }
 0x167   :  { %v600_v18 = vmax.f32 %v532_v14, 0.0  ;;  %v602_v19 = vmax.f32 %v585_v15, 0.0  ;;  %v7267_v21 = vpack.c.bf16 %v599_v7, %v595_v4  ;;  %v7269_v5 = vpack.c.bf16 %v601_v8, %v597_v9  ;;  %v884_v44 = vld [vmem:[#allocation6 + $0x888] sm:$0xff] }
 0x168   :  { %v6156_v38 = vcombine.high %v644_v32, %v652_v33  ;;  %v892_v45 = vld [vmem:[#allocation6 + $0x8c8] sm:$0xff]  ;;  %v6155_v48 = vcombine.low %v644_v32, %v652_v33  ;;  %v6411_v49 = vcombine.low %v900_v34, %v908_v35  ;;  %v6139_v1 = vcombine.low %v628_v40, %v636_v41 }
 0x169   :  { %8015 = vst [vmem:[#allocation21_spill] sm:$0xff] %v7267_v21  ;;  %8016 = vst [vmem:[#allocation22_spill] sm:$0xff] %v7269_v5  ;;  %v7271_v53 = vpack.c.bf16 %v600_v18, %v596_v10  ;;  %v7273_v57 = vpack.c.bf16 %v602_v19, %v598_v11  ;;  %3792 = vmatpush1.bf16.msra.mxu0 %v6219_v50  ;;  %3845 = vmatpush1.bf16.msra.mxu1 %v6475_v63  ;;  %v612_v55 = vld [vmem:[#allocation6 + $0x8] sm:$0xff] }
 0x16a   :  { %3793 = vmatprep.subr.bf16.mxu0 %v6204_v16  ;;  %3846 = vmatprep.subr.bf16.mxu1 %v6460_v17  ;;  %v6140_v50 = vcombine.high %v628_v40, %v636_v41  ;;  %v6396_v51 = vcombine.high %v884_v44, %v892_v45  ;;  %v620_v59 = vld [vmem:[#allocation6 + $0x48] sm:$0xff]  ;;  %v6395_v2 = vcombine.low %v884_v44, %v892_v45 }
 0x16b   :  { %3725 = vmatprep.mubr.bf16.mxu0 %v7271_v53  ;;  %3778 = vmatprep.mubr.bf16.mxu1 %v7273_v57  ;;  %v868_v60 = vld [vmem:[#allocation6 + $0x808] sm:$0xff]  ;;  %v6124_v3 = vcombine.high %v612_v55, %v620_v59  ;;  %v6123_v13 = vcombine.low %v612_v55, %v620_v59 }
 0x16c   :  { %3726 = vmatmul.mubr.bf16.gmra.mxu0 %v7267_v21  ;;  %3779 = vmatmul.mubr.bf16.gmra.mxu1 %v7269_v5  ;;  %v876_v63 = vld [vmem:[#allocation6 + $0x848] sm:$0xff] }
 0x16d   :  { %3794 = vmatpush1.bf16.msra.mxu0 %v6203_v6  ;;  %3847 = vmatpush1.bf16.msra.mxu1 %v6459_v54  ;;  %v6380_v4 = vcombine.high %v868_v60, %v876_v63  ;;  %v852_v9 = vld [vmem:[#allocation6 + $0x788] sm:$0xff]  ;;  %v6379_v7 = vcombine.low %v868_v60, %v876_v63 }
 0x16e   :  { %3821 = vmatprep.mubr.bf16.mxu0 %v7243_v42  ;;  %3874 = vmatprep.mubr.bf16.mxu1 %v7245_v43  ;;  %v860_v10 = vld [vmem:[#allocation6 + $0x7c8] sm:$0xff] }
 0x16f   :  { %3795 = vmatprep.subr.bf16.mxu0 %v6188_v58  ;;  %3848 = vmatprep.subr.bf16.mxu1 %v6444_v24  ;;  %v1108_v11 = vld [vmem:[#allocation6 + $0xf88] sm:$0xff]  ;;  %v6364_v8 = vcombine.high %v852_v9, %v860_v10  ;;  %v6363_v19 = vcombine.low %v852_v9, %v860_v10 }
 0x170   :  { %v1116_v12 = vld [vmem:[#allocation6 + $0xfc8] sm:$0xff] }
 0x171   :  { %3796 = vmatpush1.bf16.msra.mxu0 %v6187_v28  ;;  %3849 = vmatpush1.bf16.msra.mxu1 %v6443_v29  ;;  %v6620_v14 = vcombine.high %v1108_v11, %v1116_v12  ;;  %v836_v15 = vld [vmem:[#allocation6 + $0x708] sm:$0xff]  ;;  %v6619_v20 = vcombine.low %v1108_v11, %v1116_v12 }
 0x172   :  { %3797 = vmatprep.subr.bf16.mxu0 %v6172_v30  ;;  %3850 = vmatprep.subr.bf16.mxu1 %v6428_v31  ;;  %v844_v16 = vld [vmem:[#allocation6 + $0x748] sm:$0xff] }
 0x173   :  { %v1092_v17 = vld [vmem:[#allocation6 + $0xf08] sm:$0xff]  ;;  %v6348_v6 = vcombine.high %v836_v15, %v844_v16  ;;  %v6347_v58 = vcombine.low %v836_v15, %v844_v16 }
 0x174   :  { %v1100_v18 = vld [vmem:[#allocation6 + $0xf48] sm:$0xff] }
 0x175   :  { %3798 = vmatpush1.bf16.msra.mxu0 %v6171_v36  ;;  %3851 = vmatpush1.bf16.msra.mxu1 %v6427_v37  ;;  %v6604_v22 = vcombine.high %v1092_v17, %v1100_v18  ;;  %v820_v23 = vld [vmem:[#allocation6 + $0x688] sm:$0xff]  ;;  %v6603_v24 = vcombine.low %v1092_v17, %v1100_v18  ;;  %v725_v18 = vld [vmem:[#allocation6 + $0x390] sm:$0xff] }
 0x176   :  { %3799 = vmatprep.subr.bf16.mxu0 %v6156_v38  ;;  %3852 = vmatprep.subr.bf16.mxu1 %v6412_v39  ;;  %v828_v52 = vld [vmem:[#allocation6 + $0x6c8] sm:$0xff] }
 0x177   :  { %v1076_v54 = vld [vmem:[#allocation6 + $0xe88] sm:$0xff]  ;;  %v6332_v25 = vcombine.high %v820_v23, %v828_v52  ;;  %v6331_v31 = vcombine.low %v820_v23, %v828_v52 }
 0x178   :  { %v1084_v56 = vld [vmem:[#allocation6 + $0xec8] sm:$0xff] }
 0x179   :  { %3800 = vmatpush1.bf16.msra.mxu0 %v6155_v48  ;;  %3853 = vmatpush1.bf16.msra.mxu1 %v6411_v49  ;;  %v6588_v26 = vcombine.high %v1076_v54, %v1084_v56  ;;  %v804_v27 = vld [vmem:[#allocation6 + $0x608] sm:$0xff]  ;;  %v6587_v32 = vcombine.low %v1076_v54, %v1084_v56  ;;  %v709_v56 = vld [vmem:[#allocation6 + $0x310] sm:$0xff] }
 0x17a   :  { %3801 = vmatprep.subr.bf16.mxu0 %v6140_v50  ;;  %3854 = vmatprep.subr.bf16.mxu1 %v6396_v51  ;;  %v812_v28 = vld [vmem:[#allocation6 + $0x648] sm:$0xff] }
 0x17b   :  { %v1060_v29 = vld [vmem:[#allocation6 + $0xe08] sm:$0xff]  ;;  %v6316_v33 = vcombine.high %v804_v27, %v812_v28  ;;  %v6315_v39 = vcombine.low %v804_v27, %v812_v28 }
 0x17c   :  { %v1068_v30 = vld [vmem:[#allocation6 + $0xe48] sm:$0xff] }
 0x17d   :  { %3802 = vmatpush1.bf16.msra.mxu0 %v6139_v1  ;;  %3855 = vmatpush1.bf16.msra.mxu1 %v6395_v2  ;;  %v6572_v34 = vcombine.high %v1060_v29, %v1068_v30  ;;  %v788_v35 = vld [vmem:[#allocation6 + $0x588] sm:$0xff]  ;;  %v6571_v40 = vcombine.low %v1060_v29, %v1068_v30  ;;  %v693_v30 = vld [vmem:[#allocation6 + $0x290] sm:$0xff] }
 0x17e   :  { %3803 = vmatprep.subr.bf16.mxu0 %v6124_v3  ;;  %3856 = vmatprep.subr.bf16.mxu1 %v6380_v4  ;;  %v796_v36 = vld [vmem:[#allocation6 + $0x5c8] sm:$0xff] }
 0x17f   :  { %v1044_v37 = vld [vmem:[#allocation6 + $0xd88] sm:$0xff]  ;;  %v6300_v41 = vcombine.high %v788_v35, %v796_v36  ;;  %v6299_v51 = vcombine.low %v788_v35, %v796_v36 }
 0x180   :  { %v1052_v38 = vld [vmem:[#allocation6 + $0xdc8] sm:$0xff] }
 0x181   :  { %3804 = vmatpush1.bf16.msra.mxu0 %v6123_v13  ;;  %3857 = vmatpush1.bf16.msra.mxu1 %v6379_v7  ;;  %v6556_v44 = vcombine.high %v1044_v37, %v1052_v38  ;;  %v772_v45 = vld [vmem:[#allocation6 + $0x508] sm:$0xff]  ;;  %v6555_v55 = vcombine.low %v1044_v37, %v1052_v38  ;;  %v677_v38 = vld [vmem:[#allocation6 + $0x210] sm:$0xff] }
 0x182   :  { %3805 = vmatprep.subr.bf16.mxu0 %v6364_v8  ;;  %3858 = vmatprep.subr.bf16.mxu1 %v6620_v14  ;;  %v780_v48 = vld [vmem:[#allocation6 + $0x548] sm:$0xff] }
 0x183   :  { %v1028_v49 = vld [vmem:[#allocation6 + $0xd08] sm:$0xff]  ;;  %v6284_v59 = vcombine.high %v772_v45, %v780_v48  ;;  %v6283_v4 = vcombine.low %v772_v45, %v780_v48 }
 0x184   :  { %v1036_v50 = vld [vmem:[#allocation6 + $0xd48] sm:$0xff] }
 0x185   :  { %3806 = vmatpush2.bf16.msra.mxu0 %v6363_v19  ;;  %3859 = vmatpush2.bf16.msra.mxu1 %v6619_v20  ;;  %v6540_v60 = vcombine.high %v1028_v49, %v1036_v50  ;;  %v756_v63 = vld [vmem:[#allocation6 + $0x488] sm:$0xff]  ;;  %v6539_v9 = vcombine.low %v1028_v49, %v1036_v50  ;;  %v733_v19 = vld [vmem:[#allocation6 + $0x3d0] sm:$0xff] }
 0x186   :  { %3807 = vmatprep.subr.bf16.mxu0 %v6348_v6  ;;  %3860 = vmatprep.subr.bf16.mxu1 %v6604_v22  ;;  %v764_v1 = vld [vmem:[#allocation6 + $0x4c8] sm:$0xff]  ;;  %v981_v20 = vld [vmem:[#allocation6 + $0xb90] sm:$0xff]  ;;  %v6238_v52 = vcombine.high %v725_v18, %v733_v19 }
 0x187   :  { %v1012_v2 = vld [vmem:[#allocation6 + $0xc88] sm:$0xff]  ;;  %v6268_v10 = vcombine.high %v756_v63, %v764_v1  ;;  %v6267_v14 = vcombine.low %v756_v63, %v764_v1  ;;  %v989_v6 = vld [vmem:[#allocation6 + $0xbd0] sm:$0xff] }
 0x188   :  { %v1020_v3 = vld [vmem:[#allocation6 + $0xcc8] sm:$0xff]  ;;  %v6494_v54 = vcombine.high %v981_v20, %v989_v6  ;;  %v6493_v27 = vcombine.low %v981_v20, %v989_v6  ;;  %v661_v50 = vld [vmem:[#allocation6 + $0x190] sm:$0xff] }
 0x189   :  { %3808 = vmatpush2.bf16.msra.mxu0 %v6347_v58  ;;  %3861 = vmatpush2.bf16.msra.mxu1 %v6603_v24  ;;  %v6524_v11 = vcombine.high %v1012_v2, %v1020_v3  ;;  %v740_v12 = vld [vmem:[#allocation6 + $0x408] sm:$0xff]  ;;  %v6523_v15 = vcombine.low %v1012_v2, %v1020_v3  ;;  %v717_v58 = vld [vmem:[#allocation6 + $0x350] sm:$0xff] }
 0x18a   :  { %3809 = vmatprep.subr.bf16.mxu0 %v6332_v25  ;;  %3862 = vmatprep.subr.bf16.mxu1 %v6588_v26  ;;  %v748_v13 = vld [vmem:[#allocation6 + $0x448] sm:$0xff]  ;;  %v965_v24 = vld [vmem:[#allocation6 + $0xb10] sm:$0xff]  ;;  %v6237_v26 = vcombine.low %v725_v18, %v733_v19  ;;  %v6222_v28 = vcombine.high %v709_v56, %v717_v58 }
 0x18b   :  { %v996_v7 = vld [vmem:[#allocation6 + $0xc08] sm:$0xff]  ;;  %v6252_v16 = vcombine.high %v740_v12, %v748_v13  ;;  %v6251_v22 = vcombine.low %v740_v12, %v748_v13  ;;  %v973_v25 = vld [vmem:[#allocation6 + $0xb50] sm:$0xff] }
 0x18c   :  { %v1004_v8 = vld [vmem:[#allocation6 + $0xc48] sm:$0xff]  ;;  %v6478_v29 = vcombine.high %v965_v24, %v973_v25  ;;  %v6477_v35 = vcombine.low %v965_v24, %v973_v25  ;;  %v645_v3 = vld [vmem:[#allocation6 + $0x110] sm:$0xff] }
 0x18d   :  { %3810 = vmatpush2.bf16.msra.mxu0 %v6331_v31  ;;  %3863 = vmatpush2.bf16.msra.mxu1 %v6587_v32  ;;  %v6508_v17 = vcombine.high %v996_v7, %v1004_v8  ;;  %v6507_v23 = vcombine.low %v996_v7, %v1004_v8  ;;  %v701_v31 = vld [vmem:[#allocation6 + $0x2d0] sm:$0xff] }
 0x18e   :  { %3811 = vmatprep.subr.bf16.mxu0 %v6316_v33  ;;  %3864 = vmatprep.subr.bf16.mxu1 %v6572_v34  ;;  %v949_v32 = vld [vmem:[#allocation6 + $0xa90] sm:$0xff]  ;;  %v6221_v34 = vcombine.low %v709_v56, %v717_v58  ;;  %v6206_v36 = vcombine.high %v693_v30, %v701_v31 }
 0x18f   :  { %v957_v33 = vld [vmem:[#allocation6 + $0xad0] sm:$0xff] }
 0x190   :  { %v6462_v37 = vcombine.high %v949_v32, %v957_v33  ;;  %v6461_v45 = vcombine.low %v949_v32, %v957_v33  ;;  %v629_v8 = vld [vmem:[#allocation6 + $0x90] sm:$0xff] }
 0x191   :  { %3812 = vmatpush2.bf16.msra.mxu0 %v6315_v39  ;;  %3865 = vmatpush2.bf16.msra.mxu1 %v6571_v40  ;;  %v685_v39 = vld [vmem:[#allocation6 + $0x250] sm:$0xff] }
 0x192   :  { %3813 = vmatprep.subr.bf16.mxu0 %v6300_v41  ;;  %3866 = vmatprep.subr.bf16.mxu1 %v6556_v44  ;;  %v933_v40 = vld [vmem:[#allocation6 + $0xa10] sm:$0xff]  ;;  %v6205_v44 = vcombine.low %v693_v30, %v701_v31  ;;  %v6190_v48 = vcombine.high %v677_v38, %v685_v39 }
 0x193   :  { %v941_v41 = vld [vmem:[#allocation6 + $0xa50] sm:$0xff] }
 0x194   :  { %v6446_v49 = vcombine.high %v933_v40, %v941_v41  ;;  %v6445_v63 = vcombine.low %v933_v40, %v941_v41  ;;  %v613_v6 = vld [vmem:[#allocation6 + $0x10] sm:$0xff] }
 0x195   :  { %3814 = vmatpush2.bf16.msra.mxu0 %v6299_v51  ;;  %3867 = vmatpush2.bf16.msra.mxu1 %v6555_v55  ;;  %v669_v51 = vld [vmem:[#allocation6 + $0x1d0] sm:$0xff] }
 0x196   :  { %3815 = vmatprep.subr.bf16.mxu0 %v6284_v59  ;;  %3868 = vmatprep.subr.bf16.mxu1 %v6540_v60  ;;  %v917_v55 = vld [vmem:[#allocation6 + $0x990] sm:$0xff]  ;;  %v6189_v60 = vcombine.low %v677_v38, %v685_v39  ;;  %v6174_v1 = vcombine.high %v661_v50, %v669_v51 }
 0x197   :  { %v925_v59 = vld [vmem:[#allocation6 + $0x9d0] sm:$0xff] }
 0x198   :  { %v6430_v2 = vcombine.high %v917_v55, %v925_v59  ;;  %v6429_v12 = vcombine.low %v917_v55, %v925_v59  ;;  %v853_v25 = vld [vmem:[#allocation6 + $0x790] sm:$0xff] }
 0x199   :  { %3816 = vmatpush2.bf16.msra.mxu0 %v6283_v4  ;;  %3869 = vmatpush2.bf16.msra.mxu1 %v6539_v9  ;;  %v653_v4 = vld [vmem:[#allocation6 + $0x150] sm:$0xff] }
 0x19a   :  { %3817 = vmatprep.subr.bf16.mxu0 %v6268_v10  ;;  %3870 = vmatprep.subr.bf16.mxu1 %v6524_v11  ;;  %v901_v9 = vld [vmem:[#allocation6 + $0x910] sm:$0xff]  ;;  %v6173_v11 = vcombine.low %v661_v50, %v669_v51  ;;  %v6158_v13 = vcombine.high %v645_v3, %v653_v4 }
 0x19b   :  { %v909_v10 = vld [vmem:[#allocation6 + $0x950] sm:$0xff] }
 0x19c   :  { %v6414_v7 = vcombine.high %v901_v9, %v909_v10  ;;  %v6413_v18 = vcombine.low %v901_v9, %v909_v10  ;;  %v837_v33 = vld [vmem:[#allocation6 + $0x710] sm:$0xff] }
 0x19d   :  { %3818 = vmatpush2.bf16.msra.mxu0 %v6267_v14  ;;  %3871 = vmatpush2.bf16.msra.mxu1 %v6523_v15  ;;  %v637_v14 = vld [vmem:[#allocation6 + $0xd0] sm:$0xff] }
 0x19e   :  { %3819 = vmatprep.subr.bf16.mxu0 %v6252_v16  ;;  %3872 = vmatprep.subr.bf16.mxu1 %v6508_v17  ;;  %v885_v15 = vld [vmem:[#allocation6 + $0x890] sm:$0xff]  ;;  %v6157_v17 = vcombine.low %v645_v3, %v653_v4  ;;  %v6142_v19 = vcombine.high %v629_v8, %v637_v14 }
 0x19f   :  { %v893_v16 = vld [vmem:[#allocation6 + $0x8d0] sm:$0xff] }
 0x1a0   :  { %v6398_v20 = vcombine.high %v885_v15, %v893_v16  ;;  %v6397_v56 = vcombine.low %v885_v15, %v893_v16  ;;  %v821_v41 = vld [vmem:[#allocation6 + $0x690] sm:$0xff] }
 0x1a1   :  { %3820 = vmatpush2.bf16.msra.mxu0 %v6251_v22  ;;  %3873 = vmatpush2.bf16.msra.mxu1 %v6507_v23  ;;  %v621_v22 = vld [vmem:[#allocation6 + $0x50] sm:$0xff] }
 0x1a2   :  { %3895 = vmatprep.subr.bf16.mxu0 %v6238_v52  ;;  %3948 = vmatprep.subr.bf16.mxu1 %v6494_v54  ;;  %v869_v23 = vld [vmem:[#allocation6 + $0x810] sm:$0xff]  ;;  %v6141_v54 = vcombine.low %v629_v8, %v637_v14  ;;  %v6126_v58 = vcombine.high %v613_v6, %v621_v22 }
 0x1a3   :  { %v877_v52 = vld [vmem:[#allocation6 + $0x850] sm:$0xff] }
 0x1a4   :  { %3822 = vmatmul.mubr.bf16.vlgmr.msra.gmra.mxu0 %v7249_v46  ;;  %3875 = vmatmul.mubr.bf16.vlgmr.msra.gmra.mxu1 %v7251_v47  ;;  %v6382_v24 = vcombine.high %v869_v23, %v877_v52  ;;  %v6381_v30 = vcombine.low %v869_v23, %v877_v52  ;;  %v805_v59 = vld [vmem:[#allocation6 + $0x610] sm:$0xff] }
 0x1a5   :  { %3831 = vmatprep.mubr.bf16.mxu0 %v7271_v53  ;;  %3884 = vmatprep.mubr.bf16.mxu1 %v7273_v57  ;;  %v789_v10 = vld [vmem:[#allocation6 + $0x590] sm:$0xff] }
 0x1a6   :  { %3896 = vmatpush1.bf16.msra.mxu0 %v6237_v26  ;;  %3949 = vmatpush1.bf16.msra.mxu1 %v6493_v27  ;;  %v861_v26 = vld [vmem:[#allocation6 + $0x7d0] sm:$0xff] }
 0x1a7   :  { %3897 = vmatprep.subr.bf16.mxu0 %v6222_v28  ;;  %3950 = vmatprep.subr.bf16.mxu1 %v6478_v29  ;;  %v1109_v27 = vld [vmem:[#allocation6 + $0xf90] sm:$0xff]  ;;  %v6125_v29 = vcombine.low %v613_v6, %v621_v22  ;;  %v6366_v31 = vcombine.high %v853_v25, %v861_v26 }
 0x1a8   :  { %v1117_v28 = vld [vmem:[#allocation6 + $0xfd0] sm:$0xff] }
 0x1a9   :  { %v6622_v32 = vcombine.high %v1109_v27, %v1117_v28  ;;  %v6621_v38 = vcombine.low %v1109_v27, %v1117_v28  ;;  %v773_v16 = vld [vmem:[#allocation6 + $0x510] sm:$0xff] }
 0x1aa   :  { %3898 = vmatpush1.bf16.msra.mxu0 %v6221_v34  ;;  %3951 = vmatpush1.bf16.msra.mxu1 %v6477_v35  ;;  %v845_v34 = vld [vmem:[#allocation6 + $0x750] sm:$0xff] }
 0x1ab   :  { %3899 = vmatprep.subr.bf16.mxu0 %v6206_v36  ;;  %3952 = vmatprep.subr.bf16.mxu1 %v6462_v37  ;;  %v1093_v35 = vld [vmem:[#allocation6 + $0xf10] sm:$0xff]  ;;  %v6365_v37 = vcombine.low %v853_v25, %v861_v26  ;;  %v6350_v39 = vcombine.high %v837_v33, %v845_v34 }
 0x1ac   :  { %3832 = vmatmul.mubr.bf16.gmra.mxu0 %v7267_v21  ;;  %3885 = vmatmul.mubr.bf16.gmra.mxu1 %v7269_v5  ;;  %v1101_v36 = vld [vmem:[#allocation6 + $0xf50] sm:$0xff] }
 0x1ad   :  { %3927 = vmatprep.mubr.bf16.mxu0 %v7243_v42  ;;  %3980 = vmatprep.mubr.bf16.mxu1 %v7245_v43  ;;  %v6606_v40 = vcombine.high %v1093_v35, %v1101_v36  ;;  %v6605_v50 = vcombine.low %v1093_v35, %v1101_v36  ;;  %v757_v52 = vld [vmem:[#allocation6 + $0x490] sm:$0xff]  ;;  %v726_v36 = vld [vmem:[#allocation6 + $0x398] sm:$0xff] }
 0x1ae   :  { %3900 = vmatpush1.bf16.msra.mxu0 %v6205_v44  ;;  %3953 = vmatpush1.bf16.msra.mxu1 %v6461_v45  ;;  %v829_v44 = vld [vmem:[#allocation6 + $0x6d0] sm:$0xff] }
 0x1af   :  { %3901 = vmatprep.subr.bf16.mxu0 %v6190_v48  ;;  %3954 = vmatprep.subr.bf16.mxu1 %v6446_v49  ;;  %v1077_v45 = vld [vmem:[#allocation6 + $0xe90] sm:$0xff]  ;;  %v6349_v49 = vcombine.low %v837_v33, %v845_v34  ;;  %v6334_v51 = vcombine.high %v821_v41, %v829_v44 }
 0x1b0   :  { %v1085_v48 = vld [vmem:[#allocation6 + $0xed0] sm:$0xff] }
 0x1b1   :  { %v6590_v55 = vcombine.high %v1077_v45, %v1085_v48  ;;  %v6589_v3 = vcombine.low %v1077_v45, %v1085_v48  ;;  %v741_v28 = vld [vmem:[#allocation6 + $0x410] sm:$0xff]  ;;  %v710_v48 = vld [vmem:[#allocation6 + $0x318] sm:$0xff] }
 0x1b2   :  { %3902 = vmatpush1.bf16.msra.mxu0 %v6189_v60  ;;  %3955 = vmatpush1.bf16.msra.mxu1 %v6445_v63  ;;  %v813_v60 = vld [vmem:[#allocation6 + $0x650] sm:$0xff] }
 0x1b3   :  { %3903 = vmatprep.subr.bf16.mxu0 %v6174_v1  ;;  %3956 = vmatprep.subr.bf16.mxu1 %v6430_v2  ;;  %v1061_v63 = vld [vmem:[#allocation6 + $0xe10] sm:$0xff]  ;;  %v6333_v2 = vcombine.low %v821_v41, %v829_v44  ;;  %v6318_v4 = vcombine.high %v805_v59, %v813_v60 }
 0x1b4   :  { %v1069_v1 = vld [vmem:[#allocation6 + $0xe50] sm:$0xff] }
 0x1b5   :  { %v6574_v9 = vcombine.high %v1061_v63, %v1069_v1  ;;  %v6573_v8 = vcombine.low %v1061_v63, %v1069_v1  ;;  %v694_v1 = vld [vmem:[#allocation6 + $0x298] sm:$0xff] }
 0x1b6   :  { %3904 = vmatpush1.bf16.msra.mxu0 %v6173_v11  ;;  %3957 = vmatpush1.bf16.msra.mxu1 %v6429_v12  ;;  %v797_v11 = vld [vmem:[#allocation6 + $0x5d0] sm:$0xff] }
 0x1b7   :  { %3905 = vmatprep.subr.bf16.mxu0 %v6158_v13  ;;  %3958 = vmatprep.subr.bf16.mxu1 %v6414_v7  ;;  %v1045_v12 = vld [vmem:[#allocation6 + $0xd90] sm:$0xff]  ;;  %v6317_v7 = vcombine.low %v805_v59, %v813_v60  ;;  %v6302_v14 = vcombine.high %v789_v10, %v797_v11 }
 0x1b8   :  { %v1053_v13 = vld [vmem:[#allocation6 + $0xdd0] sm:$0xff] }
 0x1b9   :  { %v6558_v15 = vcombine.high %v1045_v12, %v1053_v13  ;;  %v6557_v6 = vcombine.low %v1045_v12, %v1053_v13  ;;  %v678_v13 = vld [vmem:[#allocation6 + $0x218] sm:$0xff] }
 0x1ba   :  { %3906 = vmatpush1.bf16.msra.mxu0 %v6157_v17  ;;  %3959 = vmatpush1.bf16.msra.mxu1 %v6413_v18  ;;  %v781_v17 = vld [vmem:[#allocation6 + $0x550] sm:$0xff] }
 0x1bb   :  { %3907 = vmatprep.subr.bf16.mxu0 %v6142_v19  ;;  %3960 = vmatprep.subr.bf16.mxu1 %v6398_v20  ;;  %v1029_v18 = vld [vmem:[#allocation6 + $0xd10] sm:$0xff]  ;;  %v6301_v20 = vcombine.low %v789_v10, %v797_v11  ;;  %v6286_v22 = vcombine.high %v773_v16, %v781_v17 }
 0x1bc   :  { %v1037_v19 = vld [vmem:[#allocation6 + $0xd50] sm:$0xff] }
 0x1bd   :  { %v6542_v23 = vcombine.high %v1029_v18, %v1037_v19  ;;  %v6541_v25 = vcombine.low %v1029_v18, %v1037_v19  ;;  %v662_v19 = vld [vmem:[#allocation6 + $0x198] sm:$0xff] }
 0x1be   :  { %3908 = vmatpush1.bf16.msra.mxu0 %v6141_v54  ;;  %3961 = vmatpush1.bf16.msra.mxu1 %v6397_v56  ;;  %v765_v54 = vld [vmem:[#allocation6 + $0x4d0] sm:$0xff] }
 0x1bf   :  { %3909 = vmatprep.subr.bf16.mxu0 %v6126_v58  ;;  %3962 = vmatprep.subr.bf16.mxu1 %v6382_v24  ;;  %v1013_v56 = vld [vmem:[#allocation6 + $0xc90] sm:$0xff]  ;;  %v6285_v24 = vcombine.low %v773_v16, %v781_v17  ;;  %v6270_v26 = vcombine.high %v757_v52, %v765_v54 }
 0x1c0   :  { %v1021_v58 = vld [vmem:[#allocation6 + $0xcd0] sm:$0xff] }
 0x1c1   :  { %v6526_v27 = vcombine.high %v1013_v56, %v1021_v58  ;;  %v6525_v33 = vcombine.low %v1013_v56, %v1021_v58  ;;  %v646_v58 = vld [vmem:[#allocation6 + $0x118] sm:$0xff] }
 0x1c2   :  { %3910 = vmatpush1.bf16.msra.mxu0 %v6125_v29  ;;  %3963 = vmatpush1.bf16.msra.mxu1 %v6381_v30  ;;  %v749_v29 = vld [vmem:[#allocation6 + $0x450] sm:$0xff] }
 0x1c3   :  { %3911 = vmatprep.subr.bf16.mxu0 %v6366_v31  ;;  %3964 = vmatprep.subr.bf16.mxu1 %v6622_v32  ;;  %v997_v30 = vld [vmem:[#allocation6 + $0xc10] sm:$0xff]  ;;  %v6269_v32 = vcombine.low %v757_v52, %v765_v54  ;;  %v6254_v34 = vcombine.high %v741_v28, %v749_v29 }
 0x1c4   :  { %v1005_v31 = vld [vmem:[#allocation6 + $0xc50] sm:$0xff] }
 0x1c5   :  { %v6510_v35 = vcombine.high %v997_v30, %v1005_v31  ;;  %v6509_v41 = vcombine.low %v997_v30, %v1005_v31  ;;  %v630_v31 = vld [vmem:[#allocation6 + $0x98] sm:$0xff] }
 0x1c6   :  { %3912 = vmatpush2.bf16.msra.mxu0 %v6365_v37  ;;  %3965 = vmatpush2.bf16.msra.mxu1 %v6621_v38  ;;  %v734_v37 = vld [vmem:[#allocation6 + $0x3d8] sm:$0xff] }
 0x1c7   :  { %3913 = vmatprep.subr.bf16.mxu0 %v6350_v39  ;;  %3966 = vmatprep.subr.bf16.mxu1 %v6606_v40  ;;  %v982_v38 = vld [vmem:[#allocation6 + $0xb98] sm:$0xff]  ;;  %v6253_v40 = vcombine.low %v741_v28, %v749_v29  ;;  %v6240_v44 = vcombine.high %v726_v36, %v734_v37 }
 0x1c8   :  { %v990_v39 = vld [vmem:[#allocation6 + $0xbd8] sm:$0xff] }
 0x1c9   :  { %v6496_v45 = vcombine.high %v982_v38, %v990_v39  ;;  %v6495_v59 = vcombine.low %v982_v38, %v990_v39  ;;  %v614_v39 = vld [vmem:[#allocation6 + $0x18] sm:$0xff] }
 0x1ca   :  { %3914 = vmatpush2.bf16.msra.mxu0 %v6349_v49  ;;  %3967 = vmatpush2.bf16.msra.mxu1 %v6605_v50  ;;  %v718_v49 = vld [vmem:[#allocation6 + $0x358] sm:$0xff] }
 0x1cb   :  { %3915 = vmatprep.subr.bf16.mxu0 %v6334_v51  ;;  %3968 = vmatprep.subr.bf16.mxu1 %v6590_v55  ;;  %v966_v50 = vld [vmem:[#allocation6 + $0xb18] sm:$0xff]  ;;  %v6239_v55 = vcombine.low %v726_v36, %v734_v37  ;;  %v6224_v60 = vcombine.high %v710_v48, %v718_v49 }
 0x1cc   :  { %v974_v51 = vld [vmem:[#allocation6 + $0xb58] sm:$0xff] }
 0x1cd   :  { %v6480_v63 = vcombine.high %v966_v50, %v974_v51  ;;  %v6479_v10 = vcombine.low %v966_v50, %v974_v51  ;;  %v854_v51 = vld [vmem:[#allocation6 + $0x798] sm:$0xff] }
 0x1ce   :  { %3916 = vmatpush2.bf16.msra.mxu0 %v6333_v2  ;;  %3969 = vmatpush2.bf16.msra.mxu1 %v6589_v3  ;;  %v702_v2 = vld [vmem:[#allocation6 + $0x2d8] sm:$0xff] }
 0x1cf   :  { %3917 = vmatprep.subr.bf16.mxu0 %v6318_v4  ;;  %3970 = vmatprep.subr.bf16.mxu1 %v6574_v9  ;;  %v950_v3 = vld [vmem:[#allocation6 + $0xa98] sm:$0xff]  ;;  %v6223_v9 = vcombine.low %v710_v48, %v718_v49  ;;  %v6208_v11 = vcombine.high %v694_v1, %v702_v2 }
 0x1d0   :  { %v958_v4 = vld [vmem:[#allocation6 + $0xad8] sm:$0xff] }
 0x1d1   :  { %v6464_v12 = vcombine.high %v950_v3, %v958_v4  ;;  %v6463_v16 = vcombine.low %v950_v3, %v958_v4  ;;  %v838_v4 = vld [vmem:[#allocation6 + $0x718] sm:$0xff] }
 0x1d2   :  { %3918 = vmatpush2.bf16.msra.mxu0 %v6317_v7  ;;  %3971 = vmatpush2.bf16.msra.mxu1 %v6573_v8  ;;  %v686_v7 = vld [vmem:[#allocation6 + $0x258] sm:$0xff] }
 0x1d3   :  { %3919 = vmatprep.subr.bf16.mxu0 %v6302_v14  ;;  %3972 = vmatprep.subr.bf16.mxu1 %v6558_v15  ;;  %v934_v8 = vld [vmem:[#allocation6 + $0xa18] sm:$0xff]  ;;  %v6207_v15 = vcombine.low %v694_v1, %v702_v2  ;;  %v6192_v17 = vcombine.high %v678_v13, %v686_v7 }
 0x1d4   :  { %v942_v14 = vld [vmem:[#allocation6 + $0xa58] sm:$0xff] }
 0x1d5   :  { %v6448_v18 = vcombine.high %v934_v8, %v942_v14  ;;  %v6447_v52 = vcombine.low %v934_v8, %v942_v14  ;;  %v822_v14 = vld [vmem:[#allocation6 + $0x698] sm:$0xff] }
 0x1d6   :  { %3920 = vmatpush2.bf16.msra.mxu0 %v6301_v20  ;;  %3973 = vmatpush2.bf16.msra.mxu1 %v6557_v6  ;;  %v670_v20 = vld [vmem:[#allocation6 + $0x1d8] sm:$0xff] }
 0x1d7   :  { %3921 = vmatprep.subr.bf16.mxu0 %v6286_v22  ;;  %3974 = vmatprep.subr.bf16.mxu1 %v6542_v23  ;;  %v918_v6 = vld [vmem:[#allocation6 + $0x998] sm:$0xff]  ;;  %v6191_v23 = vcombine.low %v678_v13, %v686_v7  ;;  %v6176_v54 = vcombine.high %v662_v19, %v670_v20 }
 0x1d8   :  { %v926_v22 = vld [vmem:[#allocation6 + $0x9d8] sm:$0xff] }
 0x1d9   :  { %v6432_v56 = vcombine.high %v918_v6, %v926_v22  ;;  %v6431_v28 = vcombine.low %v918_v6, %v926_v22  ;;  %v806_v22 = vld [vmem:[#allocation6 + $0x618] sm:$0xff] }
 0x1da   :  { %3922 = vmatpush2.bf16.msra.mxu0 %v6285_v24  ;;  %3975 = vmatpush2.bf16.msra.mxu1 %v6541_v25  ;;  %v654_v24 = vld [vmem:[#allocation6 + $0x158] sm:$0xff] }
 0x1db   :  { %3923 = vmatprep.subr.bf16.mxu0 %v6270_v26  ;;  %3976 = vmatprep.subr.bf16.mxu1 %v6526_v27  ;;  %v902_v25 = vld [vmem:[#allocation6 + $0x918] sm:$0xff]  ;;  %v6175_v27 = vcombine.low %v662_v19, %v670_v20  ;;  %v6160_v29 = vcombine.high %v646_v58, %v654_v24 }
 0x1dc   :  { %v910_v26 = vld [vmem:[#allocation6 + $0x958] sm:$0xff] }
 0x1dd   :  { %v6416_v30 = vcombine.high %v902_v25, %v910_v26  ;;  %v6415_v36 = vcombine.low %v902_v25, %v910_v26  ;;  %v790_v26 = vld [vmem:[#allocation6 + $0x598] sm:$0xff] }
 0x1de   :  { %3924 = vmatpush2.bf16.msra.mxu0 %v6269_v32  ;;  %3977 = vmatpush2.bf16.msra.mxu1 %v6525_v33  ;;  %v638_v32 = vld [vmem:[#allocation6 + $0xd8] sm:$0xff] }
 0x1df   :  { %3925 = vmatprep.subr.bf16.mxu0 %v6254_v34  ;;  %3978 = vmatprep.subr.bf16.mxu1 %v6510_v35  ;;  %v886_v33 = vld [vmem:[#allocation6 + $0x898] sm:$0xff]  ;;  %v6159_v35 = vcombine.low %v646_v58, %v654_v24  ;;  %v6144_v37 = vcombine.high %v630_v31, %v638_v32 }
 0x1e0   :  { %v894_v34 = vld [vmem:[#allocation6 + $0x8d8] sm:$0xff] }
 0x1e1   :  { %v6400_v38 = vcombine.high %v886_v33, %v894_v34  ;;  %v6399_v48 = vcombine.low %v886_v33, %v894_v34  ;;  %v774_v34 = vld [vmem:[#allocation6 + $0x518] sm:$0xff] }
 0x1e2   :  { %3926 = vmatpush2.bf16.msra.mxu0 %v6253_v40  ;;  %3979 = vmatpush2.bf16.msra.mxu1 %v6509_v41  ;;  %v622_v40 = vld [vmem:[#allocation6 + $0x58] sm:$0xff] }
 0x1e3   :  { %4001 = vmatprep.subr.bf16.mxu0 %v6240_v44  ;;  %4054 = vmatprep.subr.bf16.mxu1 %v6496_v45  ;;  %v870_v41 = vld [vmem:[#allocation6 + $0x818] sm:$0xff]  ;;  %v6143_v45 = vcombine.low %v630_v31, %v638_v32  ;;  %v6128_v49 = vcombine.high %v614_v39, %v622_v40 }
 0x1e4   :  { %v878_v44 = vld [vmem:[#allocation6 + $0x858] sm:$0xff] }
 0x1e5   :  { %3928 = vmatmul.mubr.bf16.vlgmr.msra.gmra.mxu0 %v7249_v46  ;;  %3981 = vmatmul.mubr.bf16.vlgmr.msra.gmra.mxu1 %v7251_v47  ;;  %v6384_v50 = vcombine.high %v870_v41, %v878_v44  ;;  %v6383_v1 = vcombine.low %v870_v41, %v878_v44  ;;  %v758_v44 = vld [vmem:[#allocation6 + $0x498] sm:$0xff] }
 0x1e6   :  { %3937 = vmatprep.mubr.bf16.mxu0 %v7271_v53  ;;  %3990 = vmatprep.mubr.bf16.mxu1 %v7273_v57 }
 0x1e7   :  { %4002 = vmatpush1.bf16.msra.mxu0 %v6239_v55  ;;  %4055 = vmatpush1.bf16.msra.mxu1 %v6495_v59  ;;  %v862_v55 = vld [vmem:[#allocation6 + $0x7d8] sm:$0xff] }
 0x1e8   :  { %4003 = vmatprep.subr.bf16.mxu0 %v6224_v60  ;;  %4056 = vmatprep.subr.bf16.mxu1 %v6480_v63  ;;  %v1110_v59 = vld [vmem:[#allocation6 + $0xf98] sm:$0xff]  ;;  %v6127_v63 = vcombine.low %v614_v39, %v622_v40  ;;  %v6368_v2 = vcombine.high %v854_v51, %v862_v55 }
 0x1e9   :  { %v1118_v60 = vld [vmem:[#allocation6 + $0xfd8] sm:$0xff] }
 0x1ea   :  { %v6624_v3 = vcombine.high %v1110_v59, %v1118_v60  ;;  %v6623_v13 = vcombine.low %v1110_v59, %v1118_v60  ;;  %v742_v60 = vld [vmem:[#allocation6 + $0x418] sm:$0xff] }
 0x1eb   :  { %4004 = vmatpush1.bf16.msra.mxu0 %v6223_v9  ;;  %4057 = vmatpush1.bf16.msra.mxu1 %v6479_v10  ;;  %v846_v9 = vld [vmem:[#allocation6 + $0x758] sm:$0xff] }
 0x1ec   :  { %4005 = vmatprep.subr.bf16.mxu0 %v6208_v11  ;;  %4058 = vmatprep.subr.bf16.mxu1 %v6464_v12  ;;  %v1094_v10 = vld [vmem:[#allocation6 + $0xf18] sm:$0xff]  ;;  %v6367_v12 = vcombine.low %v854_v51, %v862_v55  ;;  %v6352_v7 = vcombine.high %v838_v4, %v846_v9 }
 0x1ed   :  { %3938 = vmatmul.mubr.bf16.gmra.mxu0 %v7267_v21  ;;  %3991 = vmatmul.mubr.bf16.gmra.mxu1 %v7269_v5  ;;  %v1102_v11 = vld [vmem:[#allocation6 + $0xf58] sm:$0xff] }
 0x1ee   :  { %4033 = vmatprep.mubr.bf16.mxu0 %v7243_v42  ;;  %4086 = vmatprep.mubr.bf16.mxu1 %v7245_v43  ;;  %v6608_v8 = vcombine.high %v1094_v10, %v1102_v11  ;;  %v6607_v19 = vcombine.low %v1094_v10, %v1102_v11  ;;  %v727_v11 = vld [vmem:[#allocation6 + $0x3a0] sm:$0xff] }
 0x1ef   :  { %4006 = vmatpush1.bf16.msra.mxu0 %v6207_v15  ;;  %4059 = vmatpush1.bf16.msra.mxu1 %v6463_v16  ;;  %v830_v15 = vld [vmem:[#allocation6 + $0x6d8] sm:$0xff] }
 0x1f0   :  { %4007 = vmatprep.subr.bf16.mxu0 %v6192_v17  ;;  %4060 = vmatprep.subr.bf16.mxu1 %v6448_v18  ;;  %v1078_v16 = vld [vmem:[#allocation6 + $0xe98] sm:$0xff]  ;;  %v6351_v18 = vcombine.low %v838_v4, %v846_v9  ;;  %v6336_v20 = vcombine.high %v822_v14, %v830_v15 }
 0x1f1   :  { %v1086_v17 = vld [vmem:[#allocation6 + $0xed8] sm:$0xff] }
 0x1f2   :  { %v6592_v6 = vcombine.high %v1078_v16, %v1086_v17  ;;  %v6591_v58 = vcombine.low %v1078_v16, %v1086_v17  ;;  %v711_v17 = vld [vmem:[#allocation6 + $0x320] sm:$0xff] }
 0x1f3   :  { %4008 = vmatpush1.bf16.msra.mxu0 %v6191_v23  ;;  %4061 = vmatpush1.bf16.msra.mxu1 %v6447_v52  ;;  %v814_v23 = vld [vmem:[#allocation6 + $0x658] sm:$0xff] }
 0x1f4   :  { %4009 = vmatprep.subr.bf16.mxu0 %v6176_v54  ;;  %4062 = vmatprep.subr.bf16.mxu1 %v6432_v56  ;;  %v1062_v52 = vld [vmem:[#allocation6 + $0xe18] sm:$0xff]  ;;  %v6335_v56 = vcombine.low %v822_v14, %v830_v15  ;;  %v6320_v24 = vcombine.high %v806_v22, %v814_v23 }
 0x1f5   :  { %v1070_v54 = vld [vmem:[#allocation6 + $0xe58] sm:$0xff] }
 0x1f6   :  { %v6576_v25 = vcombine.high %v1062_v52, %v1070_v54  ;;  %v6575_v31 = vcombine.low %v1062_v52, %v1070_v54  ;;  %v695_v54 = vld [vmem:[#allocation6 + $0x2a0] sm:$0xff] }
 0x1f7   :  { %4010 = vmatpush1.bf16.msra.mxu0 %v6175_v27  ;;  %4063 = vmatpush1.bf16.msra.mxu1 %v6431_v28  ;;  %v798_v27 = vld [vmem:[#allocation6 + $0x5d8] sm:$0xff] }
 0x1f8   :  { %4011 = vmatprep.subr.bf16.mxu0 %v6160_v29  ;;  %4064 = vmatprep.subr.bf16.mxu1 %v6416_v30  ;;  %v1046_v28 = vld [vmem:[#allocation6 + $0xd98] sm:$0xff]  ;;  %v6319_v30 = vcombine.low %v806_v22, %v814_v23  ;;  %v6304_v32 = vcombine.high %v790_v26, %v798_v27 }
 0x1f9   :  { %v1054_v29 = vld [vmem:[#allocation6 + $0xdd8] sm:$0xff] }
 0x1fa   :  { %v6560_v33 = vcombine.high %v1046_v28, %v1054_v29  ;;  %v6559_v39 = vcombine.low %v1046_v28, %v1054_v29  ;;  %v679_v29 = vld [vmem:[#allocation6 + $0x220] sm:$0xff] }
 0x1fb   :  { %4012 = vmatpush1.bf16.msra.mxu0 %v6159_v35  ;;  %4065 = vmatpush1.bf16.msra.mxu1 %v6415_v36  ;;  %v782_v35 = vld [vmem:[#allocation6 + $0x558] sm:$0xff] }
 0x1fc   :  { %4013 = vmatprep.subr.bf16.mxu0 %v6144_v37  ;;  %4066 = vmatprep.subr.bf16.mxu1 %v6400_v38  ;;  %v1030_v36 = vld [vmem:[#allocation6 + $0xd18] sm:$0xff]  ;;  %v6303_v38 = vcombine.low %v790_v26, %v798_v27  ;;  %v6288_v40 = vcombine.high %v774_v34, %v782_v35 }
 0x1fd   :  { %v1038_v37 = vld [vmem:[#allocation6 + $0xd58] sm:$0xff] }
 0x1fe   :  { %v6544_v41 = vcombine.high %v1030_v36, %v1038_v37  ;;  %v6543_v51 = vcombine.low %v1030_v36, %v1038_v37  ;;  %v663_v37 = vld [vmem:[#allocation6 + $0x1a0] sm:$0xff] }
 0x1ff   :  { %4014 = vmatpush1.bf16.msra.mxu0 %v6143_v45  ;;  %4067 = vmatpush1.bf16.msra.mxu1 %v6399_v48  ;;  %v766_v45 = vld [vmem:[#allocation6 + $0x4d8] sm:$0xff] }
 0x200   :  { %4015 = vmatprep.subr.bf16.mxu0 %v6128_v49  ;;  %4068 = vmatprep.subr.bf16.mxu1 %v6384_v50  ;;  %v1014_v48 = vld [vmem:[#allocation6 + $0xc98] sm:$0xff]  ;;  %v6287_v50 = vcombine.low %v774_v34, %v782_v35  ;;  %v6272_v55 = vcombine.high %v758_v44, %v766_v45 }
 0x201   :  { %v1022_v49 = vld [vmem:[#allocation6 + $0xcd8] sm:$0xff] }
 0x202   :  { %v6528_v59 = vcombine.high %v1014_v48, %v1022_v49  ;;  %v6527_v4 = vcombine.low %v1014_v48, %v1022_v49  ;;  %v647_v49 = vld [vmem:[#allocation6 + $0x120] sm:$0xff] }
 0x203   :  { %4016 = vmatpush1.bf16.msra.mxu0 %v6127_v63  ;;  %4069 = vmatpush1.bf16.msra.mxu1 %v6383_v1  ;;  %v750_v63 = vld [vmem:[#allocation6 + $0x458] sm:$0xff] }
 0x204   :  { %4017 = vmatprep.subr.bf16.mxu0 %v6368_v2  ;;  %4070 = vmatprep.subr.bf16.mxu1 %v6624_v3  ;;  %v998_v1 = vld [vmem:[#allocation6 + $0xc18] sm:$0xff]  ;;  %v6271_v3 = vcombine.low %v758_v44, %v766_v45  ;;  %v6256_v9 = vcombine.high %v742_v60, %v750_v63 }
 0x205   :  { %v1006_v2 = vld [vmem:[#allocation6 + $0xc58] sm:$0xff] }
 0x206   :  { %v6512_v10 = vcombine.high %v998_v1, %v1006_v2  ;;  %v6511_v14 = vcombine.low %v998_v1, %v1006_v2  ;;  %v631_v2 = vld [vmem:[#allocation6 + $0xa0] sm:$0xff] }
 0x207   :  { %4018 = vmatpush2.bf16.msra.mxu0 %v6367_v12  ;;  %4071 = vmatpush2.bf16.msra.mxu1 %v6623_v13  ;;  %v735_v12 = vld [vmem:[#allocation6 + $0x3e0] sm:$0xff] }
 0x208   :  { %4019 = vmatprep.subr.bf16.mxu0 %v6352_v7  ;;  %4072 = vmatprep.subr.bf16.mxu1 %v6608_v8  ;;  %v983_v13 = vld [vmem:[#allocation6 + $0xba0] sm:$0xff]  ;;  %v6255_v8 = vcombine.low %v742_v60, %v750_v63  ;;  %v6242_v15 = vcombine.high %v727_v11, %v735_v12 }
 0x209   :  { %v991_v7 = vld [vmem:[#allocation6 + $0xbe0] sm:$0xff] }
 0x20a   :  { %v6498_v16 = vcombine.high %v983_v13, %v991_v7  ;;  %v6497_v22 = vcombine.low %v983_v13, %v991_v7  ;;  %v615_v7 = vld [vmem:[#allocation6 + $0x20] sm:$0xff] }
 0x20b   :  { %4020 = vmatpush2.bf16.msra.mxu0 %v6351_v18  ;;  %4073 = vmatpush2.bf16.msra.mxu1 %v6607_v19  ;;  %v719_v18 = vld [vmem:[#allocation6 + $0x360] sm:$0xff] }
 0x20c   :  { %4021 = vmatprep.subr.bf16.mxu0 %v6336_v20  ;;  %4074 = vmatprep.subr.bf16.mxu1 %v6592_v6  ;;  %v967_v19 = vld [vmem:[#allocation6 + $0xb20] sm:$0xff]  ;;  %v6241_v6 = vcombine.low %v727_v11, %v735_v12  ;;  %v6226_v23 = vcombine.high %v711_v17, %v719_v18 }
 0x20d   :  { %v975_v20 = vld [vmem:[#allocation6 + $0xb60] sm:$0xff] }
 0x20e   :  { %v6482_v52 = vcombine.high %v967_v19, %v975_v20  ;;  %v6481_v26 = vcombine.low %v967_v19, %v975_v20  ;;  %v855_v20 = vld [vmem:[#allocation6 + $0x7a0] sm:$0xff] }
 0x20f   :  { %4022 = vmatpush2.bf16.msra.mxu0 %v6335_v56  ;;  %4075 = vmatpush2.bf16.msra.mxu1 %v6591_v58  ;;  %v703_v56 = vld [vmem:[#allocation6 + $0x2e0] sm:$0xff] }
 0x210   :  { %4023 = vmatprep.subr.bf16.mxu0 %v6320_v24  ;;  %4076 = vmatprep.subr.bf16.mxu1 %v6576_v25  ;;  %v951_v58 = vld [vmem:[#allocation6 + $0xaa0] sm:$0xff]  ;;  %v6225_v25 = vcombine.low %v711_v17, %v719_v18  ;;  %v6210_v27 = vcombine.high %v695_v54, %v703_v56 }
 0x211   :  { %v959_v24 = vld [vmem:[#allocation6 + $0xae0] sm:$0xff] }
 0x212   :  { %v6466_v28 = vcombine.high %v951_v58, %v959_v24  ;;  %v6465_v34 = vcombine.low %v951_v58, %v959_v24  ;;  %v839_v24 = vld [vmem:[#allocation6 + $0x720] sm:$0xff] }
 0x213   :  { %4024 = vmatpush2.bf16.msra.mxu0 %v6319_v30  ;;  %4077 = vmatpush2.bf16.msra.mxu1 %v6575_v31  ;;  %v687_v30 = vld [vmem:[#allocation6 + $0x260] sm:$0xff] }
 0x214   :  { %4025 = vmatprep.subr.bf16.mxu0 %v6304_v32  ;;  %4078 = vmatprep.subr.bf16.mxu1 %v6560_v33  ;;  %v935_v31 = vld [vmem:[#allocation6 + $0xa20] sm:$0xff]  ;;  %v6209_v33 = vcombine.low %v695_v54, %v703_v56  ;;  %v6194_v35 = vcombine.high %v679_v29, %v687_v30 }
 0x215   :  { %v943_v32 = vld [vmem:[#allocation6 + $0xa60] sm:$0xff] }
 0x216   :  { %v6450_v36 = vcombine.high %v935_v31, %v943_v32  ;;  %v6449_v44 = vcombine.low %v935_v31, %v943_v32  ;;  %v823_v32 = vld [vmem:[#allocation6 + $0x6a0] sm:$0xff] }
 0x217   :  { %4026 = vmatpush2.bf16.msra.mxu0 %v6303_v38  ;;  %4079 = vmatpush2.bf16.msra.mxu1 %v6559_v39  ;;  %v671_v38 = vld [vmem:[#allocation6 + $0x1e0] sm:$0xff] }
 0x218   :  { %4027 = vmatprep.subr.bf16.mxu0 %v6288_v40  ;;  %4080 = vmatprep.subr.bf16.mxu1 %v6544_v41  ;;  %v919_v39 = vld [vmem:[#allocation6 + $0x9a0] sm:$0xff]  ;;  %v6193_v41 = vcombine.low %v679_v29, %v687_v30  ;;  %v6178_v45 = vcombine.high %v663_v37, %v671_v38 }
 0x219   :  { %v927_v40 = vld [vmem:[#allocation6 + $0x9e0] sm:$0xff] }
 0x21a   :  { %v6434_v48 = vcombine.high %v919_v39, %v927_v40  ;;  %v6433_v60 = vcombine.low %v919_v39, %v927_v40  ;;  %v807_v40 = vld [vmem:[#allocation6 + $0x620] sm:$0xff] }
 0x21b   :  { %4028 = vmatpush2.bf16.msra.mxu0 %v6287_v50  ;;  %4081 = vmatpush2.bf16.msra.mxu1 %v6543_v51  ;;  %v655_v50 = vld [vmem:[#allocation6 + $0x160] sm:$0xff] }
 0x21c   :  { %4029 = vmatprep.subr.bf16.mxu0 %v6272_v55  ;;  %4082 = vmatprep.subr.bf16.mxu1 %v6528_v59  ;;  %v903_v51 = vld [vmem:[#allocation6 + $0x920] sm:$0xff]  ;;  %v6177_v59 = vcombine.low %v663_v37, %v671_v38  ;;  %v6162_v63 = vcombine.high %v647_v49, %v655_v50 }
 0x21d   :  { %v911_v55 = vld [vmem:[#allocation6 + $0x960] sm:$0xff] }
 0x21e   :  { %v6418_v1 = vcombine.high %v903_v51, %v911_v55  ;;  %v6417_v11 = vcombine.low %v903_v51, %v911_v55  ;;  %v791_v55 = vld [vmem:[#allocation6 + $0x5a0] sm:$0xff] }
 0x21f   :  { %4030 = vmatpush2.bf16.msra.mxu0 %v6271_v3  ;;  %4083 = vmatpush2.bf16.msra.mxu1 %v6527_v4  ;;  %v639_v3 = vld [vmem:[#allocation6 + $0xe0] sm:$0xff] }
 0x220   :  { %4031 = vmatprep.subr.bf16.mxu0 %v6256_v9  ;;  %4084 = vmatprep.subr.bf16.mxu1 %v6512_v10  ;;  %v887_v4 = vld [vmem:[#allocation6 + $0x8a0] sm:$0xff]  ;;  %v6161_v10 = vcombine.low %v647_v49, %v655_v50  ;;  %v6146_v12 = vcombine.high %v631_v2, %v639_v3 }
 0x221   :  { %v895_v9 = vld [vmem:[#allocation6 + $0x8e0] sm:$0xff] }
 0x222   :  { %v6402_v13 = vcombine.high %v887_v4, %v895_v9  ;;  %v6401_v17 = vcombine.low %v887_v4, %v895_v9  ;;  %v775_v9 = vld [vmem:[#allocation6 + $0x520] sm:$0xff] }
 0x223   :  { %4032 = vmatpush2.bf16.msra.mxu0 %v6255_v8  ;;  %4085 = vmatpush2.bf16.msra.mxu1 %v6511_v14  ;;  %v623_v8 = vld [vmem:[#allocation6 + $0x60] sm:$0xff] }
 0x224   :  { %4107 = vmatprep.subr.bf16.mxu0 %v6242_v15  ;;  %4160 = vmatprep.subr.bf16.mxu1 %v6498_v16  ;;  %v871_v14 = vld [vmem:[#allocation6 + $0x820] sm:$0xff]  ;;  %v6145_v16 = vcombine.low %v631_v2, %v639_v3  ;;  %v6130_v18 = vcombine.high %v615_v7, %v623_v8 }
 0x225   :  { %v879_v15 = vld [vmem:[#allocation6 + $0x860] sm:$0xff] }
 0x226   :  { %4034 = vmatmul.mubr.bf16.vlgmr.msra.gmra.mxu0 %v7249_v46  ;;  %4087 = vmatmul.mubr.bf16.vlgmr.msra.gmra.mxu1 %v7251_v47  ;;  %v6386_v19 = vcombine.high %v871_v14, %v879_v15  ;;  %v6385_v54 = vcombine.low %v871_v14, %v879_v15  ;;  %v759_v15 = vld [vmem:[#allocation6 + $0x4a0] sm:$0xff] }
 0x227   :  { %4043 = vmatprep.mubr.bf16.mxu0 %v7271_v53  ;;  %4096 = vmatprep.mubr.bf16.mxu1 %v7273_v57 }
 0x228   :  { %4108 = vmatpush1.bf16.msra.mxu0 %v6241_v6  ;;  %4161 = vmatpush1.bf16.msra.mxu1 %v6497_v22  ;;  %v863_v6 = vld [vmem:[#allocation6 + $0x7e0] sm:$0xff] }
 0x229   :  { %4109 = vmatprep.subr.bf16.mxu0 %v6226_v23  ;;  %4162 = vmatprep.subr.bf16.mxu1 %v6482_v52  ;;  %v1111_v22 = vld [vmem:[#allocation6 + $0xfa0] sm:$0xff]  ;;  %v6129_v52 = vcombine.low %v615_v7, %v623_v8  ;;  %v6370_v56 = vcombine.high %v855_v20, %v863_v6 }
 0x22a   :  { %v1119_v23 = vld [vmem:[#allocation6 + $0xfe0] sm:$0xff] }
 0x22b   :  { %v6626_v58 = vcombine.high %v1111_v22, %v1119_v23  ;;  %v6625_v29 = vcombine.low %v1111_v22, %v1119_v23  ;;  %v743_v23 = vld [vmem:[#allocation6 + $0x420] sm:$0xff] }
 0x22c   :  { %4110 = vmatpush1.bf16.msra.mxu0 %v6225_v25  ;;  %4163 = vmatpush1.bf16.msra.mxu1 %v6481_v26  ;;  %v847_v25 = vld [vmem:[#allocation6 + $0x760] sm:$0xff] }
 0x22d   :  { %4111 = vmatprep.subr.bf16.mxu0 %v6210_v27  ;;  %4164 = vmatprep.subr.bf16.mxu1 %v6466_v28  ;;  %v1095_v26 = vld [vmem:[#allocation6 + $0xf20] sm:$0xff]  ;;  %v6369_v28 = vcombine.low %v855_v20, %v863_v6  ;;  %v6354_v30 = vcombine.high %v839_v24, %v847_v25 }
 0x22e   :  { %4044 = vmatmul.mubr.bf16.gmra.mxu0 %v7267_v21  ;;  %4097 = vmatmul.mubr.bf16.gmra.mxu1 %v7269_v5  ;;  %v1103_v27 = vld [vmem:[#allocation6 + $0xf60] sm:$0xff] }
 0x22f   :  { %4139 = vmatprep.mubr.bf16.mxu0 %v7243_v42  ;;  %4192 = vmatprep.mubr.bf16.mxu1 %v7245_v43  ;;  %v6610_v31 = vcombine.high %v1095_v26, %v1103_v27  ;;  %v6609_v37 = vcombine.low %v1095_v26, %v1103_v27  ;;  %v728_v27 = vld [vmem:[#allocation6 + $0x3a8] sm:$0xff] }
 0x230   :  { %4112 = vmatpush1.bf16.msra.mxu0 %v6209_v33  ;;  %4165 = vmatpush1.bf16.msra.mxu1 %v6465_v34  ;;  %v831_v33 = vld [vmem:[#allocation6 + $0x6e0] sm:$0xff] }
 0x231   :  { %4113 = vmatprep.subr.bf16.mxu0 %v6194_v35  ;;  %4166 = vmatprep.subr.bf16.mxu1 %v6450_v36  ;;  %v1079_v34 = vld [vmem:[#allocation6 + $0xea0] sm:$0xff]  ;;  %v6353_v36 = vcombine.low %v839_v24, %v847_v25  ;;  %v6338_v38 = vcombine.high %v823_v32, %v831_v33 }
 0x232   :  { %v1087_v35 = vld [vmem:[#allocation6 + $0xee0] sm:$0xff] }
 0x233   :  { %v6594_v39 = vcombine.high %v1079_v34, %v1087_v35  ;;  %v6593_v49 = vcombine.low %v1079_v34, %v1087_v35  ;;  %v712_v35 = vld [vmem:[#allocation6 + $0x328] sm:$0xff] }
 0x234   :  { %4114 = vmatpush1.bf16.msra.mxu0 %v6193_v41  ;;  %4167 = vmatpush1.bf16.msra.mxu1 %v6449_v44  ;;  %v815_v41 = vld [vmem:[#allocation6 + $0x660] sm:$0xff] }
 0x235   :  { %4115 = vmatprep.subr.bf16.mxu0 %v6178_v45  ;;  %4168 = vmatprep.subr.bf16.mxu1 %v6434_v48  ;;  %v1063_v44 = vld [vmem:[#allocation6 + $0xe20] sm:$0xff]  ;;  %v6337_v48 = vcombine.low %v823_v32, %v831_v33  ;;  %v6322_v50 = vcombine.high %v807_v40, %v815_v41 }
 0x236   :  { %v1071_v45 = vld [vmem:[#allocation6 + $0xe60] sm:$0xff] }
 0x237   :  { %v6578_v51 = vcombine.high %v1063_v44, %v1071_v45  ;;  %v6577_v2 = vcombine.low %v1063_v44, %v1071_v45  ;;  %v696_v45 = vld [vmem:[#allocation6 + $0x2a8] sm:$0xff] }
 0x238   :  { %4116 = vmatpush1.bf16.msra.mxu0 %v6177_v59  ;;  %4169 = vmatpush1.bf16.msra.mxu1 %v6433_v60  ;;  %v799_v59 = vld [vmem:[#allocation6 + $0x5e0] sm:$0xff] }
 0x239   :  { %4117 = vmatprep.subr.bf16.mxu0 %v6162_v63  ;;  %4170 = vmatprep.subr.bf16.mxu1 %v6418_v1  ;;  %v1047_v60 = vld [vmem:[#allocation6 + $0xda0] sm:$0xff]  ;;  %v6321_v1 = vcombine.low %v807_v40, %v815_v41  ;;  %v6306_v3 = vcombine.high %v791_v55, %v799_v59 }
 0x23a   :  { %v1055_v63 = vld [vmem:[#allocation6 + $0xde0] sm:$0xff] }
 0x23b   :  { %v6562_v4 = vcombine.high %v1047_v60, %v1055_v63  ;;  %v6561_v7 = vcombine.low %v1047_v60, %v1055_v63  ;;  %v680_v63 = vld [vmem:[#allocation6 + $0x228] sm:$0xff] }
 0x23c   :  { %4118 = vmatpush1.bf16.msra.mxu0 %v6161_v10  ;;  %4171 = vmatpush1.bf16.msra.mxu1 %v6417_v11  ;;  %v783_v10 = vld [vmem:[#allocation6 + $0x560] sm:$0xff] }
 0x23d   :  { %4119 = vmatprep.subr.bf16.mxu0 %v6146_v12  ;;  %4172 = vmatprep.subr.bf16.mxu1 %v6402_v13  ;;  %v1031_v11 = vld [vmem:[#allocation6 + $0xd20] sm:$0xff]  ;;  %v6305_v13 = vcombine.low %v791_v55, %v799_v59  ;;  %v6290_v8 = vcombine.high %v775_v9, %v783_v10 }
 0x23e   :  { %v1039_v12 = vld [vmem:[#allocation6 + $0xd60] sm:$0xff] }
 0x23f   :  { %v6546_v14 = vcombine.high %v1031_v11, %v1039_v12  ;;  %v6545_v20 = vcombine.low %v1031_v11, %v1039_v12  ;;  %v664_v12 = vld [vmem:[#allocation6 + $0x1a8] sm:$0xff] }
 0x240   :  { %4120 = vmatpush1.bf16.msra.mxu0 %v6145_v16  ;;  %4173 = vmatpush1.bf16.msra.mxu1 %v6401_v17  ;;  %v767_v16 = vld [vmem:[#allocation6 + $0x4e0] sm:$0xff] }
 0x241   :  { %4121 = vmatprep.subr.bf16.mxu0 %v6130_v18  ;;  %4174 = vmatprep.subr.bf16.mxu1 %v6386_v19  ;;  %v1015_v17 = vld [vmem:[#allocation6 + $0xca0] sm:$0xff]  ;;  %v6289_v19 = vcombine.low %v775_v9, %v783_v10  ;;  %v6274_v6 = vcombine.high %v759_v15, %v767_v16 }
 0x242   :  { %v1023_v18 = vld [vmem:[#allocation6 + $0xce0] sm:$0xff] }
 0x243   :  { %v6530_v22 = vcombine.high %v1015_v17, %v1023_v18  ;;  %v6529_v24 = vcombine.low %v1015_v17, %v1023_v18  ;;  %v648_v18 = vld [vmem:[#allocation6 + $0x128] sm:$0xff] }
 0x244   :  { %4122 = vmatpush1.bf16.msra.mxu0 %v6129_v52  ;;  %4175 = vmatpush1.bf16.msra.mxu1 %v6385_v54  ;;  %v751_v52 = vld [vmem:[#allocation6 + $0x460] sm:$0xff] }
 0x245   :  { %4123 = vmatprep.subr.bf16.mxu0 %v6370_v56  ;;  %4176 = vmatprep.subr.bf16.mxu1 %v6626_v58  ;;  %v999_v54 = vld [vmem:[#allocation6 + $0xc20] sm:$0xff]  ;;  %v6273_v58 = vcombine.low %v759_v15, %v767_v16  ;;  %v6258_v25 = vcombine.high %v743_v23, %v751_v52 }
 0x246   :  { %v1007_v56 = vld [vmem:[#allocation6 + $0xc60] sm:$0xff] }
 0x247   :  { %v6514_v26 = vcombine.high %v999_v54, %v1007_v56  ;;  %v6513_v32 = vcombine.low %v999_v54, %v1007_v56  ;;  %v632_v56 = vld [vmem:[#allocation6 + $0xa8] sm:$0xff] }
 0x248   :  { %4124 = vmatpush2.bf16.msra.mxu0 %v6369_v28  ;;  %4177 = vmatpush2.bf16.msra.mxu1 %v6625_v29  ;;  %v736_v28 = vld [vmem:[#allocation6 + $0x3e8] sm:$0xff] }
 0x249   :  { %4125 = vmatprep.subr.bf16.mxu0 %v6354_v30  ;;  %4178 = vmatprep.subr.bf16.mxu1 %v6610_v31  ;;  %v984_v29 = vld [vmem:[#allocation6 + $0xba8] sm:$0xff]  ;;  %v6257_v31 = vcombine.low %v743_v23, %v751_v52  ;;  %v6244_v33 = vcombine.high %v728_v27, %v736_v28 }
 0x24a   :  { %v992_v30 = vld [vmem:[#allocation6 + $0xbe8] sm:$0xff] }
 0x24b   :  { %v6500_v34 = vcombine.high %v984_v29, %v992_v30  ;;  %v6499_v40 = vcombine.low %v984_v29, %v992_v30  ;;  %v616_v30 = vld [vmem:[#allocation6 + $0x28] sm:$0xff] }
 0x24c   :  { %4126 = vmatpush2.bf16.msra.mxu0 %v6353_v36  ;;  %4179 = vmatpush2.bf16.msra.mxu1 %v6609_v37  ;;  %v720_v36 = vld [vmem:[#allocation6 + $0x368] sm:$0xff] }
 0x24d   :  { %4127 = vmatprep.subr.bf16.mxu0 %v6338_v38  ;;  %4180 = vmatprep.subr.bf16.mxu1 %v6594_v39  ;;  %v968_v37 = vld [vmem:[#allocation6 + $0xb28] sm:$0xff]  ;;  %v6243_v39 = vcombine.low %v728_v27, %v736_v28  ;;  %v6228_v41 = vcombine.high %v712_v35, %v720_v36 }
 0x24e   :  { %v976_v38 = vld [vmem:[#allocation6 + $0xb68] sm:$0xff] }
 0x24f   :  { %v6484_v44 = vcombine.high %v968_v37, %v976_v38  ;;  %v6483_v55 = vcombine.low %v968_v37, %v976_v38  ;;  %v856_v38 = vld [vmem:[#allocation6 + $0x7a8] sm:$0xff] }
 0x250   :  { %4128 = vmatpush2.bf16.msra.mxu0 %v6337_v48  ;;  %4181 = vmatpush2.bf16.msra.mxu1 %v6593_v49  ;;  %v704_v48 = vld [vmem:[#allocation6 + $0x2e8] sm:$0xff] }
 0x251   :  { %4129 = vmatprep.subr.bf16.mxu0 %v6322_v50  ;;  %4182 = vmatprep.subr.bf16.mxu1 %v6578_v51  ;;  %v952_v49 = vld [vmem:[#allocation6 + $0xaa8] sm:$0xff]  ;;  %v6227_v51 = vcombine.low %v712_v35, %v720_v36  ;;  %v6212_v59 = vcombine.high %v696_v45, %v704_v48 }
 0x252   :  { %v960_v50 = vld [vmem:[#allocation6 + $0xae8] sm:$0xff] }
 0x253   :  { %v6468_v60 = vcombine.high %v952_v49, %v960_v50  ;;  %v6467_v9 = vcombine.low %v952_v49, %v960_v50  ;;  %v840_v50 = vld [vmem:[#allocation6 + $0x728] sm:$0xff] }
 0x254   :  { %4130 = vmatpush2.bf16.msra.mxu0 %v6321_v1  ;;  %4183 = vmatpush2.bf16.msra.mxu1 %v6577_v2  ;;  %v688_v1 = vld [vmem:[#allocation6 + $0x268] sm:$0xff] }
 0x255   :  { %4131 = vmatprep.subr.bf16.mxu0 %v6306_v3  ;;  %4184 = vmatprep.subr.bf16.mxu1 %v6562_v4  ;;  %v936_v2 = vld [vmem:[#allocation6 + $0xa28] sm:$0xff]  ;;  %v6211_v4 = vcombine.low %v696_v45, %v704_v48  ;;  %v6196_v10 = vcombine.high %v680_v63, %v688_v1 }
 0x256   :  { %v944_v3 = vld [vmem:[#allocation6 + $0xa68] sm:$0xff] }
 0x257   :  { %v6452_v11 = vcombine.high %v936_v2, %v944_v3  ;;  %v6451_v15 = vcombine.low %v936_v2, %v944_v3  ;;  %v824_v3 = vld [vmem:[#allocation6 + $0x6a8] sm:$0xff] }
 0x258   :  { %4132 = vmatpush2.bf16.msra.mxu0 %v6305_v13  ;;  %4185 = vmatpush2.bf16.msra.mxu1 %v6561_v7  ;;  %v672_v13 = vld [vmem:[#allocation6 + $0x1e8] sm:$0xff] }
 0x259   :  { %4133 = vmatprep.subr.bf16.mxu0 %v6290_v8  ;;  %4186 = vmatprep.subr.bf16.mxu1 %v6546_v14  ;;  %v920_v7 = vld [vmem:[#allocation6 + $0x9a8] sm:$0xff]  ;;  %v6195_v14 = vcombine.low %v680_v63, %v688_v1  ;;  %v6180_v16 = vcombine.high %v664_v12, %v672_v13 }
 0x25a   :  { %v928_v8 = vld [vmem:[#allocation6 + $0x9e8] sm:$0xff] }
 0x25b   :  { %v6436_v17 = vcombine.high %v920_v7, %v928_v8  ;;  %v6435_v23 = vcombine.low %v920_v7, %v928_v8  ;;  %v808_v8 = vld [vmem:[#allocation6 + $0x628] sm:$0xff] }
 0x25c   :  { %4134 = vmatpush2.bf16.msra.mxu0 %v6289_v19  ;;  %4187 = vmatpush2.bf16.msra.mxu1 %v6545_v20  ;;  %v656_v19 = vld [vmem:[#allocation6 + $0x168] sm:$0xff] }
 0x25d   :  { %4135 = vmatprep.subr.bf16.mxu0 %v6274_v6  ;;  %4188 = vmatprep.subr.bf16.mxu1 %v6530_v22  ;;  %v904_v20 = vld [vmem:[#allocation6 + $0x928] sm:$0xff]  ;;  %v6179_v22 = vcombine.low %v664_v12, %v672_v13  ;;  %v6164_v52 = vcombine.high %v648_v18, %v656_v19 }
 0x25e   :  { %v912_v6 = vld [vmem:[#allocation6 + $0x968] sm:$0xff] }
 0x25f   :  { %v6420_v54 = vcombine.high %v904_v20, %v912_v6  ;;  %v6419_v27 = vcombine.low %v904_v20, %v912_v6  ;;  %v792_v6 = vld [vmem:[#allocation6 + $0x5a8] sm:$0xff] }
 0x260   :  { %4136 = vmatpush2.bf16.msra.mxu0 %v6273_v58  ;;  %4189 = vmatpush2.bf16.msra.mxu1 %v6529_v24  ;;  %v640_v58 = vld [vmem:[#allocation6 + $0xe8] sm:$0xff] }
 0x261   :  { %4137 = vmatprep.subr.bf16.mxu0 %v6258_v25  ;;  %4190 = vmatprep.subr.bf16.mxu1 %v6514_v26  ;;  %v888_v24 = vld [vmem:[#allocation6 + $0x8a8] sm:$0xff]  ;;  %v6163_v26 = vcombine.low %v648_v18, %v656_v19  ;;  %v6148_v28 = vcombine.high %v632_v56, %v640_v58 }
 0x262   :  { %v896_v25 = vld [vmem:[#allocation6 + $0x8e8] sm:$0xff] }
 0x263   :  { %v6404_v29 = vcombine.high %v888_v24, %v896_v25  ;;  %v6403_v35 = vcombine.low %v888_v24, %v896_v25  ;;  %v776_v25 = vld [vmem:[#allocation6 + $0x528] sm:$0xff] }
 0x264   :  { %4138 = vmatpush2.bf16.msra.mxu0 %v6257_v31  ;;  %4191 = vmatpush2.bf16.msra.mxu1 %v6513_v32  ;;  %v624_v31 = vld [vmem:[#allocation6 + $0x68] sm:$0xff] }
 0x265   :  { %4213 = vmatprep.subr.bf16.mxu0 %v6244_v33  ;;  %4266 = vmatprep.subr.bf16.mxu1 %v6500_v34  ;;  %v872_v32 = vld [vmem:[#allocation6 + $0x828] sm:$0xff]  ;;  %v6147_v34 = vcombine.low %v632_v56, %v640_v58  ;;  %v6132_v36 = vcombine.high %v616_v30, %v624_v31 }
 0x266   :  { %v880_v33 = vld [vmem:[#allocation6 + $0x868] sm:$0xff] }
 0x267   :  { %4140 = vmatmul.mubr.bf16.vlgmr.msra.gmra.mxu0 %v7249_v46  ;;  %4193 = vmatmul.mubr.bf16.vlgmr.msra.gmra.mxu1 %v7251_v47  ;;  %v6388_v37 = vcombine.high %v872_v32, %v880_v33  ;;  %v6387_v45 = vcombine.low %v872_v32, %v880_v33  ;;  %v760_v33 = vld [vmem:[#allocation6 + $0x4a8] sm:$0xff] }
 0x268   :  { %4149 = vmatprep.mubr.bf16.mxu0 %v7271_v53  ;;  %4202 = vmatprep.mubr.bf16.mxu1 %v7273_v57 }
 0x269   :  { %4214 = vmatpush1.bf16.msra.mxu0 %v6243_v39  ;;  %4267 = vmatpush1.bf16.msra.mxu1 %v6499_v40  ;;  %v864_v39 = vld [vmem:[#allocation6 + $0x7e8] sm:$0xff] }
 0x26a   :  { %4215 = vmatprep.subr.bf16.mxu0 %v6228_v41  ;;  %4268 = vmatprep.subr.bf16.mxu1 %v6484_v44  ;;  %v1112_v40 = vld [vmem:[#allocation6 + $0xfa8] sm:$0xff]  ;;  %v6131_v44 = vcombine.low %v616_v30, %v624_v31  ;;  %v6372_v48 = vcombine.high %v856_v38, %v864_v39 }
 0x26b   :  { %v1120_v41 = vld [vmem:[#allocation6 + $0xfe8] sm:$0xff] }
 0x26c   :  { %v6628_v49 = vcombine.high %v1112_v40, %v1120_v41  ;;  %v6627_v63 = vcombine.low %v1112_v40, %v1120_v41  ;;  %v744_v41 = vld [vmem:[#allocation6 + $0x428] sm:$0xff] }
 0x26d   :  { %4216 = vmatpush1.bf16.msra.mxu0 %v6227_v51  ;;  %4269 = vmatpush1.bf16.msra.mxu1 %v6483_v55  ;;  %v848_v51 = vld [vmem:[#allocation6 + $0x768] sm:$0xff] }
 0x26e   :  { %4217 = vmatprep.subr.bf16.mxu0 %v6212_v59  ;;  %4270 = vmatprep.subr.bf16.mxu1 %v6468_v60  ;;  %v1096_v55 = vld [vmem:[#allocation6 + $0xf28] sm:$0xff]  ;;  %v6371_v60 = vcombine.low %v856_v38, %v864_v39  ;;  %v6356_v1 = vcombine.high %v840_v50, %v848_v51 }
 0x26f   :  { %4150 = vmatmul.mubr.bf16.gmra.mxu0 %v7267_v21  ;;  %4203 = vmatmul.mubr.bf16.gmra.mxu1 %v7269_v5  ;;  %v1104_v59 = vld [vmem:[#allocation6 + $0xf68] sm:$0xff] }
 0x270   :  { %4245 = vmatprep.mubr.bf16.mxu0 %v7243_v42  ;;  %4298 = vmatprep.mubr.bf16.mxu1 %v7245_v43  ;;  %v6612_v2 = vcombine.high %v1096_v55, %v1104_v59  ;;  %v6611_v12 = vcombine.low %v1096_v55, %v1104_v59  ;;  %v729_v59 = vld [vmem:[#allocation6 + $0x3b0] sm:$0xff] }
 0x271   :  { %4218 = vmatpush1.bf16.msra.mxu0 %v6211_v4  ;;  %4271 = vmatpush1.bf16.msra.mxu1 %v6467_v9  ;;  %v832_v4 = vld [vmem:[#allocation6 + $0x6e8] sm:$0xff] }
 0x272   :  { %4219 = vmatprep.subr.bf16.mxu0 %v6196_v10  ;;  %4272 = vmatprep.subr.bf16.mxu1 %v6452_v11  ;;  %v1080_v9 = vld [vmem:[#allocation6 + $0xea8] sm:$0xff]  ;;  %v6355_v11 = vcombine.low %v840_v50, %v848_v51  ;;  %v6340_v13 = vcombine.high %v824_v3, %v832_v4 }
 0x273   :  { %v1088_v10 = vld [vmem:[#allocation6 + $0xee8] sm:$0xff] }
 0x274   :  { %v6596_v7 = vcombine.high %v1080_v9, %v1088_v10  ;;  %v6595_v18 = vcombine.low %v1080_v9, %v1088_v10  ;;  %v713_v10 = vld [vmem:[#allocation6 + $0x330] sm:$0xff] }
 0x275   :  { %4220 = vmatpush1.bf16.msra.mxu0 %v6195_v14  ;;  %4273 = vmatpush1.bf16.msra.mxu1 %v6451_v15  ;;  %v816_v14 = vld [vmem:[#allocation6 + $0x668] sm:$0xff] }
 0x276   :  { %4221 = vmatprep.subr.bf16.mxu0 %v6180_v16  ;;  %4274 = vmatprep.subr.bf16.mxu1 %v6436_v17  ;;  %v1064_v15 = vld [vmem:[#allocation6 + $0xe28] sm:$0xff]  ;;  %v6339_v17 = vcombine.low %v824_v3, %v832_v4  ;;  %v6324_v19 = vcombine.high %v808_v8, %v816_v14 }
 0x277   :  { %v1072_v16 = vld [vmem:[#allocation6 + $0xe68] sm:$0xff] }
 0x278   :  { %v6580_v20 = vcombine.high %v1064_v15, %v1072_v16  ;;  %v6579_v56 = vcombine.low %v1064_v15, %v1072_v16  ;;  %v697_v16 = vld [vmem:[#allocation6 + $0x2b0] sm:$0xff] }
 0x279   :  { %4222 = vmatpush1.bf16.msra.mxu0 %v6179_v22  ;;  %4275 = vmatpush1.bf16.msra.mxu1 %v6435_v23  ;;  %v800_v22 = vld [vmem:[#allocation6 + $0x5e8] sm:$0xff] }
 0x27a   :  { %4223 = vmatprep.subr.bf16.mxu0 %v6164_v52  ;;  %4276 = vmatprep.subr.bf16.mxu1 %v6420_v54  ;;  %v1048_v23 = vld [vmem:[#allocation6 + $0xda8] sm:$0xff]  ;;  %v6323_v54 = vcombine.low %v808_v8, %v816_v14  ;;  %v6308_v58 = vcombine.high %v792_v6, %v800_v22 }
 0x27b   :  { %v1056_v52 = vld [vmem:[#allocation6 + $0xde8] sm:$0xff] }
 0x27c   :  { %v6564_v24 = vcombine.high %v1048_v23, %v1056_v52  ;;  %v6563_v30 = vcombine.low %v1048_v23, %v1056_v52  ;;  %v681_v52 = vld [vmem:[#allocation6 + $0x230] sm:$0xff] }
 0x27d   :  { %4224 = vmatpush1.bf16.msra.mxu0 %v6163_v26  ;;  %4277 = vmatpush1.bf16.msra.mxu1 %v6419_v27  ;;  %v784_v26 = vld [vmem:[#allocation6 + $0x568] sm:$0xff] }
 0x27e   :  { %4225 = vmatprep.subr.bf16.mxu0 %v6148_v28  ;;  %4278 = vmatprep.subr.bf16.mxu1 %v6404_v29  ;;  %v1032_v27 = vld [vmem:[#allocation6 + $0xd28] sm:$0xff]  ;;  %v6307_v29 = vcombine.low %v792_v6, %v800_v22  ;;  %v6292_v31 = vcombine.high %v776_v25, %v784_v26 }
 0x27f   :  { %v1040_v28 = vld [vmem:[#allocation6 + $0xd68] sm:$0xff] }
 0x280   :  { %v6548_v32 = vcombine.high %v1032_v27, %v1040_v28  ;;  %v6547_v38 = vcombine.low %v1032_v27, %v1040_v28  ;;  %v665_v28 = vld [vmem:[#allocation6 + $0x1b0] sm:$0xff] }
 0x281   :  { %4226 = vmatpush1.bf16.msra.mxu0 %v6147_v34  ;;  %4279 = vmatpush1.bf16.msra.mxu1 %v6403_v35  ;;  %v768_v34 = vld [vmem:[#allocation6 + $0x4e8] sm:$0xff] }
 0x282   :  { %4227 = vmatprep.subr.bf16.mxu0 %v6132_v36  ;;  %4280 = vmatprep.subr.bf16.mxu1 %v6388_v37  ;;  %v1016_v35 = vld [vmem:[#allocation6 + $0xca8] sm:$0xff]  ;;  %v6291_v37 = vcombine.low %v776_v25, %v784_v26  ;;  %v6276_v39 = vcombine.high %v760_v33, %v768_v34 }
 0x283   :  { %v1024_v36 = vld [vmem:[#allocation6 + $0xce8] sm:$0xff] }
 0x284   :  { %v6532_v40 = vcombine.high %v1016_v35, %v1024_v36  ;;  %v6531_v50 = vcombine.low %v1016_v35, %v1024_v36 }
 0x285   :  { %4228 = vmatpush1.bf16.msra.mxu0 %v6131_v44  ;;  %4281 = vmatpush1.bf16.msra.mxu1 %v6387_v45  ;;  %v752_v44 = vld [vmem:[#allocation6 + $0x468] sm:$0xff] }
 0x286   :  { %4229 = vmatprep.subr.bf16.mxu0 %v6372_v48  ;;  %4282 = vmatprep.subr.bf16.mxu1 %v6628_v49  ;;  %v1000_v45 = vld [vmem:[#allocation6 + $0xc28] sm:$0xff]  ;;  %v6275_v49 = vcombine.low %v760_v33, %v768_v34  ;;  %v6260_v51 = vcombine.high %v744_v41, %v752_v44  ;;  %v7321_v33 = vpop.f32.mrf.mxu1 }
 0x287   :  { %v1008_v48 = vld [vmem:[#allocation6 + $0xc68] sm:$0xff] }
 0x288   :  { %v6516_v55 = vcombine.high %v1000_v45, %v1008_v48  ;;  %v6515_v3 = vcombine.low %v1000_v45, %v1008_v48  ;;  %v7327_v45 = vpop.f32.mrf.mxu1 }
 0x289   :  { %4230 = vmatpush2.bf16.msra.mxu0 %v6371_v60  ;;  %4283 = vmatpush2.bf16.msra.mxu1 %v6627_v63  ;;  %v737_v60 = vld [vmem:[#allocation6 + $0x3f0] sm:$0xff] }
 0x28a   :  { %4231 = vmatprep.subr.bf16.mxu0 %v6356_v1  ;;  %4284 = vmatprep.subr.bf16.mxu1 %v6612_v2  ;;  %v985_v63 = vld [vmem:[#allocation6 + $0xbb0] sm:$0xff]  ;;  %v6259_v2 = vcombine.low %v744_v41, %v752_v44  ;;  %v6246_v4 = vcombine.high %v729_v59, %v737_v60 }
 0x28b   :  { %v993_v1 = vld [vmem:[#allocation6 + $0xbf0] sm:$0xff] }
 0x28c   :  { %v6502_v9 = vcombine.high %v985_v63, %v993_v1  ;;  %v6501_v8 = vcombine.low %v985_v63, %v993_v1  ;;  %v913_v41 = vld [vmem:[#allocation6 + $0x970] sm:$0xff] }
 0x28d   :  { %4232 = vmatpush2.bf16.msra.mxu0 %v6355_v11  ;;  %4285 = vmatpush2.bf16.msra.mxu1 %v6611_v12  ;;  %v721_v11 = vld [vmem:[#allocation6 + $0x370] sm:$0xff] }
 0x28e   :  { %4233 = vmatprep.subr.bf16.mxu0 %v6340_v13  ;;  %4286 = vmatprep.subr.bf16.mxu1 %v6596_v7  ;;  %v969_v12 = vld [vmem:[#allocation6 + $0xb30] sm:$0xff]  ;;  %v6245_v7 = vcombine.low %v729_v59, %v737_v60  ;;  %v6230_v14 = vcombine.high %v713_v10, %v721_v11 }
 0x28f   :  { %v977_v13 = vld [vmem:[#allocation6 + $0xb70] sm:$0xff] }
 0x290   :  { %v6486_v15 = vcombine.high %v969_v12, %v977_v13  ;;  %v6485_v6 = vcombine.low %v969_v12, %v977_v13  ;;  %v641_v59 = vld [vmem:[#allocation6 + $0xf0] sm:$0xff] }
 0x291   :  { %4234 = vmatpush2.bf16.msra.mxu0 %v6339_v17  ;;  %4287 = vmatpush2.bf16.msra.mxu1 %v6595_v18  ;;  %v705_v17 = vld [vmem:[#allocation6 + $0x2f0] sm:$0xff] }
 0x292   :  { %4235 = vmatprep.subr.bf16.mxu0 %v6324_v19  ;;  %4288 = vmatprep.subr.bf16.mxu1 %v6580_v20  ;;  %v953_v18 = vld [vmem:[#allocation6 + $0xab0] sm:$0xff]  ;;  %v6229_v20 = vcombine.low %v713_v10, %v721_v11  ;;  %v6214_v22 = vcombine.high %v697_v16, %v705_v17 }
 0x293   :  { %v961_v19 = vld [vmem:[#allocation6 + $0xaf0] sm:$0xff] }
 0x294   :  { %v6470_v23 = vcombine.high %v953_v18, %v961_v19  ;;  %v6469_v25 = vcombine.low %v953_v18, %v961_v19  ;;  %v889_v60 = vld [vmem:[#allocation6 + $0x8b0] sm:$0xff] }
 0x295   :  { %4236 = vmatpush2.bf16.msra.mxu0 %v6323_v54  ;;  %4289 = vmatpush2.bf16.msra.mxu1 %v6579_v56  ;;  %v689_v54 = vld [vmem:[#allocation6 + $0x270] sm:$0xff] }
 0x296   :  { %4237 = vmatprep.subr.bf16.mxu0 %v6308_v58  ;;  %4290 = vmatprep.subr.bf16.mxu1 %v6564_v24  ;;  %v937_v56 = vld [vmem:[#allocation6 + $0xa30] sm:$0xff]  ;;  %v6213_v24 = vcombine.low %v697_v16, %v705_v17  ;;  %v6198_v26 = vcombine.high %v681_v52, %v689_v54  ;;  %v6197_v34 = vcombine.low %v681_v52, %v689_v54 }
 0x297   :  { %v945_v58 = vld [vmem:[#allocation6 + $0xa70] sm:$0xff] }
 0x298   :  { %v6454_v27 = vcombine.high %v937_v56, %v945_v58  ;;  %v6453_v35 = vcombine.low %v937_v56, %v945_v58  ;;  %v897_v63 = vld [vmem:[#allocation6 + $0x8f0] sm:$0xff] }
 0x299   :  { %4238 = vmatpush2.bf16.msra.mxu0 %v6307_v29  ;;  %4291 = vmatpush2.bf16.msra.mxu1 %v6563_v30  ;;  %v673_v29 = vld [vmem:[#allocation6 + $0x1f0] sm:$0xff]  ;;  %v6406_v10 = vcombine.high %v889_v60, %v897_v63  ;;  %v6405_v16 = vcombine.low %v889_v60, %v897_v63 }
 0x29a   :  { %4239 = vmatprep.subr.bf16.mxu0 %v6292_v31  ;;  %4292 = vmatprep.subr.bf16.mxu1 %v6548_v32  ;;  %v921_v30 = vld [vmem:[#allocation6 + $0x9b0] sm:$0xff]  ;;  %v7319_v32 = vpop.f32.mrf.mxu0  ;;  %v6182_v36 = vcombine.high %v665_v28, %v673_v29  ;;  %v6181_v48 = vcombine.low %v665_v28, %v673_v29 }
 0x29b   :  { %v929_v31 = vld [vmem:[#allocation6 + $0x9f0] sm:$0xff] }
 0x29c   :  { %v7325_v44 = vpop.f32.mrf.mxu0  ;;  %v617_v11 = vld [vmem:[#allocation6 + $0x30] sm:$0xff] }
 0x29d   :  { %4240 = vmatpush2.bf16.msra.mxu0 %v6291_v37  ;;  %4293 = vmatpush2.bf16.msra.mxu1 %v6547_v38  ;;  %v6438_v37 = vcombine.high %v921_v30, %v929_v31  ;;  %v649_v38 = vld [vmem:[#allocation6 + $0x130] sm:$0xff] }
 0x29e   :  { %4241 = vmatprep.subr.bf16.mxu0 %v6276_v39  ;;  %4294 = vmatprep.subr.bf16.mxu1 %v6532_v40  ;;  %v657_v39 = vld [vmem:[#allocation6 + $0x170] sm:$0xff]  ;;  %v7329_v1 = vpop.f32.mrf.mxu0 }
 0x29f   :  { %v905_v40 = vld [vmem:[#allocation6 + $0x930] sm:$0xff] }
 0x2a0   :  { %v625_v12 = vld [vmem:[#allocation6 + $0x70] sm:$0xff] }
 0x2a1   :  { %4242 = vmatpush2.bf16.msra.mxu0 %v6275_v49  ;;  %4295 = vmatpush2.bf16.msra.mxu1 %v6531_v50  ;;  %v6437_v49 = vcombine.low %v921_v30, %v929_v31  ;;  %v6166_v50 = vcombine.high %v649_v38, %v657_v39  ;;  %v873_v13 = vld [vmem:[#allocation6 + $0x830] sm:$0xff]  ;;  %v6134_v19 = vcombine.high %v617_v11, %v625_v12 }
 0x2a2   :  { %4243 = vmatprep.subr.bf16.mxu0 %v6260_v51  ;;  %4296 = vmatprep.subr.bf16.mxu1 %v6516_v55  ;;  %v6422_v51 = vcombine.high %v905_v40, %v913_v41  ;;  %v633_v55 = vld [vmem:[#allocation6 + $0xb0] sm:$0xff]  ;;  %v6133_v54 = vcombine.low %v617_v11, %v625_v12 }
 0x2a3   :  { %v1121_v52 = vld [vmem:[#allocation6 + $0xff0] sm:$0xff] }
 0x2a4   :  { %v849_v28 = vld [vmem:[#allocation6 + $0x770] sm:$0xff] }
 0x2a5   :  { %4244 = vmatpush2.bf16.msra.mxu0 %v6259_v2  ;;  %4297 = vmatpush2.bf16.msra.mxu1 %v6515_v3  ;;  %v7331_v2 = vpop.f32.mrf.mxu1  ;;  %v6165_v3 = vcombine.low %v649_v38, %v657_v39  ;;  %v1097_v29 = vld [vmem:[#allocation6 + $0xf30] sm:$0xff] }
 0x2a6   :  { %4319 = vmatprep.subr.bf16.mxu0 %v6246_v4  ;;  %4372 = vmatprep.subr.bf16.mxu1 %v6502_v9  ;;  %v6421_v4 = vcombine.low %v905_v40, %v913_v41  ;;  %v6150_v9 = vcombine.high %v633_v55, %v641_v59  ;;  %v1105_v30 = vld [vmem:[#allocation6 + $0xf70] sm:$0xff] }
 0x2a7   :  { %v6614_v38 = vcombine.high %v1097_v29, %v1105_v30  ;;  %v825_v39 = vld [vmem:[#allocation6 + $0x6b0] sm:$0xff] }
 0x2a8   :  { %4246 = vmatmul.mubr.bf16.vlgmr.msra.gmra.mxu0 %v7249_v46  ;;  %4299 = vmatmul.mubr.bf16.vlgmr.msra.gmra.mxu1 %v7251_v47  ;;  %v833_v40 = vld [vmem:[#allocation6 + $0x6f0] sm:$0xff] }
 0x2a9   :  { %4255 = vmatprep.mubr.bf16.mxu0 %v7271_v53  ;;  %4308 = vmatprep.mubr.bf16.mxu1 %v7273_v57  ;;  %v1081_v41 = vld [vmem:[#allocation6 + $0xeb0] sm:$0xff]  ;;  %v6341_v12 = vcombine.low %v825_v39, %v833_v40 }
 0x2aa   :  { %4320 = vmatpush1.bf16.msra.mxu0 %v6245_v7  ;;  %4373 = vmatpush1.bf16.msra.mxu1 %v6501_v8  ;;  %v881_v7 = vld [vmem:[#allocation6 + $0x870] sm:$0xff]  ;;  %v7333_v8 = vpop.f32.mrf.mxu0 }
 0x2ab   :  { %4321 = vmatprep.subr.bf16.mxu0 %v6230_v14  ;;  %4374 = vmatprep.subr.bf16.mxu1 %v6486_v15  ;;  %v7335_v14 = vpop.f32.mrf.mxu1  ;;  %v6149_v15 = vcombine.low %v633_v55, %v641_v59  ;;  %v6389_v56 = vcombine.low %v873_v13, %v881_v7  ;;  %v6342_v59 = vcombine.high %v825_v39, %v833_v40  ;;  %v809_v63 = vld [vmem:[#allocation6 + $0x630] sm:$0xff] }
 0x2ac   :  { %v7337_v17 = vpop.f32.mrf.mxu0  ;;  %v761_v40 = vld [vmem:[#allocation6 + $0x4b0] sm:$0xff] }
 0x2ad   :  { %v7339_v18 = vpop.f32.mrf.mxu1 }
 0x2ae   :  { %4322 = vmatpush1.bf16.msra.mxu0 %v6229_v20  ;;  %4375 = vmatpush1.bf16.msra.mxu1 %v6485_v6  ;;  %v6390_v20 = vcombine.high %v873_v13, %v881_v7  ;;  %v857_v6 = vld [vmem:[#allocation6 + $0x7b0] sm:$0xff]  ;;  %v7341_v58 = vpop.f32.mrf.mxu0 }
 0x2af   :  { %4323 = vmatprep.subr.bf16.mxu0 %v6214_v22  ;;  %4376 = vmatprep.subr.bf16.mxu1 %v6470_v23  ;;  %v865_v22 = vld [vmem:[#allocation6 + $0x7f0] sm:$0xff] }
 0x2b0   :  { %4256 = vmatmul.mubr.bf16.gmra.mxu0 %v7267_v21  ;;  %4309 = vmatmul.mubr.bf16.gmra.mxu1 %v7269_v5  ;;  %v1113_v23 = vld [vmem:[#allocation6 + $0xfb0] sm:$0xff]  ;;  %v6373_v31 = vcombine.low %v857_v6, %v865_v22 }
 0x2b1   :  { %4351 = vmatprep.mubr.bf16.mxu0 %v7243_v42  ;;  %4404 = vmatprep.mubr.bf16.mxu1 %v7245_v43 }
 0x2b2   :  { %4324 = vmatpush1.bf16.msra.mxu0 %v6213_v24  ;;  %4377 = vmatpush1.bf16.msra.mxu1 %v6469_v25  ;;  %v7343_v24 = vpop.f32.mrf.mxu1  ;;  %v6374_v25 = vcombine.high %v857_v6, %v865_v22  ;;  %v1057_v6 = vld [vmem:[#allocation6 + $0xdf0] sm:$0xff] }
 0x2b3   :  { %4325 = vmatprep.subr.bf16.mxu0 %v6198_v26  ;;  %4378 = vmatprep.subr.bf16.mxu1 %v6454_v27  ;;  %v6630_v26 = vcombine.high %v1113_v23, %v1121_v52  ;;  %v841_v27 = vld [vmem:[#allocation6 + $0x730] sm:$0xff] }
 0x2b6   :  { %4326 = vmatpush1.bf16.msra.mxu0 %v6197_v34  ;;  %4379 = vmatpush1.bf16.msra.mxu1 %v6453_v35  ;;  %v6629_v34 = vcombine.low %v1113_v23, %v1121_v52  ;;  %v7345_v35 = vpop.f32.mrf.mxu0 }
 0x2b7   :  { %4327 = vmatprep.subr.bf16.mxu0 %v6182_v36  ;;  %4380 = vmatprep.subr.bf16.mxu1 %v6438_v37  ;;  %v7347_v36 = vpop.f32.mrf.mxu1  ;;  %v6358_v37 = vcombine.high %v841_v27, %v849_v28 }
 0x2b9   :  { %v7351_v55 = vpop.f32.mrf.mxu1 }
 0x2ba   :  { %4328 = vmatpush1.bf16.msra.mxu0 %v6181_v48  ;;  %4381 = vmatpush1.bf16.msra.mxu1 %v6437_v49  ;;  %v1089_v48 = vld [vmem:[#allocation6 + $0xef0] sm:$0xff]  ;;  %v6357_v49 = vcombine.low %v841_v27, %v849_v28 }
 0x2bb   :  { %4329 = vmatprep.subr.bf16.mxu0 %v6166_v50  ;;  %4382 = vmatprep.subr.bf16.mxu1 %v6422_v51  ;;  %v6613_v50 = vcombine.low %v1097_v29, %v1105_v30  ;;  %v7349_v51 = vpop.f32.mrf.mxu0  ;;  %v6598_v60 = vcombine.high %v1081_v41, %v1089_v48  ;;  %v7355_v11 = vpop.f32.mrf.mxu1  ;;  %v6597_v13 = vcombine.low %v1081_v41, %v1089_v48  ;;  %v785_v27 = vld [vmem:[#allocation6 + $0x570] sm:$0xff] }
 0x2bc   :  { %v1033_v28 = vld [vmem:[#allocation6 + $0xd30] sm:$0xff] }
 0x2bd   :  { %v7359_v23 = vpop.f32.mrf.mxu1  ;;  %v1041_v29 = vld [vmem:[#allocation6 + $0xd70] sm:$0xff] }
 0x2be   :  { %4330 = vmatpush1.bf16.msra.mxu0 %v6165_v3  ;;  %4383 = vmatpush1.bf16.msra.mxu1 %v6421_v4  ;;  %v817_v3 = vld [vmem:[#allocation6 + $0x670] sm:$0xff]  ;;  %v6550_v39 = vcombine.high %v1033_v28, %v1041_v29 }
 0x2bf   :  { %4331 = vmatprep.subr.bf16.mxu0 %v6150_v9  ;;  %4384 = vmatprep.subr.bf16.mxu1 %v6406_v10  ;;  %v1065_v4 = vld [vmem:[#allocation6 + $0xe30] sm:$0xff]  ;;  %v7353_v10 = vpop.f32.mrf.mxu0  ;;  %v6326_v7 = vcombine.high %v809_v63, %v817_v3  ;;  %v6325_v52 = vcombine.low %v809_v63, %v817_v3  ;;  %v6549_v63 = vcombine.low %v1033_v28, %v1041_v29 }
 0x2c0   :  { %v1073_v9 = vld [vmem:[#allocation6 + $0xe70] sm:$0xff] }
 0x2c1   :  { %v7357_v22 = vpop.f32.mrf.mxu0  ;;  %v769_v41 = vld [vmem:[#allocation6 + $0x4f0] sm:$0xff] }
 0x2c2   :  { %4332 = vmatpush1.bf16.msra.mxu0 %v6149_v15  ;;  %4385 = vmatpush1.bf16.msra.mxu1 %v6405_v16  ;;  %v6582_v15 = vcombine.high %v1065_v4, %v1073_v9  ;;  %v793_v16 = vld [vmem:[#allocation6 + $0x5b0] sm:$0xff]  ;;  %v6278_v3 = vcombine.high %v761_v40, %v769_v41 }
 0x2c3   :  { %4333 = vmatprep.subr.bf16.mxu0 %v6134_v19  ;;  %4386 = vmatprep.subr.bf16.mxu1 %v6390_v20  ;;  %v801_v19 = vld [vmem:[#allocation6 + $0x5f0] sm:$0xff]  ;;  %v7361_v30 = vpop.f32.mrf.mxu0 }
 0x2c4   :  { %v1049_v20 = vld [vmem:[#allocation6 + $0xdb0] sm:$0xff] }
 0x2c5   :  { %v1017_v48 = vld [vmem:[#allocation6 + $0xcb0] sm:$0xff] }
 0x2c6   :  { %4334 = vmatpush1.bf16.msra.mxu0 %v6133_v54  ;;  %4387 = vmatpush1.bf16.msra.mxu1 %v6389_v56  ;;  %v6581_v54 = vcombine.low %v1065_v4, %v1073_v9  ;;  %v6310_v56 = vcombine.high %v793_v16, %v801_v19  ;;  %v745_v9 = vld [vmem:[#allocation6 + $0x430] sm:$0xff] }
 0x2c7   :  { %4335 = vmatprep.subr.bf16.mxu0 %v6374_v25  ;;  %4388 = vmatprep.subr.bf16.mxu1 %v6630_v26  ;;  %v6566_v25 = vcombine.high %v1049_v20, %v1057_v6  ;;  %v777_v26 = vld [vmem:[#allocation6 + $0x530] sm:$0xff] }
 0x2ca   :  { %4336 = vmatpush2.bf16.msra.mxu0 %v6373_v31  ;;  %4389 = vmatpush2.bf16.msra.mxu1 %v6629_v34  ;;  %v7363_v31 = vpop.f32.mrf.mxu1  ;;  %v6309_v34 = vcombine.low %v793_v16, %v801_v19  ;;  %v6277_v19 = vcombine.low %v761_v40, %v769_v41 }
 0x2cb   :  { %4337 = vmatprep.subr.bf16.mxu0 %v6358_v37  ;;  %4390 = vmatprep.subr.bf16.mxu1 %v6614_v38  ;;  %v6565_v37 = vcombine.low %v1049_v20, %v1057_v6  ;;  %v6294_v38 = vcombine.high %v777_v26, %v785_v27 }
 0x2ce   :  { %4338 = vmatpush2.bf16.msra.mxu0 %v6357_v49  ;;  %4391 = vmatpush2.bf16.msra.mxu1 %v6613_v50  ;;  %v1025_v49 = vld [vmem:[#allocation6 + $0xcf0] sm:$0xff]  ;;  %v7365_v50 = vpop.f32.mrf.mxu0 }
 0x2cf   :  { %4339 = vmatprep.subr.bf16.mxu0 %v6342_v59  ;;  %4392 = vmatprep.subr.bf16.mxu1 %v6598_v60  ;;  %v7367_v59 = vpop.f32.mrf.mxu1  ;;  %v6293_v60 = vcombine.low %v777_v26, %v785_v27  ;;  %v6534_v4 = vcombine.high %v1017_v48, %v1025_v49  ;;  %v6533_v20 = vcombine.low %v1017_v48, %v1025_v49  ;;  %v994_v26 = vld [vmem:[#allocation6 + $0xbf8] sm:$0xff] }
 0x2d0   :  { %v722_v48 = vld [vmem:[#allocation6 + $0x378] sm:$0xff] }
 0x2d1   :  { %v7371_v16 = vpop.f32.mrf.mxu1  ;;  %v970_v49 = vld [vmem:[#allocation6 + $0xb38] sm:$0xff] }
 0x2d2   :  { %4340 = vmatpush2.bf16.msra.mxu0 %v6341_v12  ;;  %4393 = vmatpush2.bf16.msra.mxu1 %v6597_v13  ;;  %v753_v12 = vld [vmem:[#allocation6 + $0x470] sm:$0xff] }
 0x2d3   :  { %4341 = vmatprep.subr.bf16.mxu0 %v6326_v7  ;;  %4394 = vmatprep.subr.bf16.mxu1 %v6582_v15  ;;  %v1001_v13 = vld [vmem:[#allocation6 + $0xc30] sm:$0xff]  ;;  %v7369_v15 = vpop.f32.mrf.mxu0  ;;  %v6262_v6 = vcombine.high %v745_v9, %v753_v12  ;;  %v7375_v28 = vpop.f32.mrf.mxu1  ;;  %v6261_v29 = vcombine.low %v745_v9, %v753_v12  ;;  %v698_v12 = vld [vmem:[#allocation6 + $0x2b8] sm:$0xff] }
 0x2d4   :  { %v1009_v7 = vld [vmem:[#allocation6 + $0xc70] sm:$0xff] }
 0x2d5   :  { %v7373_v27 = vpop.f32.mrf.mxu0  ;;  %v7379_v41 = vpop.f32.mrf.mxu1 }
 0x2d6   :  { %4342 = vmatpush2.bf16.msra.mxu0 %v6325_v52  ;;  %4395 = vmatpush2.bf16.msra.mxu1 %v6581_v54  ;;  %v6518_v52 = vcombine.high %v1001_v13, %v1009_v7  ;;  %v730_v54 = vld [vmem:[#allocation6 + $0x3b8] sm:$0xff] }
 0x2d7   :  { %4343 = vmatprep.subr.bf16.mxu0 %v6310_v56  ;;  %4396 = vmatprep.subr.bf16.mxu1 %v6566_v25  ;;  %v738_v56 = vld [vmem:[#allocation6 + $0x3f8] sm:$0xff]  ;;  %v7377_v40 = vpop.f32.mrf.mxu0 }
 0x2d8   :  { %v986_v25 = vld [vmem:[#allocation6 + $0xbb8] sm:$0xff] }
 0x2da   :  { %4344 = vmatpush2.bf16.msra.mxu0 %v6309_v34  ;;  %4397 = vmatpush2.bf16.msra.mxu1 %v6565_v37  ;;  %v6517_v34 = vcombine.low %v1001_v13, %v1009_v7  ;;  %v6248_v37 = vcombine.high %v730_v54, %v738_v56  ;;  %v7381_v13 = vpop.f32.mrf.mxu0  ;;  %v7383_v7 = vpop.f32.mrf.mxu1 }
 0x2db   :  { %4345 = vmatprep.subr.bf16.mxu0 %v6294_v38  ;;  %4398 = vmatprep.subr.bf16.mxu1 %v6550_v39  ;;  %v6504_v38 = vcombine.high %v986_v25, %v994_v26  ;;  %v714_v39 = vld [vmem:[#allocation6 + $0x338] sm:$0xff] }
 0x2de   :  { %4346 = vmatpush2.bf16.msra.mxu0 %v6293_v60  ;;  %4399 = vmatpush2.bf16.msra.mxu1 %v6549_v63  ;;  %v978_v60 = vld [vmem:[#allocation6 + $0xb78] sm:$0xff]  ;;  %v6247_v63 = vcombine.low %v730_v54, %v738_v56  ;;  %v7391_v54 = vpop.f32.mrf.mxu1  ;;  %v6231_v56 = vcombine.low %v714_v39, %v722_v48 }
 0x2df   :  { %4347 = vmatprep.subr.bf16.mxu0 %v6278_v3  ;;  %4400 = vmatprep.subr.bf16.mxu1 %v6534_v4  ;;  %v6503_v3 = vcombine.low %v986_v25, %v994_v26  ;;  %v6232_v4 = vcombine.high %v714_v39, %v722_v48  ;;  %v6488_v9 = vcombine.high %v970_v49, %v978_v60 }
 0x2e0   :  { %8018 = vst [vmem:[#allocation24_spill] sm:$0xff] %v7391_v54  ;;  %v6487_v25 = vcombine.low %v970_v49, %v978_v60  ;;  %v7395_v61 = vpop.f32.mrf.mxu1  ;;  %v666_v49 = vld [vmem:[#allocation6 + $0x1b8] sm:$0xff] }
 0x2e1   :  { %8020 = vst [vmem:[#allocation26_spill] sm:$0xff] %v7395_v61  ;;  %v674_v60 = vld [vmem:[#allocation6 + $0x1f8] sm:$0xff] }
 0x2e2   :  { %4348 = vmatpush2.bf16.msra.mxu0 %v6277_v19  ;;  %4401 = vmatpush2.bf16.msra.mxu1 %v6533_v20  ;;  %v706_v19 = vld [vmem:[#allocation6 + $0x2f8] sm:$0xff] }
 0x2e3   :  { %4349 = vmatprep.subr.bf16.mxu0 %v6262_v6  ;;  %4402 = vmatprep.subr.bf16.mxu1 %v6518_v52  ;;  %v954_v20 = vld [vmem:[#allocation6 + $0xab8] sm:$0xff]  ;;  %v7389_v52 = vpop.f32.mrf.mxu0  ;;  %v6216_v26 = vcombine.high %v698_v12, %v706_v19 }
 0x2e4   :  { %v962_v6 = vld [vmem:[#allocation6 + $0xaf8] sm:$0xff]  ;;  %8017 = vst [vmem:[#allocation23_spill] sm:$0xff] %v7389_v52  ;;  %v6215_v52 = vcombine.low %v698_v12, %v706_v19 }
 0x2e5   :  { %v7393_v62 = vpop.f32.mrf.mxu0  ;;  %v6471_v54 = vcombine.low %v954_v20, %v962_v6 }
 0x2e6   :  { %4350 = vmatpush2.bf16.msra.mxu0 %v6261_v29  ;;  %4403 = vmatpush2.bf16.msra.mxu1 %v6517_v34  ;;  %v6472_v29 = vcombine.high %v954_v20, %v962_v6  ;;  %v682_v34 = vld [vmem:[#allocation6 + $0x238] sm:$0xff]  ;;  %8019 = vst [vmem:[#allocation25_spill] sm:$0xff] %v7393_v62  ;;  %v6184_v20 = vcombine.high %v666_v49, %v674_v60 }
 0x2e7   :  { %4425 = vmatprep.subr.bf16.mxu0 %v6248_v37  ;;  %4478 = vmatprep.subr.bf16.mxu1 %v6504_v38  ;;  %v690_v37 = vld [vmem:[#allocation6 + $0x278] sm:$0xff] }
 0x2e8   :  { %v938_v38 = vld [vmem:[#allocation6 + $0xa38] sm:$0xff]  ;;  %v6200_v39 = vcombine.high %v682_v34, %v690_v37  ;;  %v6199_v12 = vcombine.low %v682_v34, %v690_v37 }
 0x2e9   :  { %4352 = vmatmul.mubr.bf16.vlgmr.msra.gmra.mxu0 %v7249_v46  ;;  %4405 = vmatmul.mubr.bf16.vlgmr.msra.gmra.mxu1 %v7251_v47  ;;  %v6456_v48 = vcombine.high %v938_v38, %v946_v0  ;;  %v6455_v19 = vcombine.low %v938_v38, %v946_v0  ;;  %v642_v34 = vld [vmem:[#allocation6 + $0xf8] sm:$0xff] }
 0x2ea   :  { %4361 = vmatprep.mubr.bf16.mxu0 %v7271_v53  ;;  %4414 = vmatprep.mubr.bf16.mxu1 %v7273_v57  ;;  %v890_v37 = vld [vmem:[#allocation6 + $0x8b8] sm:$0xff] }
 0x2eb   :  { %4426 = vmatpush1.bf16.msra.mxu0 %v6247_v63  ;;  %4479 = vmatpush1.bf16.msra.mxu1 %v6503_v3  ;;  %v922_v63 = vld [vmem:[#allocation6 + $0x9b8] sm:$0xff] }
 0x2ec   :  { %4427 = vmatprep.subr.bf16.mxu0 %v6232_v4  ;;  %4480 = vmatprep.subr.bf16.mxu1 %v6488_v9  ;;  %v930_v3 = vld [vmem:[#allocation6 + $0x9f8] sm:$0xff]  ;;  %v7401_v4 = vpop.f32.mrf.mxu0  ;;  %v7403_v9 = vpop.f32.mrf.mxu1 }
 0x2ed   :  { %8021 = vst [vmem:[#allocation27_spill] sm:$0xff] %v7401_v4  ;;  %8022 = vst [vmem:[#allocation28_spill] sm:$0xff] %v7403_v9  ;;  %v6440_v6 = vcombine.high %v922_v63, %v930_v3  ;;  %v6439_v9 = vcombine.low %v922_v63, %v930_v3  ;;  %v898_v38 = vld [vmem:[#allocation6 + $0x8f8] sm:$0xff] }
 0x2ee   :  { %v7405_v61 = vpop.f32.mrf.mxu0  ;;  %v618_v63 = vld [vmem:[#allocation6 + $0x38] sm:$0xff] }
 0x2ef   :  { %4428 = vmatpush1.bf16.msra.mxu0 %v6231_v56  ;;  %4481 = vmatpush1.bf16.msra.mxu1 %v6487_v25  ;;  %v650_v56 = vld [vmem:[#allocation6 + $0x138] sm:$0xff]  ;;  %8023 = vst [vmem:[#allocation29_spill] sm:$0xff] %v7405_v61 }
 0x2f0   :  { %4429 = vmatprep.subr.bf16.mxu0 %v6216_v26  ;;  %4482 = vmatprep.subr.bf16.mxu1 %v6472_v29  ;;  %v658_v25 = vld [vmem:[#allocation6 + $0x178] sm:$0xff] }
 0x2f1   :  { %4362 = vmatmul.mubr.bf16.gmra.mxu0 %v7267_v21  ;;  %4415 = vmatmul.mubr.bf16.gmra.mxu1 %v7269_v5  ;;  %v906_v26 = vld [vmem:[#allocation6 + $0x938] sm:$0xff]  ;;  %v6167_v4 = vcombine.low %v650_v56, %v658_v25 }
 0x2f2   :  { %4457 = vmatprep.mubr.bf16.mxu0 %v7243_v42  ;;  %4510 = vmatprep.mubr.bf16.mxu1 %v7245_v43  ;;  %v914_v29 = vld [vmem:[#allocation6 + $0x978] sm:$0xff]  ;;  %v7407_v42 = vpop.f32.mrf.mxu1  ;;  %v6183_v43 = vcombine.low %v666_v49, %v674_v60  ;;  %v6408_v60 = vcombine.high %v890_v37, %v898_v38 }
 0x2f3   :  { %4430 = vmatpush1.bf16.msra.mxu0 %v6215_v52  ;;  %4483 = vmatpush1.bf16.msra.mxu1 %v6471_v54  ;;  %8024 = vst [vmem:[#allocation30_spill] sm:$0xff] %v7407_v42  ;;  %v6168_v52 = vcombine.high %v650_v56, %v658_v25  ;;  %v6424_v0 = vcombine.high %v906_v26, %v914_v29  ;;  %v634_v54 = vld [vmem:[#allocation6 + $0xb8] sm:$0xff] }
 0x2f4   :  { %4431 = vmatprep.subr.bf16.mxu0 %v6200_v39  ;;  %4484 = vmatprep.subr.bf16.mxu1 %v6456_v48  ;;  %v7409_v39 = vpop.f32.mrf.mxu0  ;;  %v7411_v48 = vpop.f32.mrf.mxu1  ;;  %v6423_v62 = vcombine.low %v906_v26, %v914_v29  ;;  %v6152_v49 = vcombine.high %v634_v54, %v642_v34  ;;  %v626_v3 = vld [vmem:[#allocation6 + $0x78] sm:$0xff] }
 0x2f5   :  { %8025 = vst [vmem:[#allocation31_spill] sm:$0xff] %v7409_v39  ;;  %8026 = vst [vmem:[#allocation32_spill] sm:$0xff] %v7411_v48  ;;  %v6151_v39 = vcombine.low %v634_v54, %v642_v34  ;;  %v6407_v48 = vcombine.low %v890_v37, %v898_v38  ;;  %v858_v25 = vld [vmem:[#allocation6 + $0x7b8] sm:$0xff]  ;;  %v6135_v42 = vcombine.low %v618_v63, %v626_v3 }
 0x2f6   :  { %v866_v26 = vld [vmem:[#allocation6 + $0x7f8] sm:$0xff] }
 0x2f7   :  { %4432 = vmatpush1.bf16.msra.mxu0 %v6199_v12  ;;  %4485 = vmatpush1.bf16.msra.mxu1 %v6455_v19  ;;  %v874_v12 = vld [vmem:[#allocation6 + $0x838] sm:$0xff] }
 0x2f8   :  { %4433 = vmatprep.subr.bf16.mxu0 %v6184_v20  ;;  %4486 = vmatprep.subr.bf16.mxu1 %v6440_v6  ;;  %v882_v19 = vld [vmem:[#allocation6 + $0x878] sm:$0xff]  ;;  %v7413_v20 = vpop.f32.mrf.mxu0  ;;  %v7415_v6 = vpop.f32.mrf.mxu1 }
 0x2f9   :  { %v6392_v56 = vcombine.high %v874_v12, %v882_v19  ;;  %v1114_v29 = vld [vmem:[#allocation6 + $0xfb8] sm:$0xff]  ;;  %v6391_v61 = vcombine.low %v874_v12, %v882_v19 }
 0x2fa   :  { %v842_v54 = vld [vmem:[#allocation6 + $0x738] sm:$0xff] }
 0x2fb   :  { %4434 = vmatpush1.bf16.msra.mxu0 %v6183_v43  ;;  %4487 = vmatpush1.bf16.msra.mxu1 %v6439_v9  ;;  %v6136_v9 = vcombine.high %v618_v63, %v626_v3  ;;  %v1122_v43 = vld [vmem:[#allocation6 + $0xff8] sm:$0xff] }
 0x2fc   :  { %4435 = vmatprep.subr.bf16.mxu0 %v6168_v52  ;;  %4488 = vmatprep.subr.bf16.mxu1 %v6424_v0  ;;  %v7417_v52 = vpop.f32.mrf.mxu0  ;;  %v7419_v0 = vpop.f32.mrf.mxu1  ;;  %v850_v34 = vld [vmem:[#allocation6 + $0x778] sm:$0xff] }
 0x2fd   :  { %8027 = vst [vmem:[#allocation33_spill] sm:$0xff] %v7417_v52  ;;  %8028 = vst [vmem:[#allocation34_spill] sm:$0xff] %v7419_v0  ;;  %v1098_v37 = vld [vmem:[#allocation6 + $0xf38] sm:$0xff]  ;;  %v6375_v52 = vcombine.low %v858_v25, %v866_v26  ;;  %v6631_v0 = vcombine.low %v1114_v29, %v1122_v43  ;;  %v6359_v5 = vcombine.low %v842_v54, %v850_v34 }
 0x2fe   :  { %v1106_v38 = vld [vmem:[#allocation6 + $0xf78] sm:$0xff] }
 0x2ff   :  { %4436 = vmatpush1.bf16.msra.mxu0 %v6167_v4  ;;  %4489 = vmatpush1.bf16.msra.mxu1 %v6423_v62  ;;  %v6376_v62 = vcombine.high %v858_v25, %v866_v26  ;;  %v6632_v4 = vcombine.high %v1114_v29, %v1122_v43  ;;  %v826_v63 = vld [vmem:[#allocation6 + $0x6b8] sm:$0xff]  ;;  %v6615_v21 = vcombine.low %v1098_v37, %v1106_v38 }
 0x300   :  { %4437 = vmatprep.subr.bf16.mxu0 %v6152_v49  ;;  %4490 = vmatprep.subr.bf16.mxu1 %v6408_v60  ;;  %v7421_v49 = vpop.f32.mrf.mxu0  ;;  %v7423_v60 = vpop.f32.mrf.mxu1  ;;  %v834_v19 = vld [vmem:[#allocation6 + $0x6f8] sm:$0xff] }
 0x301   :  { %v810_v25 = vld [vmem:[#allocation6 + $0x638] sm:$0xff] }
 0x302   :  { %v7425_v3 = vpop.f32.mrf.mxu0  ;;  %v7427_v12 = vpop.f32.mrf.mxu1  ;;  %v818_v43 = vld [vmem:[#allocation6 + $0x678] sm:$0xff] }
 0x303   :  { %4438 = vmatpush1.bf16.msra.mxu0 %v6151_v39  ;;  %4491 = vmatpush1.bf16.msra.mxu1 %v6407_v48  ;;  %v6360_v39 = vcombine.high %v842_v54, %v850_v34  ;;  %v6616_v48 = vcombine.high %v1098_v37, %v1106_v38  ;;  %8029 = vst [vmem:[#allocation35_spill] sm:$0xff] %v7425_v3  ;;  %8030 = vst [vmem:[#allocation36_spill] sm:$0xff] %v7427_v12  ;;  %v794_v54 = vld [vmem:[#allocation6 + $0x5b8] sm:$0xff] }
 0x304   :  { %4439 = vmatprep.subr.bf16.mxu0 %v6136_v9  ;;  %4492 = vmatprep.subr.bf16.mxu1 %v6392_v56  ;;  %v1082_v9 = vld [vmem:[#allocation6 + $0xeb8] sm:$0xff]  ;;  %v7429_v26 = vpop.f32.mrf.mxu0  ;;  %v7431_v29 = vpop.f32.mrf.mxu1  ;;  %v6343_v12 = vcombine.low %v826_v63, %v834_v19 }
 0x305   :  { %v1090_v56 = vld [vmem:[#allocation6 + $0xef8] sm:$0xff]  ;;  %8031 = vst [vmem:[#allocation37_spill] sm:$0xff] %v7429_v26  ;;  %8032 = vst [vmem:[#allocation38_spill] sm:$0xff] %v7431_v29  ;;  %v6327_v29 = vcombine.low %v810_v25, %v818_v43 }
 0x306   :  { %v6599_v3 = vcombine.low %v1082_v9, %v1090_v56  ;;  %v7433_v34 = vpop.f32.mrf.mxu0  ;;  %v7435_v37 = vpop.f32.mrf.mxu1  ;;  %v802_v38 = vld [vmem:[#allocation6 + $0x5f8] sm:$0xff] }
 0x307   :  { %4440 = vmatpush1.bf16.msra.mxu0 %v6135_v42  ;;  %4493 = vmatpush1.bf16.msra.mxu1 %v6391_v61  ;;  %v6344_v61 = vcombine.high %v826_v63, %v834_v19  ;;  %v6600_v42 = vcombine.high %v1082_v9, %v1090_v56  ;;  %8033 = vst [vmem:[#allocation39_spill] sm:$0xff] %v7433_v34  ;;  %8034 = vst [vmem:[#allocation40_spill] sm:$0xff] %v7435_v37  ;;  %v778_v63 = vld [vmem:[#allocation6 + $0x538] sm:$0xff] }
 0x308   :  { %4441 = vmatprep.subr.bf16.mxu0 %v6376_v62  ;;  %4494 = vmatprep.subr.bf16.mxu1 %v6632_v4  ;;  %v1066_v62 = vld [vmem:[#allocation6 + $0xe38] sm:$0xff]  ;;  %v7437_v19 = vpop.f32.mrf.mxu0  ;;  %v7439_v9 = vpop.f32.mrf.mxu1  ;;  %v6311_v37 = vcombine.low %v794_v54, %v802_v38 }
 0x309   :  { %v1074_v4 = vld [vmem:[#allocation6 + $0xe78] sm:$0xff]  ;;  %8035 = vst [vmem:[#allocation41_spill] sm:$0xff] %v7437_v19  ;;  %8036 = vst [vmem:[#allocation42_spill] sm:$0xff] %v7439_v9 }
 0x30a   :  { %v6583_v26 = vcombine.low %v1066_v62, %v1074_v4  ;;  %v786_v56 = vld [vmem:[#allocation6 + $0x578] sm:$0xff] }
 0x30b   :  { %4442 = vmatpush2.bf16.msra.mxu0 %v6375_v52  ;;  %4495 = vmatpush2.bf16.msra.mxu1 %v6631_v0  ;;  %v6328_v52 = vcombine.high %v810_v25, %v818_v43  ;;  %v6584_v0 = vcombine.high %v1066_v62, %v1074_v4  ;;  %v762_v25 = vld [vmem:[#allocation6 + $0x4b8] sm:$0xff]  ;;  %v7441_v43 = vpop.f32.mrf.mxu0  ;;  %v7443_v62 = vpop.f32.mrf.mxu1  ;;  %v6295_v9 = vcombine.low %v778_v63, %v786_v56 }
 0x30c   :  { %4443 = vmatprep.subr.bf16.mxu0 %v6360_v39  ;;  %4496 = vmatprep.subr.bf16.mxu1 %v6616_v48  ;;  %v1050_v39 = vld [vmem:[#allocation6 + $0xdb8] sm:$0xff]  ;;  %8037 = vst [vmem:[#allocation43_spill] sm:$0xff] %v7441_v43  ;;  %8038 = vst [vmem:[#allocation44_spill] sm:$0xff] %v7443_v62 }
 0x30d   :  { %v1058_v48 = vld [vmem:[#allocation6 + $0xdf8] sm:$0xff] }
 0x30e   :  { %v6567_v34 = vcombine.low %v1050_v39, %v1058_v48  ;;  %v770_v4 = vld [vmem:[#allocation6 + $0x4f8] sm:$0xff] }
 0x30f   :  { %4444 = vmatpush2.bf16.msra.mxu0 %v6359_v5  ;;  %4497 = vmatpush2.bf16.msra.mxu1 %v6615_v21  ;;  %v6312_v21 = vcombine.high %v794_v54, %v802_v38  ;;  %v6568_v5 = vcombine.high %v1050_v39, %v1058_v48  ;;  %v746_v54 = vld [vmem:[#allocation6 + $0x438] sm:$0xff]  ;;  %v7445_v38 = vpop.f32.mrf.mxu0  ;;  %v7447_v39 = vpop.f32.mrf.mxu1  ;;  %v6279_v62 = vcombine.low %v762_v25, %v770_v4 }
 0x310   :  { %4445 = vmatprep.subr.bf16.mxu0 %v6344_v61  ;;  %4498 = vmatprep.subr.bf16.mxu1 %v6600_v42  ;;  %v1034_v61 = vld [vmem:[#allocation6 + $0xd38] sm:$0xff] }
 0x311   :  { %v1042_v42 = vld [vmem:[#allocation6 + $0xd78] sm:$0xff] }
 0x312   :  { %v6551_v19 = vcombine.low %v1034_v61, %v1042_v42  ;;  %v754_v48 = vld [vmem:[#allocation6 + $0x478] sm:$0xff] }
 0x313   :  { %4446 = vmatpush2.bf16.msra.mxu0 %v6343_v12  ;;  %4499 = vmatpush2.bf16.msra.mxu1 %v6599_v3  ;;  %v6296_v3 = vcombine.high %v778_v63, %v786_v56  ;;  %v6552_v12 = vcombine.high %v1034_v61, %v1042_v42  ;;  %v7449_v63 = vpop.f32.mrf.mxu0  ;;  %v7451_v56 = vpop.f32.mrf.mxu1  ;;  %v3783_v61 = vadd.f32 %v7343_v24, %v7341_v58 }
 0x314   :  { %4447 = vmatprep.subr.bf16.mxu0 %v6328_v52  ;;  %4500 = vmatprep.subr.bf16.mxu1 %v6584_v0  ;;  %v1018_v52 = vld [vmem:[#allocation6 + $0xcb8] sm:$0xff]  ;;  %v3787_v42 = vadd.f32 %v7351_v55, %v7349_v51  ;;  %v3781_v58 = vadd.f32 %v7339_v18, %v7337_v17  ;;  %v3785_v55 = vadd.f32 %v7347_v36, %v7345_v35 }
 0x315   :  { %v1026_v0 = vld [vmem:[#allocation6 + $0xcf8] sm:$0xff]  ;;  %v4051_v24 = vpop.f32.mrf.mxu0  ;;  %v4104_v51 = vpop.f32.mrf.mxu1  ;;  %v3887_v17 = vadd.f32 %v7371_v16, %v7369_v15  ;;  %v3775_v18 = vadd.f32 %v7331_v2, %v7329_v1  ;;  %v3999_v1 = vadd.f32 %v7423_v60, %v7421_v49 }
 0x316   :  { %v6535_v43 = vcombine.low %v1018_v52, %v1026_v0  ;;  %v4105_v2 = vadd.f32 %v4104_v51, %v4051_v24  ;;  %v8040_v60 = vld [vmem:[#allocation22_spill] sm:$0xff]  ;;  %v8053_v51 = vld [vmem:[#allocation37_spill] sm:$0xff] }
 0x317   :  { %4448 = vmatpush2.bf16.msra.mxu0 %v6327_v29  ;;  %4501 = vmatpush2.bf16.msra.mxu1 %v6583_v26  ;;  %v6280_v26 = vcombine.high %v762_v25, %v770_v4  ;;  %v6536_v29 = vcombine.high %v1018_v52, %v1026_v0  ;;  %v3777_v25 = vadd.f32 %v7335_v14, %v7333_v8  ;;  %v8012_v52 = vmov 0   ;;  %v8041_v0 = vld [vmem:[#allocation33_spill] sm:$0xff] }
 0x318   :  { %4449 = vmatprep.subr.bf16.mxu0 %v6312_v21  ;;  %4502 = vmatprep.subr.bf16.mxu1 %v6568_v5  ;;  %v1002_v21 = vld [vmem:[#allocation6 + $0xc38] sm:$0xff] }
 0x319   :  { %v1010_v5 = vld [vmem:[#allocation6 + $0xc78] sm:$0xff] }
 0x31b   :  { %4450 = vmatpush2.bf16.msra.mxu0 %v6311_v37  ;;  %4503 = vmatpush2.bf16.msra.mxu1 %v6567_v34  ;;  %v6264_v34 = vcombine.high %v746_v54, %v754_v48  ;;  %v6520_v37 = vcombine.high %v1002_v21, %v1010_v5 }
 0x31c   :  { %4451 = vmatprep.subr.bf16.mxu0 %v6296_v3  ;;  %4504 = vmatprep.subr.bf16.mxu1 %v6552_v12  ;;  %v6519_v3 = vcombine.low %v1002_v21, %v1010_v5  ;;  %v3889_v12 = vadd.f32 %v7375_v28, %v7373_v27  ;;  %v3773_v27 = vadd.f32 %v7327_v45, %v7325_v44  ;;  %v8045_v21 = vld [vmem:[#allocation41_spill] sm:$0xff]  ;;  %v8046_v5 = vld [vmem:[#allocation42_spill] sm:$0xff] }
 0x31d   :  { %v3883_v28 = vadd.f32 %v7367_v59, %v7365_v50  ;;  %v3879_v44 = vadd.f32 %v7359_v23, %v7357_v22  ;;  %v4555_v50 = vpack.c.bf16 %v3785_v55, %v3781_v58  ;;  %v3881_v59 = vadd.f32 %v7363_v31, %v7361_v30  ;;  %v8054_v55 = vld [vmem:[#allocation38_spill] sm:$0xff] }
 0x31e   :  { %v4540_v35 = vpack.c.bf16 %v3777_v25, %v3773_v27  ;;  %v3771_v30 = vadd.f32 %v7321_v33, %v7319_v32 }
 0x31f   :  { %4452 = vmatpush2.bf16.msra.mxu0 %v6295_v9  ;;  %4505 = vmatpush2.bf16.msra.mxu1 %v6551_v19  ;;  %v3893_v9 = vadd.f32 %v7383_v7, %v7381_v13  ;;  %v6263_v19 = vcombine.low %v746_v54, %v754_v48  ;;  %v4556_v13 = vpack.c.bf16 %v3787_v42, %v3783_v61  ;;  %v8047_v61 = vld [vmem:[#allocation31_spill] sm:$0xff]  ;;  %v8048_v42 = vld [vmem:[#allocation32_spill] sm:$0xff] }
 0x320   :  { %4453 = vmatprep.subr.bf16.mxu0 %v6280_v26  ;;  %4506 = vmatprep.subr.bf16.mxu1 %v6536_v29  ;;  %v3891_v7 = vadd.f32 %v7379_v41, %v7377_v40  ;;  %v4542_v15 = vpack.c.bf16 %v3883_v28, %v3879_v44  ;;  %v4539_v16 = vpack.c.bf16 %v3775_v18, %v3771_v30  ;;  %v8042_v26 = vld [vmem:[#allocation34_spill] sm:$0xff]  ;;  %v8058_v18 = vld [vmem:[#allocation40_spill] sm:$0xff]  ;;  %v8061_v30 = vld [vmem:[#allocation35_spill] sm:$0xff] }
 0x321   :  { %v3997_v29 = vadd.f32 %v8042_v26, %v8041_v0  ;;  %v4103_v54 = vadd.f32 %v7451_v56, %v7449_v63  ;;  %v8051_v63 = vld [vmem:[#allocation25_spill] sm:$0xff]  ;;  %v8052_v56 = vld [vmem:[#allocation26_spill] sm:$0xff] }
 0x322   :  { %v4557_v40 = vpack.c.bf16 %v3891_v7, %v3887_v17  ;;  %v3985_v24 = vadd.f32 %v8052_v56, %v8051_v63  ;;  %v8055_v7 = vld [vmem:[#allocation27_spill] sm:$0xff] }
 0x323   :  { %4454 = vmatpush2.bf16.msra.mxu0 %v6279_v62  ;;  %4507 = vmatpush2.bf16.msra.mxu1 %v6535_v43  ;;  %v4558_v43 = vpack.c.bf16 %v3893_v9, %v3889_v12  ;;  %v3993_v9 = vadd.f32 %v8048_v42, %v8047_v61  ;;  %v8057_v17 = vld [vmem:[#allocation39_spill] sm:$0xff] }
 0x324   :  { %4455 = vmatprep.subr.bf16.mxu0 %v6264_v34  ;;  %4508 = vmatprep.subr.bf16.mxu1 %v6520_v37  ;;  %v4095_v34 = vadd.f32 %v8046_v5, %v8045_v21  ;;  %v7530_v37 = vld [vmem:[%s7998_s4] sm:$0xff]  }
 0x325   :  { %v4559_v28 = vpack.c.bf16 %v3997_v29, %v3993_v9 }
 0x327   :  { %4456 = vmatpush2.bf16.msra.mxu0 %v6263_v19  ;;  %4509 = vmatpush2.bf16.msra.mxu1 %v6519_v3  ;;  %v7473_v8 = vpop.f32.mrf.mxu0  ;;  %v7475_v14 = vpop.f32.mrf.mxu1  ;;  %v8049_v19 = vld [vmem:[#allocation43_spill] sm:$0xff]  ;;  %v8050_v3 = vld [vmem:[#allocation44_spill] sm:$0xff] }
 0x328   :  { %4616 = vmatprep.subr.bf16.mxu0 %v4556_v13  ;;  %4689 = vmatprep.subr.bf16.mxu1 %v4558_v43  ;;  %v4099_v12 = vadd.f32 %v8050_v3, %v8049_v19  ;;  %v4091_v13 = vadd.f32 %v8054_v55, %v8053_v51  ;;  %v8056_v43 = vld [vmem:[#allocation28_spill] sm:$0xff] }
 0x329   :  { %v7483_v45 = vpop.f32.mrf.mxu0  ;;  %v7485_v36 = vpop.f32.mrf.mxu1  ;;  %v3987_v27 = vadd.f32 %v8056_v43, %v8055_v7 }
 0x32a   :  { %4458 = vmatmul.mubr.bf16.vlgmr.msra.gmra.mxu0 %v7249_v46  ;;  %4511 = vmatmul.mubr.bf16.vlgmr.msra.gmra.mxu1 %v7251_v47  ;;  %v3877_v46 = vadd.f32 %v7355_v11, %v7353_v10  ;;  %v3995_v47 = vadd.f32 %v7415_v6, %v7413_v20  ;;  %v8039_v6 = vld [vmem:[#allocation21_spill] sm:$0xff]  ;;  %v4561_v44 = vpack.c.bf16 %v4103_v54, %v4099_v12 }
 0x32b   :  { %4467 = vmatprep.mubr.bf16.mxu0 %v7271_v53  ;;  %4520 = vmatprep.mubr.bf16.mxu1 %v7273_v57  ;;  %v7495_v22 = vpop.f32.mrf.mxu0  ;;  %v7497_v23 = vpop.f32.mrf.mxu1  ;;  %v4101_v53 = vadd.f32 %v7447_v39, %v7445_v38  ;;  %v8043_v38 = vld [vmem:[#allocation29_spill] sm:$0xff]  ;;  %v8044_v39 = vld [vmem:[#allocation30_spill] sm:$0xff]  ;;  %v4197_v26 = vadd.f32 %v7485_v36, %v7483_v45 }
 0x32c   :  { %4617 = vmatpush1.bf16.msra.mxu0 %v4555_v50  ;;  %4690 = vmatpush1.bf16.msra.mxu1 %v4557_v40  ;;  %v4541_v41 = vpack.c.bf16 %v3881_v59, %v3877_v46  ;;  %v4560_v32 = vpack.c.bf16 %v3999_v1, %v3995_v47  ;;  %v3989_v48 = vadd.f32 %v8044_v39, %v8043_v38  ;;  %v8060_v1 = vld [vmem:[#allocation24_spill] sm:$0xff] }
 0x32d   :  { %4618 = vmatprep.subr.bf16.mxu0 %v4540_v35  ;;  %4691 = vmatprep.subr.bf16.mxu1 %v4542_v15  ;;  %v7507_v57 = vpop.f32.mrf.mxu0  ;;  %v7509_v31 = vpop.f32.mrf.mxu1  ;;  %v4562_v33 = vpack.c.bf16 %v4105_v2, %v4101_v53  ;;  %v4093_v35 = vadd.f32 %v8058_v18, %v8057_v17  ;;  %v4546_v59 = vpack.c.bf16 %v4095_v34, %v4091_v13  ;;  %v8059_v15 = vld [vmem:[#allocation23_spill] sm:$0xff]  ;;  %v8062_v46 = vld [vmem:[#allocation36_spill] sm:$0xff] }
 0x32e   :  { %v4544_v50 = vpack.c.bf16 %v3989_v48, %v3985_v24  ;;  %v3983_v2 = vadd.f32 %v8060_v1, %v8059_v15  ;;  %v4089_v47 = vadd.f32 %v8062_v46, %v8061_v30  ;;  %v4199_v29 = vadd.f32 %v7497_v23, %v7495_v22 }
 0x32f   :  { %v7511_v49 = vpop.f32.mrf.mxu0  ;;  %v7513_v10 = vpop.f32.mrf.mxu1 }
 0x330   :  { %4619 = vmatpush1.bf16.msra.mxu0 %v4539_v16  ;;  %4692 = vmatpush1.bf16.msra.mxu1 %v4541_v41  ;;  %v4543_v16 = vpack.c.bf16 %v3987_v27, %v3983_v2  ;;  %v4545_v41 = vpack.c.bf16 %v4093_v35, %v4089_v47  ;;  %v4205_v0 = vadd.f32 %v7513_v10, %v7511_v49 }
 0x331   :  { %4762 = vmatprep.subr.bf16.mxu0 %v4560_v32  ;;  %4835 = vmatprep.subr.bf16.mxu1 %v4562_v33  ;;  %v4153_v11 = vpop.f32.mrf.mxu0  ;;  %v4206_v20 = vpop.f32.mrf.mxu1  ;;  %v7557_v33 = vld [vmem:[%s7998_s4 + $0x8] sm:$0xff]  }
 0x332   :  { %4468 = vmatmul.mubr.bf16.gmra.mxu0 %v8039_v6  ;;  %4521 = vmatmul.mubr.bf16.gmra.mxu1 %v8040_v60  ;;  %v4207_v53 = vadd.f32 %v4206_v20, %v4153_v11  ;;  %v7568_v11 = vld [vmem:[%s7998_s4 + $0x10] sm:$0xff]   ;;  %v7579_v20 = vld [vmem:[%s7998_s4 + $0x18] sm:$0xff]   ;;  %v4201_v60 = vadd.f32 %v7509_v31, %v7507_v57  ;;  %v4195_v57 = vadd.f32 %v7475_v14, %v7473_v8 }
 0x333   :  { %v4155_v62 = vpop.f32.mrf.mxu0  ;;  %v4208_v4 = vpop.f32.mrf.mxu1  ;;  %4636 = vmatprep.mubr.bf16.mxu0 %v8012_v52  ;;  %4709 = vmatprep.mubr.bf16.mxu1 %v8012_v52 }
 0x334   :  { %v4209_v6 = vadd.f32 %v4208_v4, %v4155_v62  ;;  %v4548_v38 = vpack.c.bf16 %v4201_v60, %v4197_v26  ;;  %v4547_v45 = vpack.c.bf16 %v4199_v29, %v4195_v57 }
 0x335   :  { %v4157_v25 = vpop.f32.mrf.mxu0  ;;  %v4210_v58 = vpop.f32.mrf.mxu1 }
 0x336   :  { %v4211_v40 = vadd.f32 %v4210_v58, %v4157_v25  ;;  %v4563_v54 = vpack.c.bf16 %v4209_v6, %v4205_v0 }
 0x338   :  { %v4564_v32 = vpack.c.bf16 %v4211_v40, %v4207_v53 }
 0x33a   :  { %6637 = vmatmul.mubr.msk.bf16.vlgmr.msra.gmra.mxu0 %vm4591_vm1, %v7530_v37  ;;  %6641 = vmatmul.mubr.msk.bf16.vlgmr.msra.gmra.mxu1 %vm4591_vm1, %v7530_v37 }
 0x33b   :  { %4763 = vmatpush1.bf16.msra.mxu0 %v4559_v28  ;;  %4836 = vmatpush1.bf16.msra.mxu1 %v4561_v44 }
 0x33c   :  { %4764 = vmatprep.subr.bf16.mxu0 %v4544_v50  ;;  %4837 = vmatprep.subr.bf16.mxu1 %v4546_v59 }
 0x33d   :  { %4646 = vmatprep.mubr.bf16.mxu0 %v8012_v52  ;;  %4719 = vmatprep.mubr.bf16.mxu1 %v8012_v52 }
 0x33f   :  { %4765 = vmatpush1.bf16.msra.mxu0 %v4543_v16  ;;  %4838 = vmatpush1.bf16.msra.mxu1 %v4545_v41 }
 0x340   :  { %4908 = vmatprep.subr.bf16.mxu0 %v4564_v32 }
 0x342   :  { %6638 = vmatmul.mubr.msk.bf16.gmra.mxu0 %vm4591_vm1, %v7557_v33  ;;  %6642 = vmatmul.mubr.msk.bf16.gmra.mxu1 %vm4591_vm1, %v7557_v33 }
 0x343   :  { %4656 = vmatprep.mubr.bf16.mxu0 %v8012_v52  ;;  %4729 = vmatprep.mubr.bf16.mxu1 %v8012_v52 }
 0x34a   :  { %6639 = vmatmul.mubr.msk.bf16.gmra.mxu0 %vm4591_vm1, %v7568_v11  ;;  %6643 = vmatmul.mubr.msk.bf16.gmra.mxu1 %vm4591_vm1, %v7568_v11 }
 0x34b   :  { %4666 = vmatprep.mubr.bf16.mxu0 %v8012_v52  ;;  %4739 = vmatprep.mubr.bf16.mxu1 %v8012_v52 }
 0x352   :  { %6640 = vmatmul.mubr.msk.bf16.gmra.mxu0 %vm4591_vm1, %v7579_v20  ;;  %6644 = vmatmul.mubr.msk.bf16.gmra.mxu1 %vm4591_vm1, %v7579_v20 }
 0x353   :  { %4782 = vmatprep.mubr.bf16.mxu0 %v8012_v52  ;;  %4855 = vmatprep.mubr.bf16.mxu1 %v8012_v52 }
 0x35a   :  { %6645 = vmatmul.mubr.msk.bf16.vlgmr.msra.gmra.mxu0 %vm4591_vm1, %v7530_v37  ;;  %6649 = vmatmul.mubr.msk.bf16.vlgmr.msra.gmra.mxu1 %vm4591_vm1, %v7530_v37 }
 0x35b   :  { %4909 = vmatpush1.bf16.msra.mxu0 %v4563_v54  ;;  %4792 = vmatprep.mubr.bf16.mxu0 %v8012_v52 }
 0x35c   :  { %4910 = vmatprep.subr.bf16.mxu0 %v4548_v38  ;;  %4865 = vmatprep.mubr.bf16.mxu1 %v8012_v52 }
 0x35f   :  { %4911 = vmatpush1.bf16.msra.mxu0 %v4547_v45 }
 0x362   :  { %6646 = vmatmul.mubr.msk.bf16.gmra.mxu0 %vm4591_vm1, %v7557_v33  ;;  %6650 = vmatmul.mubr.msk.bf16.gmra.mxu1 %vm4591_vm1, %v7557_v33 }
 0x363   :  { %4802 = vmatprep.mubr.bf16.mxu0 %v8012_v52  ;;  %4875 = vmatprep.mubr.bf16.mxu1 %v8012_v52 }
 0x368   :  { %v4247_v36 = vpop.f32.mrf.mxu0  ;;  %v4300_v8 = vpop.f32.mrf.mxu1 }
 0x369   :  { %v4301_v51 = vadd.f32 %v4300_v8, %v4247_v36 }
 0x36a   :  { %v4249_v14 = vpop.f32.mrf.mxu0  ;;  %v4302_v22 = vpop.f32.mrf.mxu1  ;;  %6647 = vmatmul.mubr.msk.bf16.gmra.mxu0 %vm4591_vm1, %v7568_v11  ;;  %6651 = vmatmul.mubr.msk.bf16.gmra.mxu1 %vm4591_vm1, %v7568_v11 }
 0x36b   :  { %4812 = vmatprep.mubr.bf16.mxu0 %v8012_v52  ;;  %4885 = vmatprep.mubr.bf16.mxu1 %v8012_v52  ;;  %v4303_v25 = vadd.f32 %v4302_v22, %v4249_v14 }
 0x36c   :  { %v4251_v23 = vpop.f32.mrf.mxu0  ;;  %v4304_v31 = vpop.f32.mrf.mxu1 }
 0x36d   :  { %v4305_v63 = vadd.f32 %v4304_v31, %v4251_v23 }
 0x36e   :  { %v4253_v49 = vpop.f32.mrf.mxu0  ;;  %v4306_v10 = vpop.f32.mrf.mxu1 }
 0x36f   :  { %v4307_v9 = vadd.f32 %v4306_v10, %v4253_v49  ;;  %v4549_v55 = vpack.c.bf16 %v4305_v63, %v4301_v51 }
 0x370   :  { %v4257_v62 = vpop.f32.mrf.mxu0  ;;  %v4310_v4 = vpop.f32.mrf.mxu1 }
 0x371   :  { %v4311_v12 = vadd.f32 %v4310_v4, %v4257_v62  ;;  %v4550_v24 = vpack.c.bf16 %v4307_v9, %v4303_v25 }
 0x372   :  { %v4259_v39 = vpop.f32.mrf.mxu0  ;;  %v4312_v48 = vpop.f32.mrf.mxu1  ;;  %6648 = vmatmul.mubr.msk.bf16.gmra.mxu0 %vm4591_vm1, %v7579_v20  ;;  %6652 = vmatmul.mubr.msk.bf16.gmra.mxu1 %vm4591_vm1, %v7579_v20 }
 0x373   :  { %4928 = vmatprep.mubr.bf16.mxu0 %v8012_v52  ;;  %5001 = vmatprep.mubr.bf16.mxu1 %v8012_v52  ;;  %v4313_v19 = vadd.f32 %v4312_v48, %v4259_v39 }
 0x374   :  { %v4261_v21 = vpop.f32.mrf.mxu0  ;;  %v4314_v5 = vpop.f32.mrf.mxu1 }
 0x375   :  { %v4315_v34 = vadd.f32 %v4314_v5, %v4261_v21 }
 0x376   :  { %v4263_v61 = vpop.f32.mrf.mxu0  ;;  %v4316_v42 = vpop.f32.mrf.mxu1 }
 0x377   :  { %v4317_v3 = vadd.f32 %v4316_v42, %v4263_v61  ;;  %v4565_v56 = vpack.c.bf16 %v4315_v34, %v4311_v12  ;;  %v5188_v34 = vld [vmem:[#allocation7] sm:$0xff]  ;;  %v5189_v12 = vld [vmem:[#allocation7 + $0x8] sm:$0xff] }
 0x379   :  { %v4566_v58 = vpack.c.bf16 %v4317_v3, %v4313_v19 }
 0x37a   :  { %6653 = vmatmul.mubr.msk.bf16.vlgmr.msra.gmra.mxu0 %vm4591_vm1, %v7530_v37 }
 0x37b   :  { %4981 = vmatprep.subr.bf16.mxu1 %v4566_v58  ;;  %4938 = vmatprep.mubr.bf16.mxu0 %v8012_v52  ;;  %v5190_v58 = vld [vmem:[#allocation7 + $0x10] sm:$0xff] }
 0x37c   :  { %4982 = vmatpush1.bf16.msra.mxu1 %v4565_v56 }
 0x37d   :  { %4983 = vmatprep.subr.bf16.mxu1 %v4550_v24 }
 0x380   :  { %4984 = vmatpush1.bf16.msra.mxu1 %v4549_v55 }
 0x382   :  { %6654 = vmatmul.mubr.msk.bf16.gmra.mxu0 %vm4591_vm1, %v7557_v33 }
 0x383   :  { %4948 = vmatprep.mubr.bf16.mxu0 %v8012_v52  ;;  %6657 = vmatmul.mubr.msk.bf16.vlgmr.msra.gmra.mxu1 %vm4591_vm1, %v7530_v37 }
 0x384   :  { %5011 = vmatprep.mubr.bf16.mxu1 %v8012_v52 }
 0x38a   :  { %6655 = vmatmul.mubr.msk.bf16.gmra.mxu0 %vm4591_vm1, %v7568_v11 }
 0x38b   :  { %4958 = vmatprep.mubr.bf16.mxu0 %v8012_v52  ;;  %6658 = vmatmul.mubr.msk.bf16.gmra.mxu1 %vm4591_vm1, %v7557_v33 }
 0x38c   :  { %5021 = vmatprep.mubr.bf16.mxu1 %v8012_v52 }
 0x392   :  { %6656 = vmatmul.mubr.msk.bf16.gmra.mxu0 %vm4591_vm1, %v7579_v20 }
 0x393   :  { %5074 = vmatprep.mubr.bf16.mxu0 %v8012_v52  ;;  %6659 = vmatmul.mubr.msk.bf16.gmra.mxu1 %vm4591_vm1, %v7568_v11 }
 0x394   :  { %5031 = vmatprep.mubr.bf16.mxu1 %v8012_v52 }
 0x39b   :  { %6660 = vmatmul.mubr.msk.bf16.gmra.mxu1 %vm4591_vm1, %v7579_v20 }
 0x39c   :  { %5147 = vmatprep.mubr.bf16.mxu1 %v8012_v52 }
 0x3a9   :  { %v4353_v13 = vpop.f32.mrf.mxu0  ;;  %v4406_v7 = vpop.f32.mrf.mxu1 }
 0x3aa   :  { %v4407_v29 = vadd.f32 %v4406_v7, %v4353_v13  ;;  %v5204_v7 = vld [vmem:[#allocation7 + $0x80] sm:$0xff] }
 0x3ab   :  { %v4355_v43 = vpop.f32.mrf.mxu0  ;;  %v4408_v27 = vpop.f32.mrf.mxu1 }
 0x3ac   :  { %v4409_v32 = vadd.f32 %v4408_v27, %v4355_v43  ;;  %v5191_v27 = vld [vmem:[#allocation7 + $0x18] sm:$0xff] }
 0x3ad   :  { %v4357_v28 = vpop.f32.mrf.mxu0  ;;  %v4410_v17 = vpop.f32.mrf.mxu1 }
 0x3ae   :  { %v4411_v60 = vadd.f32 %v4410_v17, %v4357_v28 }
 0x3af   :  { %v4359_v18 = vpop.f32.mrf.mxu0  ;;  %v4412_v35 = vpop.f32.mrf.mxu1 }
 0x3b0   :  { %v4413_v47 = vadd.f32 %v4412_v35, %v4359_v18  ;;  %v4551_v54 = vpack.c.bf16 %v4411_v60, %v4407_v29  ;;  %v5222_v29 = vld [vmem:[#allocation7 + $0x110] sm:$0xff] }
 0x3b1   :  { %v4363_v44 = vpop.f32.mrf.mxu0  ;;  %v4416_v50 = vpop.f32.mrf.mxu1 }
 0x3b2   :  { %v4417_v41 = vadd.f32 %v4416_v50, %v4363_v44  ;;  %v4552_v26 = vpack.c.bf16 %v4413_v47, %v4409_v32  ;;  %v5205_v50 = vld [vmem:[#allocation7 + $0x88] sm:$0xff]  ;;  %v5220_v47 = vld [vmem:[#allocation7 + $0x100] sm:$0xff] }
 0x3b3   :  { %v4365_v59 = vpop.f32.mrf.mxu0  ;;  %v4418_v40 = vpop.f32.mrf.mxu1 }
 0x3b4   :  { %v4419_v53 = vadd.f32 %v4418_v40, %v4365_v59  ;;  %v5206_v40 = vld [vmem:[#allocation7 + $0x90] sm:$0xff] }
 0x3b5   :  { %v4367_v15 = vpop.f32.mrf.mxu0  ;;  %v4420_v1 = vpop.f32.mrf.mxu1 }
 0x3b6   :  { %v4421_v2 = vadd.f32 %v4420_v1, %v4367_v15 }
 0x3b7   :  { %v4369_v30 = vpop.f32.mrf.mxu0  ;;  %v4422_v46 = vpop.f32.mrf.mxu1 }
 0x3b8   :  { %v4423_v16 = vadd.f32 %v4422_v46, %v4369_v30  ;;  %v4567_v0 = vpack.c.bf16 %v4421_v2, %v4417_v41 }
 0x3ba   :  { %v4568_v6 = vpack.c.bf16 %v4423_v16, %v4419_v53  ;;  %v5207_v16 = vld [vmem:[#allocation7 + $0x98] sm:$0xff] }
 0x3bc   :  { %5054 = vmatprep.subr.bf16.mxu0 %v4568_v6 }
 0x3bd   :  { %5055 = vmatpush1.bf16.msra.mxu0 %v4567_v0  ;;  %v5221_v0 = vld [vmem:[#allocation7 + $0x108] sm:$0xff] }
 0x3be   :  { %5056 = vmatprep.subr.bf16.mxu0 %v4552_v26 }
 0x3c1   :  { %5057 = vmatpush1.bf16.msra.mxu0 %v4551_v54 }
 0x3c4   :  { %6661 = vmatmul.mubr.msk.bf16.vlgmr.msra.gmra.mxu0 %vm4591_vm1, %v7530_v37 }
 0x3c5   :  { %5084 = vmatprep.mubr.bf16.mxu0 %v8012_v52 }
 0x3cc   :  { %6662 = vmatmul.mubr.msk.bf16.gmra.mxu0 %vm4591_vm1, %v7557_v33 }
 0x3cd   :  { %5094 = vmatprep.mubr.bf16.mxu0 %v8012_v52 }
 0x3d4   :  { %6663 = vmatmul.mubr.msk.bf16.gmra.mxu0 %vm4591_vm1, %v7568_v11 }
 0x3d5   :  { %5104 = vmatprep.mubr.bf16.mxu0 %v8012_v52 }
 0x3dc   :  { %6664 = vmatmul.mubr.msk.bf16.gmra.mxu0 %vm4591_vm1, %v7579_v20 }
 0x3dd   :  { %5708 = vmatprep.mubr.bf16.mxu0 %v8012_v52 }
 0x3ea   :  { %v4459_v38 = vpop.f32.mrf.mxu0  ;;  %v4512_v57 = vpop.f32.mrf.mxu1 }
 0x3eb   :  { %v4513_v35 = vadd.f32 %v4512_v57, %v4459_v38 }
 0x3ec   :  { %v4461_v45 = vpop.f32.mrf.mxu0  ;;  %v4514_v36 = vpop.f32.mrf.mxu1 }
 0x3ed   :  { %v4515_v63 = vadd.f32 %v4514_v36, %v4461_v45 }
 0x3ee   :  { %v4463_v8 = vpop.f32.mrf.mxu0  ;;  %v4516_v14 = vpop.f32.mrf.mxu1 }
 0x3ef   :  { %v4517_v51 = vadd.f32 %v4516_v14, %v4463_v8  ;;  %v5236_v8 = vld [vmem:[#allocation7 + $0x180] sm:$0xff] }
 0x3f0   :  { %v4465_v22 = vpop.f32.mrf.mxu0  ;;  %v4518_v23 = vpop.f32.mrf.mxu1 }
 0x3f1   :  { %v4519_v61 = vadd.f32 %v4518_v23, %v4465_v22  ;;  %v4553_v30 = vpack.c.bf16 %v4517_v51, %v4513_v35  ;;  %v5223_v22 = vld [vmem:[#allocation7 + $0x118] sm:$0xff] }
 0x3f2   :  { %v4469_v31 = vpop.f32.mrf.mxu0  ;;  %v4522_v49 = vpop.f32.mrf.mxu1 }
 0x3f3   :  { %v4523_v19 = vadd.f32 %v4522_v49, %v4469_v31  ;;  %v4554_v28 = vpack.c.bf16 %v4519_v61, %v4515_v63 }
 0x3f4   :  { %v4471_v10 = vpop.f32.mrf.mxu0  ;;  %v4524_v62 = vpop.f32.mrf.mxu1 }
 0x3f5   :  { %v4525_v42 = vadd.f32 %v4524_v62, %v4471_v10  ;;  %v5237_v62 = vld [vmem:[#allocation7 + $0x188] sm:$0xff] }
 0x3f6   :  { %v4473_v4 = vpop.f32.mrf.mxu0  ;;  %v4526_v39 = vpop.f32.mrf.mxu1 }
 0x3f7   :  { %v4527_v48 = vadd.f32 %v4526_v39, %v4473_v4  ;;  %v5238_v39 = vld [vmem:[#allocation7 + $0x190] sm:$0xff] }
 0x3f8   :  { %v4475_v21 = vpop.f32.mrf.mxu0  ;;  %v4528_v5 = vpop.f32.mrf.mxu1 }
 0x3f9   :  { %v4529_v9 = vadd.f32 %v4528_v5, %v4475_v21  ;;  %v4569_v55 = vpack.c.bf16 %v4527_v48, %v4523_v19  ;;  %v5239_v19 = vld [vmem:[#allocation7 + $0x198] sm:$0xff] }
 0x3fa   :  { %v4638_v3 = vpop.f32.mrf.mxu0  ;;  %v4711_v25 = vpop.f32.mrf.mxu1 }
 0x3fb   :  { %v4570_v56 = vpack.c.bf16 %v4529_v9, %v4525_v42  ;;  %v5316_v24 = vmul.f32 %v5188_v34, %v4638_v3  ;;  %v5318_v18 = vmul.f32 %v5190_v58, %v4711_v25  ;;  %v5252_v42 = vld [vmem:[#allocation7 + $0x200] sm:$0xff]  ;;  %v5253_v58 = vld [vmem:[#allocation7 + $0x208] sm:$0xff] }
 0x3fc   :  { %v4640_v13 = vpop.f32.mrf.mxu0  ;;  %v4713_v43 = vpop.f32.mrf.mxu1 }
 0x3fd   :  { %5127 = vmatprep.subr.bf16.mxu1 %v4570_v56  ;;  %v5317_v17 = vmul.f32 %v5189_v12, %v4640_v13  ;;  %v5319_v2 = vmul.f32 %v5191_v27, %v4713_v43  ;;  %v5254_v56 = vld [vmem:[#allocation7 + $0x210] sm:$0xff]  ;;  %v5268_v43 = vld [vmem:[#allocation7 + $0x280] sm:$0xff] }
 0x3fe   :  { %5128 = vmatpush1.bf16.msra.mxu1 %v4569_v55  ;;  %v4642_v44 = vpop.f32.mrf.mxu0  ;;  %v4715_v59 = vpop.f32.mrf.mxu1 }
 0x3ff   :  { %5129 = vmatprep.subr.bf16.mxu1 %v4554_v28  ;;  %v5444_v15 = vadd.f32 %v5317_v17, %v5316_v24  ;;  %v5332_v1 = vmul.f32 %v5204_v7, %v4642_v44  ;;  %v5334_v6 = vmul.f32 %v5206_v40, %v4715_v59  ;;  %v5255_v28 = vld [vmem:[#allocation7 + $0x218] sm:$0xff]  ;;  %v5270_v40 = vld [vmem:[#allocation7 + $0x290] sm:$0xff] }
 0x400   :  { %v4644_v46 = vpop.f32.mrf.mxu0  ;;  %v4717_v53 = vpop.f32.mrf.mxu1 }
 0x401   :  { %v5333_v41 = vmul.f32 %v5205_v50, %v4644_v46  ;;  %v5452_v32 = vadd.f32 %v5444_v15, %v5318_v18  ;;  %v5335_v45 = vmul.f32 %v5207_v16, %v4717_v53  ;;  %v5269_v50 = vld [vmem:[#allocation7 + $0x288] sm:$0xff]  ;;  %v5271_v16 = vld [vmem:[#allocation7 + $0x298] sm:$0xff] }
 0x402   :  { %5130 = vmatpush1.bf16.msra.mxu1 %v4553_v30  ;;  %v4648_v60 = vpop.f32.mrf.mxu0  ;;  %v4721_v26 = vpop.f32.mrf.mxu1 }
 0x403   :  { %v5445_v54 = vadd.f32 %v5333_v41, %v5332_v1  ;;  %v5348_v38 = vmul.f32 %v5220_v47, %v4648_v60  ;;  %v7657_v57 = vadd.f32 %v5452_v32, %v5319_v2  ;;  %v5350_v49 = vmul.f32 %v5222_v29, %v4721_v26  ;;  %v5284_v47 = vld [vmem:[#allocation7 + $0x300] sm:$0xff]  ;;  %v5285_v60 = vld [vmem:[#allocation7 + $0x308] sm:$0xff]  ;;  %v5286_v26 = vld [vmem:[#allocation7 + $0x310] sm:$0xff] }
 0x404   :  { %v4650_v36 = vpop.f32.mrf.mxu0  ;;  %v4723_v14 = vpop.f32.mrf.mxu1 }
 0x405   :  { %6665 = vmatmul.mubr.msk.bf16.vlgmr.msra.gmra.mxu1 %vm4591_vm1, %v7530_v37  ;;  %v5349_v23 = vmul.f32 %v5221_v0, %v4650_v36  ;;  %v5453_v31 = vadd.f32 %v5445_v54, %v5334_v6  ;;  %v5351_v34 = vmul.f32 %v5223_v22, %v4723_v14  ;;  %v5287_v22 = vld [vmem:[#allocation7 + $0x318] sm:$0xff] }
 0x406   :  { %5157 = vmatprep.mubr.bf16.mxu1 %v8012_v52  ;;  %v4652_v10 = vpop.f32.mrf.mxu0  ;;  %v4725_v4 = vpop.f32.mrf.mxu1 }
 0x407   :  { %v5446_v48 = vadd.f32 %v5349_v23, %v5348_v38  ;;  %v5364_v21 = vmul.f32 %v5236_v8, %v4652_v10  ;;  %v7662_v5 = vadd.f32 %v5453_v31, %v5335_v45  ;;  %v5366_v12 = vmul.f32 %v5238_v39, %v4725_v4  ;;  %v5300_v8 = vld [vmem:[#allocation7 + $0x380] sm:$0xff]  ;;  %v5302_v39 = vld [vmem:[#allocation7 + $0x390] sm:$0xff] }
 0x408   :  { %v4654_v61 = vpop.f32.mrf.mxu0  ;;  %v4727_v9 = vpop.f32.mrf.mxu1 }
 0x409   :  { %v5365_v3 = vmul.f32 %v5237_v62, %v4654_v61  ;;  %v5454_v37 = vadd.f32 %v5446_v48, %v5350_v49  ;;  %v5367_v13 = vmul.f32 %v5239_v19, %v4727_v9  ;;  %v5301_v62 = vld [vmem:[#allocation7 + $0x388] sm:$0xff]  ;;  %v5303_v9 = vld [vmem:[#allocation7 + $0x398] sm:$0xff] }
 0x40a   :  { %v4658_v25 = vpop.f32.mrf.mxu0  ;;  %v4731_v63 = vpop.f32.mrf.mxu1 }
 0x40b   :  { %v5447_v24 = vadd.f32 %v5365_v3, %v5364_v21  ;;  %v5380_v51 = vmul.f32 %v5252_v42, %v4658_v25  ;;  %v7664_v55 = vadd.f32 %v5454_v37, %v5351_v34  ;;  %v5382_v35 = vmul.f32 %v5254_v56, %v4731_v63 }
 0x40c   :  { %v4660_v7 = vpop.f32.mrf.mxu0  ;;  %v4733_v27 = vpop.f32.mrf.mxu1 }
 0x40d   :  { %6666 = vmatmul.mubr.msk.bf16.gmra.mxu1 %vm4591_vm1, %v7557_v33  ;;  %v5381_v17 = vmul.f32 %v5253_v58, %v4660_v7  ;;  %v5455_v18 = vadd.f32 %v5447_v24, %v5366_v12  ;;  %v5383_v30 = vmul.f32 %v5255_v28, %v4733_v27  ;;  %v6864_v7 = vld [vmem:[#allocation9 + $0x74] ss:$8 sps:$4 sm:$0xff]   ;;  %v6867_v27 = vld [vmem:[#allocation9 + $0x64] ss:$8 sps:$4 sm:$0xff]   ;;  %v6865_v28 = vld [vmem:[#allocation9 + $0x60] ss:$8 sps:$4 sm:$0xff]  }
 0x40e   :  { %5167 = vmatprep.mubr.bf16.mxu1 %v8012_v52  ;;  %v4662_v44 = vpop.f32.mrf.mxu0  ;;  %v4735_v59 = vpop.f32.mrf.mxu1  ;;  %5676 = vmatprep.subr.bf16.mxu0 %v6864_v7 }
 0x40f   :  { %v5448_v15 = vadd.f32 %v5381_v17, %v5380_v51  ;;  %v5396_v1 = vmul.f32 %v5268_v43, %v4662_v44  ;;  %v7669_v2 = vadd.f32 %v5455_v18, %v5367_v13  ;;  %v5398_v32 = vmul.f32 %v5270_v40, %v4735_v59  ;;  %v6862_v13 = vld [vmem:[#allocation9 + $0x70] ss:$8 sps:$4 sm:$0xff]   ;;  %v6870_v17 = vld [vmem:[#allocation9 + $0x54] ss:$8 sps:$4 sm:$0xff]  }
 0x410   :  { %v4664_v46 = vpop.f32.mrf.mxu0  ;;  %v4737_v53 = vpop.f32.mrf.mxu1  ;;  %5677 = vmatpush1.bf16.msra.mxu0 %v6862_v13  ;;  %v6876_v59 = vld [vmem:[#allocation9 + $0x34] ss:$8 sps:$4 sm:$0xff]  }
 0x411   :  { %v5397_v41 = vmul.f32 %v5269_v50, %v4664_v46  ;;  %v5456_v33 = vadd.f32 %v5448_v15, %v5382_v35  ;;  %v5399_v45 = vmul.f32 %v5271_v16, %v4737_v53  ;;  %5678 = vmatprep.subr.bf16.mxu0 %v6867_v27  ;;  %v6873_v35 = vld [vmem:[#allocation9 + $0x44] ss:$8 sps:$4 sm:$0xff]   ;;  %v6871_v50 = vld [vmem:[#allocation9 + $0x40] ss:$8 sps:$4 sm:$0xff]   ;;  %v6874_v15 = vld [vmem:[#allocation9 + $0x30] ss:$8 sps:$4 sm:$0xff]  }
 0x412   :  { %v4668_v6 = vpop.f32.mrf.mxu0  ;;  %v4741_v0 = vpop.f32.mrf.mxu1  ;;  %v6879_v53 = vld [vmem:[#allocation9 + $0x24] ss:$8 sps:$4 sm:$0xff]   ;;  %v6892_v13 = vld [vmem:[%s8002_s8 + $0x60] sm:$0xff]  }
 0x413   :  { %v5449_v29 = vadd.f32 %v5397_v41, %v5396_v1  ;;  %v5412_v54 = vmul.f32 %v5284_v47, %v4668_v6  ;;  %v7671_v38 = vadd.f32 %v5456_v33, %v5383_v30  ;;  %v5414_v49 = vmul.f32 %v5286_v26, %v4741_v0  ;;  %v6877_v41 = vld [vmem:[#allocation9 + $0x20] ss:$8 sps:$4 sm:$0xff]   ;;  %v6885_v26 = vld [vmem:[#allocation9 + $0x4] ss:$8 sps:$4 sm:$0xff]  }
 0x414   :  { %v4670_v36 = vpop.f32.mrf.mxu0  ;;  %v4743_v14 = vpop.f32.mrf.mxu1  ;;  %5679 = vmatpush1.bf16.msra.mxu0 %v6865_v28  ;;  %v6893_v27 = vld [vmem:[%s8002_s8 + $0x20] sm:$0xff]  }
 0x415   :  { %6667 = vmatmul.mubr.msk.bf16.gmra.mxu1 %vm4591_vm1, %v7568_v11  ;;  %v5413_v23 = vmul.f32 %v5285_v60, %v4670_v36  ;;  %v5457_v31 = vadd.f32 %v5449_v29, %v5398_v32  ;;  %v5415_v61 = vmul.f32 %v5287_v22, %v4743_v14  ;;  %5680 = vmatprep.subr.bf16.mxu0 %v6870_v17  ;;  %v6882_v32 = vld [vmem:[#allocation9 + $0x14] ss:$8 sps:$4 sm:$0xff]   ;;  %v6880_v60 = vld [vmem:[#allocation9 + $0x10] ss:$8 sps:$4 sm:$0xff]  }
 0x416   :  { %5177 = vmatprep.mubr.bf16.mxu1 %v8012_v52  ;;  %v4672_v10 = vpop.f32.mrf.mxu0  ;;  %v4745_v4 = vpop.f32.mrf.mxu1  ;;  %v6894_v17 = vld [vmem:[%s8002_s8 + $0x58] sm:$0xff]   ;;  %v5192_v52 = vld [vmem:[#allocation7 + $0x20] sm:$0xff] }
 0x417   :  { %v5450_v48 = vadd.f32 %v5413_v23, %v5412_v54  ;;  %v5428_v21 = vmul.f32 %v5300_v8, %v4672_v10  ;;  %v7676_v34 = vadd.f32 %v5457_v31, %v5399_v45  ;;  %v5430_v37 = vmul.f32 %v5302_v39, %v4745_v4  ;;  %v6883_v54 = vld [vmem:[#allocation9] ss:$8 sps:$4 sm:$0xff]  }
 0x418   :  { %v4674_v42 = vpop.f32.mrf.mxu0  ;;  %v4747_v11 = vpop.f32.mrf.mxu1 }
 0x419   :  { %v5429_v19 = vmul.f32 %v5301_v62, %v4674_v42  ;;  %v5458_v3 = vadd.f32 %v5450_v48, %v5414_v49  ;;  %v5431_v58 = vmul.f32 %v5303_v9, %v4747_v11  ;;  %v6887_v42 = vld [vmem:[%s8002_s8 + $0x38] sm:$0xff]   ;;  %v6888_v9 = vld [vmem:[%s8002_s8 + $0x70] sm:$0xff]   ;;  %v6890_v11 = vld [vmem:[%s8002_s8 + $0x68] sm:$0xff]  }
 0x41a   :  { %v7682_v56 = vpop.f32.mrf.mxu0  ;;  %v7706_v33 = vpop.f32.mrf.mxu1 }
 0x41b   :  { %v5451_v12 = vadd.f32 %v5429_v19, %v5428_v21  ;;  %v7678_v25 = vadd.f32 %v5458_v3, %v5415_v61  ;;  %v6886_v61 = vld [vmem:[%s8002_s8 + $0x78] sm:$0xff]   ;;  %v6889_v3 = vld [vmem:[%s8002_s8 + $0x30] sm:$0xff]  }
 0x41c   :  { %v7686_v51 = vpop.f32.mrf.mxu0  ;;  %v7710_v0 = vpop.f32.mrf.mxu1  ;;  %6704 = vmatprep.subr.bf16.mxu1 %v6886_v61 }
 0x41d   :  { %6668 = vmatmul.mubr.msk.bf16.gmra.mxu1 %vm4591_vm1, %v7579_v20  ;;  %v5459_v63 = vadd.f32 %v5451_v12, %v5430_v37  ;;  %v6868_v20 = vld [vmem:[#allocation9 + $0x50] ss:$8 sps:$4 sm:$0xff]  }
 0x41e   :  { %v7688_v43 = vpop.f32.mrf.mxu0  ;;  %5681 = vmatpush1.bf16.msra.mxu0 %v6868_v20  ;;  %v7714_v45 = vpop.f32.mrf.mxu1  ;;  %6705 = vmatpush3.bf16.msra.mxu1 %v6887_v42 }
 0x41f   :  { %v7684_v24 = vadd.f32 %v5459_v63, %v5431_v58  ;;  %5682 = vmatprep.subr.bf16.mxu0 %v6873_v35  ;;  %6706 = vmatprep.subr.bf16.mxu1 %v6888_v9  ;;  %v6891_v58 = vld [vmem:[%s8002_s8 + $0x28] sm:$0xff]   ;;  %v6895_v35 = vld [vmem:[%s8002_s8 + $0x18] sm:$0xff]  }
 0x420   :  { %v7690_v18 = vpop.f32.mrf.mxu0  ;;  %v7718_v8 = vpop.f32.mrf.mxu1 }
 0x422   :  { %v7692_v44 = vpop.f32.mrf.mxu0  ;;  %5683 = vmatpush1.bf16.msra.mxu0 %v6871_v50  ;;  %v7722_v22 = vpop.f32.mrf.mxu1  ;;  %6707 = vmatpush3.bf16.msra.mxu1 %v6889_v3 }
 0x423   :  { %5684 = vmatprep.subr.bf16.mxu0 %v6876_v59  ;;  %6708 = vmatprep.subr.bf16.mxu1 %v6890_v11 }
 0x424   :  { %v7694_v40 = vpop.f32.mrf.mxu0  ;;  %v7726_v31 = vpop.f32.mrf.mxu1 }
 0x426   :  { %v7696_v1 = vpop.f32.mrf.mxu0  ;;  %5685 = vmatpush1.bf16.msra.mxu0 %v6874_v15  ;;  %v7730_v10 = vpop.f32.mrf.mxu1  ;;  %6709 = vmatpush3.bf16.msra.mxu1 %v6891_v58 }
 0x427   :  { %5686 = vmatprep.subr.bf16.mxu0 %v6879_v53  ;;  %6710 = vmatprep.subr.bf16.mxu1 %v6892_v13 }
 0x428   :  { %v7698_v30 = vpop.f32.mrf.mxu0  ;;  %v7734_v4 = vpop.f32.mrf.mxu1 }
 0x42a   :  { %v7700_v46 = vpop.f32.mrf.mxu0  ;;  %5687 = vmatpush1.bf16.msra.mxu0 %v6877_v41  ;;  %v7738_v48 = vpop.f32.mrf.mxu1  ;;  %6711 = vmatpush3.bf16.msra.mxu1 %v6893_v27 }
 0x42b   :  { %5688 = vmatprep.subr.bf16.mxu0 %v6882_v32  ;;  %6712 = vmatprep.subr.bf16.mxu1 %v6894_v17 }
 0x42c   :  { %v7702_v47 = vpop.f32.mrf.mxu0  ;;  %v7751_v19 = vpop.f32.mrf.mxu1 }
 0x42e   :  { %v7704_v16 = vpop.f32.mrf.mxu0  ;;  %5689 = vmatpush1.bf16.msra.mxu0 %v6880_v60  ;;  %v7761_v12 = vpop.f32.mrf.mxu1  ;;  %6713 = vmatpush3.bf16.msra.mxu1 %v6895_v35 }
 0x42f   :  { %5690 = vmatprep.subr.bf16.mxu0 %v6885_v26 }
 0x430   :  { %v7708_v6 = vpop.f32.mrf.mxu0  ;;  %v7771_v7 = vpop.f32.mrf.mxu1 }
 0x432   :  { %v7712_v29 = vpop.f32.mrf.mxu0  ;;  %5691 = vmatpush1.bf16.msra.mxu0 %v6883_v54  ;;  %v7781_v20 = vpop.f32.mrf.mxu1 }
 0x434   :  { %v7716_v36 = vpop.f32.mrf.mxu0  ;;  %v7788_v59 = vpop.f32.mrf.mxu1 }
 0x435   :  { %8064 = vst [vmem:[#allocation22_spill] sm:$0xff] %v7788_v59 }
 0x436   :  { %v7720_v14 = vpop.f32.mrf.mxu0  ;;  %v7792_v53 = vpop.f32.mrf.mxu1 }
 0x438   :  { %v7724_v23 = vpop.f32.mrf.mxu0  ;;  %v7796_v32 = vpop.f32.mrf.mxu1 }
 0x439   :  { %8067 = vst [vmem:[#allocation29_spill] sm:$0xff] %v7796_v32 }
 0x43a   :  { %v7728_v49 = vpop.f32.mrf.mxu0 }
 0x43c   :  { %v7732_v62 = vpop.f32.mrf.mxu0 }
 0x43e   :  { %v7736_v39 = vpop.f32.mrf.mxu0 }
 0x440   :  { %v7740_v21 = vpop.f32.mrf.mxu0 }
 0x442   :  { %v7756_v37 = vpop.f32.mrf.mxu0 }
 0x443   :  { %v7800_v26 = vpop.f32.mrf.mxu1 }
 0x444   :  { %v7766_v63 = vpop.f32.mrf.mxu0 }
 0x445   :  { %v7804_v61 = vpop.f32.mrf.mxu1 }
 0x446   :  { %v7776_v28 = vpop.f32.mrf.mxu0 }
 0x447   :  { %v7808_v9 = vpop.f32.mrf.mxu1 }
 0x448   :  { %v7786_v50 = vpop.f32.mrf.mxu0 }
 0x449   :  { %8063 = vst [vmem:[#allocation21_spill] sm:$0xff] %v7786_v50  ;;  %v7812_v11 = vpop.f32.mrf.mxu1 }
 0x44a   :  { %v7790_v15 = vpop.f32.mrf.mxu0  ;;  %8072 = vst [vmem:[#allocation32_spill] sm:$0xff] %v7812_v11 }
 0x44b   :  { %8065 = vst [vmem:[#allocation33_spill] sm:$0xff] %v7790_v15  ;;  %v7816_v13 = vpop.f32.mrf.mxu1  ;;  %v5224_v15 = vld [vmem:[#allocation7 + $0x120] sm:$0xff] }
 0x44c   :  { %v7794_v41 = vpop.f32.mrf.mxu0  ;;  %8074 = vst [vmem:[#allocation44_spill] sm:$0xff] %v7816_v13  ;;  %v5209_v13 = vld [vmem:[#allocation7 + $0xa8] sm:$0xff] }
 0x44d   :  { %8066 = vst [vmem:[#allocation34_spill] sm:$0xff] %v7794_v41  ;;  %v7820_v17 = vpop.f32.mrf.mxu1  ;;  %v5320_v41 = vmul.f32 %v5192_v52, %v7682_v56  ;;  %v5337_v59 = vmul.f32 %v5209_v13, %v7690_v18  ;;  %v5194_v52 = vld [vmem:[#allocation7 + $0x30] sm:$0xff]  ;;  %v5211_v13 = vld [vmem:[#allocation7 + $0xb8] sm:$0xff] }
 0x44e   :  { %v7798_v60 = vpop.f32.mrf.mxu0  ;;  %8076 = vst [vmem:[#allocation26_spill] sm:$0xff] %v7820_v17  ;;  %v5322_v50 = vmul.f32 %v5194_v52, %v7706_v33  ;;  %v5272_v33 = vld [vmem:[#allocation7 + $0x2a0] sm:$0xff] }
 0x44f   :  { %8068 = vst [vmem:[#allocation30_spill] sm:$0xff] %v7798_v60 }
 0x450   :  { %v7802_v54 = vpop.f32.mrf.mxu0 }
 0x451   :  { %8069 = vst [vmem:[#allocation41_spill] sm:$0xff] %v7802_v54  ;;  %v7824_v54 = vpop.f32.mrf.mxu1 }
 0x452   :  { %v7806_v42 = vpop.f32.mrf.mxu0  ;;  %8078 = vst [vmem:[#allocation38_spill] sm:$0xff] %v7824_v54 }
 0x453   :  { %8070 = vst [vmem:[#allocation42_spill] sm:$0xff] %v7806_v42  ;;  %v5208_v42 = vld [vmem:[#allocation7 + $0xa0] sm:$0xff] }
 0x454   :  { %v7810_v3 = vpop.f32.mrf.mxu0  ;;  %v5336_v60 = vmul.f32 %v5208_v42, %v7688_v43  ;;  %v5240_v43 = vld [vmem:[#allocation7 + $0x1a0] sm:$0xff]  ;;  %v5210_v42 = vld [vmem:[#allocation7 + $0xb0] sm:$0xff] }
 0x455   :  { %8071 = vst [vmem:[#allocation31_spill] sm:$0xff] %v7810_v3  ;;  %v5193_v3 = vld [vmem:[#allocation7 + $0x28] sm:$0xff] }
 0x456   :  { %v7814_v58 = vpop.f32.mrf.mxu0  ;;  %v5321_v17 = vmul.f32 %v5193_v3, %v7686_v51  ;;  %v5469_v54 = vadd.f32 %v7662_v5, %v5336_v60  ;;  %v5195_v3 = vld [vmem:[#allocation7 + $0x38] sm:$0xff]  ;;  %v5338_v5 = vmul.f32 %v5210_v42, %v7714_v45  ;;  %v5212_v42 = vld [vmem:[#allocation7 + $0xc0] sm:$0xff] }
 0x457   :  { %8073 = vst [vmem:[#allocation43_spill] sm:$0xff] %v7814_v58  ;;  %v7830_v58 = vpop.f32.mrf.mxu1  ;;  %v5323_v52 = vmul.f32 %v5195_v3, %v7710_v0  ;;  %v5257_v0 = vld [vmem:[#allocation7 + $0x228] sm:$0xff]  ;;  %v5400_v3 = vmul.f32 %v5272_v33, %v7704_v16 }
 0x458   :  { %v7818_v27 = vpop.f32.mrf.mxu0  ;;  %8080 = vst [vmem:[#allocation28_spill] sm:$0xff] %v7830_v58  ;;  %v5225_v58 = vld [vmem:[#allocation7 + $0x128] sm:$0xff]  ;;  %v5477_v51 = vadd.f32 %v5469_v54, %v5337_v59 }
 0x459   :  { %8075 = vst [vmem:[#allocation25_spill] sm:$0xff] %v7818_v27  ;;  %v5468_v27 = vadd.f32 %v7657_v57, %v5320_v41  ;;  %v7838_v56 = vpop.f32.mrf.mxu1  ;;  %v5368_v41 = vmul.f32 %v5240_v43, %v7696_v1  ;;  %v5339_v43 = vmul.f32 %v5211_v13, %v7718_v8  ;;  %v5385_v13 = vmul.f32 %v5257_v0, %v7702_v47  ;;  %v5213_v33 = vld [vmem:[#allocation7 + $0xc8] sm:$0xff]  ;;  %v5228_v47 = vld [vmem:[#allocation7 + $0x140] sm:$0xff] }
 0x45a   :  { %8081 = vst [vmem:[#allocation39_spill] sm:$0xff] %v7838_v56  ;;  %v5256_v56 = vld [vmem:[#allocation7 + $0x220] sm:$0xff]  ;;  %v5485_v54 = vadd.f32 %v5477_v51, %v5338_v5 }
 0x45b   :  { %v5476_v11 = vadd.f32 %v5468_v27, %v5321_v17  ;;  %v7846_v18 = vpop.f32.mrf.mxu1  ;;  %v5226_v27 = vld [vmem:[#allocation7 + $0x130] sm:$0xff]  ;;  %v5471_v1 = vadd.f32 %v7669_v2, %v5368_v41  ;;  %v5273_v41 = vld [vmem:[#allocation7 + $0x2a8] sm:$0xff] }
 0x45c   :  { %8082 = vst [vmem:[#allocation40_spill] sm:$0xff] %v7846_v18  ;;  %v5227_v18 = vld [vmem:[#allocation7 + $0x138] sm:$0xff] }
 0x45d   :  { %v5484_v17 = vadd.f32 %v5476_v11, %v5322_v50  ;;  %v5354_v50 = vmul.f32 %v5226_v27, %v7722_v22  ;;  %v5242_v11 = vld [vmem:[#allocation7 + $0x1b0] sm:$0xff]  ;;  %v5340_v22 = vmul.f32 %v5212_v42, %v7736_v39  ;;  %v5289_v39 = vld [vmem:[#allocation7 + $0x328] sm:$0xff] }
 0x45f   :  { %v5492_v2 = vadd.f32 %v5484_v17, %v5323_v52  ;;  %v5355_v17 = vmul.f32 %v5227_v18, %v7726_v31  ;;  %v5473_v52 = vadd.f32 %v7676_v34, %v5400_v3  ;;  %v5305_v31 = vld [vmem:[#allocation7 + $0x3a8] sm:$0xff]  ;;  %v5214_v3 = vld [vmem:[#allocation7 + $0xd0] sm:$0xff] }
 0x484   :  { %v7822_v35 = vpop.f32.mrf.mxu0 }
 0x485   :  { %8077 = vst [vmem:[#allocation37_spill] sm:$0xff] %v7822_v35 }
 0x486   :  { %v7827_v32 = vpop.f32.mrf.mxu0 }
 0x487   :  { %8079 = vst [vmem:[#allocation27_spill] sm:$0xff] %v7827_v32  ;;  %v5352_v32 = vmul.f32 %v5224_v15, %v7692_v44  ;;  %v5353_v44 = vmul.f32 %v5225_v58, %v7694_v40  ;;  %v5241_v15 = vld [vmem:[#allocation7 + $0x1a8] sm:$0xff]  ;;  %v5384_v58 = vmul.f32 %v5256_v56, %v7700_v46  ;;  %v5370_v46 = vmul.f32 %v5242_v11, %v7730_v10 }
 0x488   :  { %v7834_v35 = vpop.f32.mrf.mxu0  ;;  %v5369_v45 = vmul.f32 %v5241_v15, %v7698_v30  ;;  %v5288_v30 = vld [vmem:[#allocation7 + $0x320] sm:$0xff]  ;;  %v5493_v15 = vadd.f32 %v5485_v54, %v5339_v43  ;;  %v5197_v56 = vld [vmem:[#allocation7 + $0x48] sm:$0xff]  ;;  %v5274_v54 = vld [vmem:[#allocation7 + $0x2b0] sm:$0xff] }
 0x489   :  { %v5470_v60 = vadd.f32 %v7664_v55, %v5352_v32  ;;  %v5196_v55 = vld [vmem:[#allocation7 + $0x40] sm:$0xff]  ;;  %v7856_v32 = vpop.f32.mrf.mxu1  ;;  %v5472_v16 = vadd.f32 %v7671_v38, %v5384_v58  ;;  %v5416_v10 = vmul.f32 %v5288_v30, %v7712_v29  ;;  %v5325_v38 = vmul.f32 %v5197_v56, %v7732_v62 }
 0x48a   :  { %v7842_v57 = vpop.f32.mrf.mxu0  ;;  %v5324_v51 = vmul.f32 %v5196_v55, %v7728_v49  ;;  %v5479_v5 = vadd.f32 %v5471_v1, %v5369_v45  ;;  %v5243_v49 = vld [vmem:[#allocation7 + $0x1b8] sm:$0xff]  ;;  %v5401_v1 = vmul.f32 %v5273_v41, %v7708_v6  ;;  %v5258_v45 = vld [vmem:[#allocation7 + $0x230] sm:$0xff]  ;;  %v5501_v34 = vadd.f32 %v5493_v15, %v5340_v22  ;;  %v5244_v62 = vld [vmem:[#allocation7 + $0x1c0] sm:$0xff] }
 0x48b   :  { %v5478_v40 = vadd.f32 %v5470_v60, %v5353_v44  ;;  %v5304_v60 = vld [vmem:[#allocation7 + $0x3a0] sm:$0xff]  ;;  %v7866_v44 = vpop.f32.mrf.mxu1  ;;  %v5371_v58 = vmul.f32 %v5243_v49, %v7734_v4  ;;  %v5341_v6 = vmul.f32 %v5213_v33, %v7740_v21  ;;  %v5480_v11 = vadd.f32 %v5472_v16, %v5385_v13  ;;  %v5259_v4 = vld [vmem:[#allocation7 + $0x238] sm:$0xff] }
 0x48c   :  { %v7851_v59 = vpop.f32.mrf.mxu0  ;;  %v5432_v43 = vmul.f32 %v5304_v60, %v7720_v14  ;;  %v5500_v55 = vadd.f32 %v5492_v2, %v5324_v51  ;;  %v5487_v18 = vadd.f32 %v5479_v5, %v5370_v46  ;;  %v5386_v14 = vmul.f32 %v5258_v45, %v7738_v48  ;;  %v5275_v51 = vld [vmem:[#allocation7 + $0x2b8] sm:$0xff]  ;;  %v5290_v5 = vld [vmem:[#allocation7 + $0x330] sm:$0xff]  ;;  %v5229_v48 = vld [vmem:[#allocation7 + $0x148] sm:$0xff] }
 0x48d   :  { %v5486_v27 = vadd.f32 %v5478_v40, %v5354_v50  ;;  %v5198_v50 = vld [vmem:[#allocation7 + $0x50] sm:$0xff]  ;;  %v7880_v29 = vpop.f32.mrf.mxu1  ;;  %v5402_v0 = vmul.f32 %v5274_v54, %v7761_v12  ;;  %v5481_v2 = vadd.f32 %v5473_v52, %v5401_v1  ;;  %v5474_v41 = vadd.f32 %v7678_v25, %v5416_v10  ;;  %v5199_v13 = vld [vmem:[#allocation7 + $0x58] sm:$0xff]  ;;  %v5260_v54 = vld [vmem:[#allocation7 + $0x240] sm:$0xff] }
 0x48e   :  { %v7862_v8 = vpop.f32.mrf.mxu0  ;;  %v5417_v30 = vmul.f32 %v5289_v39, %v7716_v36  ;;  %v5356_v21 = vmul.f32 %v5228_v47, %v7756_v37  ;;  %v5475_v15 = vadd.f32 %v7684_v24, %v5432_v43  ;;  %v5433_v60 = vmul.f32 %v5305_v31, %v7724_v23  ;;  %v5306_v36 = vld [vmem:[#allocation7 + $0x3b0] sm:$0xff]  ;;  %v5215_v33 = vld [vmem:[#allocation7 + $0xd8] sm:$0xff]  ;;  %v5200_v39 = vld [vmem:[#allocation7 + $0x60] sm:$0xff] }
 0x48f   :  { %v5494_v42 = vadd.f32 %v5486_v27, %v5355_v17  ;;  %v5508_v46 = vadd.f32 %v5500_v55, %v5325_v38  ;;  %v5326_v12 = vmul.f32 %v5198_v50, %v7800_v26  ;;  %v5495_v22 = vadd.f32 %v5487_v18, %v5371_v58  ;;  %v7894_v37 = vpop.f32.mrf.mxu1  ;;  %v5245_v26 = vld [vmem:[#allocation7 + $0x1c8] sm:$0xff]  ;;  %v5291_v45 = vld [vmem:[#allocation7 + $0x338] sm:$0xff]  ;;  %v5276_v38 = vld [vmem:[#allocation7 + $0x2c0] sm:$0xff] }
 0x490   :  { %v7876_v40 = vpop.f32.mrf.mxu0  ;;  %v5509_v16 = vadd.f32 %v5501_v34, %v5341_v6  ;;  %v5372_v25 = vmul.f32 %v5244_v62, %v7776_v28  ;;  %v5342_v27 = vmul.f32 %v5214_v3, %v7808_v9  ;;  %v5488_v17 = vadd.f32 %v5480_v11, %v5386_v14  ;;  %v8083_v31 = vld [vmem:[#allocation21_spill] sm:$0xff]  ;;  %v8084_v6 = vld [vmem:[#allocation32_spill] sm:$0xff]  ;;  %v5216_v50 = vld [vmem:[#allocation7 + $0xe0] sm:$0xff] }
 0x491   :  { %v5387_v24 = vmul.f32 %v5259_v4, %v7751_v19  ;;  %v5403_v23 = vmul.f32 %v5275_v51, %v7771_v7  ;;  %v5418_v49 = vmul.f32 %v5290_v5, %v7781_v20  ;;  %v5482_v52 = vadd.f32 %v5474_v41, %v5417_v30  ;;  %v5230_v7 = vld [vmem:[#allocation7 + $0x150] sm:$0xff]  ;;  %v5307_v58 = vld [vmem:[#allocation7 + $0x3b8] sm:$0xff]  ;;  %v7906_v11 = vpop.f32.mrf.mxu1  ;;  %v5261_v4 = vld [vmem:[#allocation7 + $0x248] sm:$0xff] }
 0x492   :  { %v7890_v56 = vpop.f32.mrf.mxu0  ;;  %v5489_v1 = vadd.f32 %v5481_v2, %v5402_v0  ;;  %v5502_v10 = vadd.f32 %v5494_v42, %v5356_v21  ;;  %v5357_v28 = vmul.f32 %v5229_v48, %v7766_v63  ;;  %v5483_v9 = vadd.f32 %v5475_v15, %v5433_v60  ;;  %v8085_v14 = vld [vmem:[#allocation22_spill] sm:$0xff]  ;;  %v8086_v0 = vld [vmem:[#allocation33_spill] sm:$0xff]  ;;  %v8089_v5 = vld [vmem:[#allocation44_spill] sm:$0xff] }
 0x493   :  { %v5434_v43 = vmul.f32 %v5306_v36, %v7792_v53  ;;  %v5516_v55 = vadd.f32 %v5508_v46, %v5326_v12  ;;  %v5327_v19 = vmul.f32 %v5199_v13, %v7804_v61  ;;  %v5503_v20 = vadd.f32 %v5495_v22, %v5372_v25  ;;  %v5246_v3 = vld [vmem:[#allocation7 + $0x1d0] sm:$0xff]  ;;  %v8088_v51 = vld [vmem:[#allocation30_spill] sm:$0xff]  ;;  %v5201_v60 = vld [vmem:[#allocation7 + $0x68] sm:$0xff] }
 0x494   :  { %v7902_v47 = vpop.f32.mrf.mxu0  ;;  %v5373_v18 = vmul.f32 %v5245_v26, %v8083_v31  ;;  %v5517_v34 = vadd.f32 %v5509_v16, %v5342_v27  ;;  %v5343_v63 = vmul.f32 %v5215_v33, %v8084_v6  ;;  %v5496_v42 = vadd.f32 %v5488_v17, %v5387_v24  ;;  %v8087_v61 = vld [vmem:[#allocation37_spill] sm:$0xff]  ;;  %v5277_v16 = vld [vmem:[#allocation7 + $0x2c8] sm:$0xff]  ;;  %v5232_v31 = vld [vmem:[#allocation7 + $0x160] sm:$0xff] }
 0x495   :  { %v5419_v53 = vmul.f32 %v5291_v45, %v8085_v14  ;;  %v5388_v62 = vmul.f32 %v5260_v54, %v8086_v0  ;;  %v5328_v2 = vmul.f32 %v5200_v39, %v8087_v61  ;;  %v5497_v41 = vadd.f32 %v5489_v1, %v5403_v23  ;;  %v8090_v48 = vld [vmem:[#allocation29_spill] sm:$0xff]  ;;  %v8091_v23 = vld [vmem:[#allocation38_spill] sm:$0xff]  ;;  %v5217_v33 = vld [vmem:[#allocation7 + $0xe8] sm:$0xff]  ;;  %v7918_v1 = vpop.f32.mrf.mxu1 }
 0x496   :  { %v5510_v30 = vadd.f32 %v5502_v10, %v5357_v28  ;;  %v5404_v21 = vmul.f32 %v5276_v38, %v8088_v51  ;;  %v5358_v15 = vmul.f32 %v5230_v7, %v8089_v5  ;;  %v5490_v46 = vadd.f32 %v5482_v52, %v5418_v49  ;;  %v5231_v25 = vld [vmem:[#allocation7 + $0x158] sm:$0xff]  ;;  %v7915_v13 = vpop.f32.mrf.mxu0  ;;  %v5202_v10 = vld [vmem:[#allocation7 + $0x70] sm:$0xff]  ;;  %v5292_v45 = vld [vmem:[#allocation7 + $0x340] sm:$0xff] }
 0x497   :  { %v5435_v12 = vmul.f32 %v5307_v58, %v8090_v48  ;;  %v5524_v22 = vadd.f32 %v5516_v55, %v5327_v19  ;;  %v5344_v36 = vmul.f32 %v5216_v50, %v7834_v35  ;;  %v5491_v27 = vadd.f32 %v5483_v9, %v5434_v43  ;;  %v8092_v49 = vld [vmem:[#allocation34_spill] sm:$0xff]  ;;  %v8093_v55 = vld [vmem:[#allocation27_spill] sm:$0xff]  ;;  %v8094_v19 = vld [vmem:[#allocation41_spill] sm:$0xff] }
 0x498   :  { %v5511_v17 = vadd.f32 %v5503_v20, %v5373_v18  ;;  %v5525_v24 = vadd.f32 %v5517_v34, %v5343_v63  ;;  %v5374_v26 = vmul.f32 %v5246_v3, %v8091_v23  ;;  %v5504_v28 = vadd.f32 %v5496_v42, %v5388_v62  ;;  %v5247_v54 = vld [vmem:[#allocation7 + $0x1d8] sm:$0xff]  ;;  %v5262_v58 = vld [vmem:[#allocation7 + $0x250] sm:$0xff]  ;;  %v5248_v63 = vld [vmem:[#allocation7 + $0x1e0] sm:$0xff]  ;;  %v7925_v50 = vpop.f32.mrf.mxu0 }
 0x499   :  { %v5389_v52 = vmul.f32 %v5261_v4, %v8092_v49  ;;  %v5532_v39 = vadd.f32 %v5524_v22, %v5328_v2  ;;  %v5329_v38 = vmul.f32 %v5201_v60, %v8093_v55  ;;  %v5505_v35 = vadd.f32 %v5497_v41, %v5404_v21  ;;  %v8095_v43 = vld [vmem:[#allocation26_spill] sm:$0xff]  ;;  %v8097_v61 = vld [vmem:[#allocation28_spill] sm:$0xff]  ;;  %v8099_v49 = vld [vmem:[#allocation43_spill] sm:$0xff] }
 0x49a   :  { %v5405_v7 = vmul.f32 %v5277_v16, %v8094_v19  ;;  %v5518_v9 = vadd.f32 %v5510_v30, %v5358_v15  ;;  %v5359_v20 = vmul.f32 %v5231_v25, %v8095_v43  ;;  %v5533_v34 = vadd.f32 %v5525_v24, %v5344_v36  ;;  %v8096_v0 = vld [vmem:[#allocation42_spill] sm:$0xff]  ;;  %v5218_v4 = vld [vmem:[#allocation7 + $0xf0] sm:$0xff]  ;;  %v8098_v16 = vld [vmem:[#allocation39_spill] sm:$0xff] }
 0x49b   :  { %v5345_v6 = vmul.f32 %v5217_v33, %v7842_v57  ;;  %v5498_v14 = vadd.f32 %v5490_v46, %v5419_v53  ;;  %v5420_v62 = vmul.f32 %v5292_v45, %v8096_v0  ;;  %v5519_v3 = vadd.f32 %v5511_v17, %v5374_v26  ;;  %v5203_v30 = vld [vmem:[#allocation7 + $0x78] sm:$0xff]  ;;  %v5308_v5 = vld [vmem:[#allocation7 + $0x3c0] sm:$0xff]  ;;  %v5278_v60 = vld [vmem:[#allocation7 + $0x2d0] sm:$0xff]  ;;  %v7932_v33 = vpop.f32.mrf.mxu0 }
 0x49c   :  { %v5375_v2 = vmul.f32 %v5247_v54, %v8097_v61  ;;  %v5499_v51 = vadd.f32 %v5491_v27, %v5435_v12  ;;  %v5512_v21 = vadd.f32 %v5504_v28, %v5389_v52  ;;  %v5540_v15 = vadd.f32 %v5532_v39, %v5329_v38  ;;  %v5233_v53 = vld [vmem:[#allocation7 + $0x168] sm:$0xff]  ;;  %v5219_v17 = vld [vmem:[#allocation7 + $0xf8] sm:$0xff]  ;;  %v5234_v55 = vld [vmem:[#allocation7 + $0x170] sm:$0xff] }
 0x49d   :  { %v5360_v57 = vmul.f32 %v5232_v31, %v7851_v59  ;;  %v5513_v48 = vadd.f32 %v5505_v35, %v5405_v7  ;;  %v5526_v22 = vadd.f32 %v5518_v9, %v5359_v20  ;;  %v5390_v25 = vmul.f32 %v5262_v58, %v8098_v16  ;;  %v5293_v24 = vld [vmem:[#allocation7 + $0x348] sm:$0xff]  ;;  %v5263_v23 = vld [vmem:[#allocation7 + $0x258] sm:$0xff]  ;;  %v5106_v0 = vpop.f32.mrf.mxu0 }
 0x49e   :  { %v5376_v46 = vmul.f32 %v5248_v63, %v7876_v40  ;;  %v5541_v26 = vadd.f32 %v5533_v34, %v5345_v6  ;;  %v5506_v28 = vadd.f32 %v5498_v14, %v5420_v62  ;;  %v5436_v59 = vmul.f32 %v5308_v5, %v8099_v49  ;;  %v5249_v54 = vld [vmem:[#allocation7 + $0x1e8] sm:$0xff]  ;;  %v5279_v38 = vld [vmem:[#allocation7 + $0x2d8] sm:$0xff]  ;;  %v5264_v6 = vld [vmem:[#allocation7 + $0x260] sm:$0xff] }
 0x49f   :  { %v5527_v52 = vadd.f32 %v5519_v3, %v5375_v2  ;;  %v5406_v45 = vmul.f32 %v5278_v60, %v7856_v32  ;;  %v5309_v40 = vld [vmem:[#allocation7 + $0x3c8] sm:$0xff]  ;;  %v5534_v35 = vadd.f32 %v5526_v22, %v5360_v57  ;;  %v5361_v19 = vmul.f32 %v5233_v53, %v7862_v8  ;;  %v5280_v14 = vld [vmem:[#allocation7 + $0x2e0] sm:$0xff]  ;;  %v8102_v8 = vld [vmem:[#allocation25_spill] sm:$0xff] }
 0x4a0   :  { %v8100_v43 = vld [vmem:[#allocation31_spill] sm:$0xff]  ;;  %v5520_v31 = vadd.f32 %v5512_v21, %v5390_v25  ;;  %v5377_v32 = vmul.f32 %v5249_v54, %v7890_v56  ;;  %v5507_v2 = vadd.f32 %v5499_v51, %v5436_v59  ;;  %v5235_v5 = vld [vmem:[#allocation7 + $0x178] sm:$0xff]  ;;  %v5310_v57 = vld [vmem:[#allocation7 + $0x3d0] sm:$0xff]  ;;  %v5392_v22 = vmul.f32 %v5264_v6, %v7902_v47 }
 0x4a1   :  { %v5421_v20 = vmul.f32 %v5293_v24, %v8100_v43  ;;  %v5535_v34 = vadd.f32 %v5527_v52, %v5376_v46  ;;  %v5542_v60 = vadd.f32 %v5534_v35, %v5361_v19  ;;  %v5265_v46 = vld [vmem:[#allocation7 + $0x268] sm:$0xff]  ;;  %v5408_v51 = vmul.f32 %v5280_v14, %v7925_v50  ;;  %v5266_v59 = vld [vmem:[#allocation7 + $0x270] sm:$0xff]  ;;  %v5311_v52 = vld [vmem:[#allocation7 + $0x3d8] sm:$0xff] }
 0x4a2   :  { %v5438_v47 = vmul.f32 %v5310_v57, %v7906_v11  ;;  %v5296_v35 = vld [vmem:[#allocation7 + $0x360] sm:$0xff]  ;;  %v5282_v6 = vld [vmem:[#allocation7 + $0x2f0] sm:$0xff]  ;;  %v5297_v14 = vld [vmem:[#allocation7 + $0x368] sm:$0xff] }
 0x4a3   :  { %v5514_v56 = vadd.f32 %v5506_v28, %v5421_v20  ;;  %v5543_v24 = vadd.f32 %v5535_v34, %v5377_v32  ;;  %v5281_v28 = vld [vmem:[#allocation7 + $0x2e8] sm:$0xff] }
 0x4c5   :  { %v5149_v18 = vpop.f32.mrf.mxu1 }
 0x4c6   :  { %v5330_v42 = vmul.f32 %v5202_v10, %v5149_v18  ;;  %v8101_v18 = vld [vmem:[#allocation40_spill] sm:$0xff] }
 0x4c7   :  { %v5151_v41 = vpop.f32.mrf.mxu1  ;;  %v5391_v58 = vmul.f32 %v5263_v23, %v8101_v18 }
 0x4c8   :  { %v5548_v12 = vadd.f32 %v5540_v15, %v5330_v42  ;;  %v5331_v27 = vmul.f32 %v5203_v30, %v5151_v41  ;;  %v5294_v42 = vld [vmem:[#allocation7 + $0x350] sm:$0xff]  ;;  %v5437_v41 = vmul.f32 %v5309_v40, %v8102_v8  ;;  %v5521_v30 = vadd.f32 %v5513_v48, %v5406_v45  ;;  %v5295_v48 = vld [vmem:[#allocation7 + $0x358] sm:$0xff] }
 0x4c9   :  { %v5153_v36 = vpop.f32.mrf.mxu1  ;;  %v5250_v15 = vld [vmem:[#allocation7 + $0x1f0] sm:$0xff]  ;;  %v5528_v25 = vadd.f32 %v5520_v31, %v5391_v58  ;;  %v5422_v53 = vmul.f32 %v5294_v42, %v7880_v29  ;;  %v8103_v29 = vmov 0   ;;  %v5393_v45 = vmul.f32 %v5265_v46, %v7915_v13  ;;  %v5267_v13 = vld [vmem:[#allocation7 + $0x278] sm:$0xff] }
 0x4ca   :  { %v5346_v10 = vmul.f32 %v5218_v4, %v5153_v36  ;;  %v5556_v62 = vadd.f32 %v5548_v12, %v5331_v27  ;;  %v5407_v4 = vmul.f32 %v5279_v38, %v7866_v44  ;;  %v5108_v44 = vpop.f32.mrf.mxu0  ;;  %v5515_v27 = vadd.f32 %v5507_v2, %v5437_v41 }
 0x4cb   :  { %v5155_v39 = vpop.f32.mrf.mxu1  ;;  %v5536_v50 = vadd.f32 %v5528_v25, %v5392_v22  ;;  %v5423_v40 = vmul.f32 %v5295_v48, %v7894_v37  ;;  %v5439_v58 = vmul.f32 %v5311_v52, %v7918_v1  ;;  %v5424_v42 = vmul.f32 %v5296_v35, %v5106_v0 }
 0x4cc   :  { %v5549_v7 = vadd.f32 %v5541_v26, %v5346_v10  ;;  %v5347_v9 = vmul.f32 %v5219_v17, %v5155_v39  ;;  %v5251_v17 = vld [vmem:[#allocation7 + $0x1f8] sm:$0xff]  ;;  %v5529_v10 = vadd.f32 %v5521_v30, %v5407_v4  ;;  %v5110_v11 = vpop.f32.mrf.mxu0  ;;  %v5523_v18 = vadd.f32 %v5515_v27, %v5438_v47 }
 0x4cd   :  { %v5159_v63 = vpop.f32.mrf.mxu1  ;;  %v5425_v0 = vmul.f32 %v5297_v14, %v5108_v44 }
 0x4ce   :  { %v5557_v3 = vadd.f32 %v5549_v7, %v5347_v9  ;;  %v5362_v61 = vmul.f32 %v5234_v55, %v5159_v63  ;;  %v5522_v55 = vadd.f32 %v5514_v56, %v5422_v53  ;;  %v5537_v38 = vadd.f32 %v5529_v10, %v5408_v51  ;;  %v5312_v9 = vld [vmem:[#allocation7 + $0x3e0] sm:$0xff]  ;;  %v5112_v4 = vpop.f32.mrf.mxu0 }
 0x4cf   :  { %v5161_v21 = vpop.f32.mrf.mxu1  ;;  %v5409_v7 = vmul.f32 %v5281_v28, %v7932_v33  ;;  %v5544_v63 = vadd.f32 %v5536_v50, %v5393_v45  ;;  %v5531_v30 = vadd.f32 %v5523_v18, %v5439_v58  ;;  %v6896_v45 = vld [vmem:[%s8002_s8 + $0x50] sm:$0xff]  }
 0x4d0   :  { %v5564_v16 = vpack.c.bf16 %v5557_v3, %v5556_v62  ;;  %v5550_v23 = vadd.f32 %v5542_v60, %v5362_v61  ;;  %v5363_v26 = vmul.f32 %v5235_v5, %v5161_v21  ;;  %v5530_v37 = vadd.f32 %v5522_v55, %v5423_v40  ;;  %v5283_v61 = vld [vmem:[#allocation7 + $0x2f8] sm:$0xff]  ;;  %v5313_v21 = vld [vmem:[#allocation7 + $0x3e8] sm:$0xff]  ;;  %v5298_v5 = vld [vmem:[#allocation7 + $0x370] sm:$0xff]  ;;  %6714 = vmatprep.subr.bf16.mxu1 %v6896_v45 }
 0x4d1   :  { %v5163_v36 = vpop.f32.mrf.mxu1  ;;  %v5440_v62 = vmul.f32 %v5312_v9, %v5110_v11  ;;  %v5545_v33 = vadd.f32 %v5537_v38, %v5409_v7  ;;  %v5441_v56 = vmul.f32 %v5313_v21, %v5112_v4  ;;  %v6900_v55 = vld [vmem:[%s8002_s8 + $0x40] sm:$0xff]  }
 0x4d2   :  { %v5378_v12 = vmul.f32 %v5250_v15, %v5163_v36  ;;  %5709 = vmatmul.mubr.bf16.vlgmr.msra.gmra.mxu0 %v5564_v16  ;;  %v5558_v43 = vadd.f32 %v5550_v23, %v5363_v26  ;;  %v5538_v15 = vadd.f32 %v5530_v37, %v5424_v42  ;;  %v5299_v36 = vld [vmem:[#allocation7 + $0x378] sm:$0xff]  ;;  %v5584_v38 = vld [vmem:[#allocation10] sm:$0x3] }
 0x4d3   :  { %v5165_v49 = vpop.f32.mrf.mxu1  ;;  %5718 = vmatprep.mubr.bf16.mxu0 %v8103_v29  ;;  %v5539_v22 = vadd.f32 %v5531_v30, %v5440_v62  ;;  %v5315_v26 = vld [vmem:[#allocation7 + $0x3f8] sm:$0xff] }
 0x4d4   :  { %v5551_v54 = vadd.f32 %v5543_v24, %v5378_v12  ;;  %v5379_v39 = vmul.f32 %v5251_v17, %v5165_v49  ;;  %v5314_v17 = vld [vmem:[#allocation7 + $0x3f0] sm:$0xff]  ;;  %v5546_v48 = vadd.f32 %v5538_v15, %v5425_v0  ;;  %v6901_v40 = vld [vmem:[%s8002_s8] sm:$0xff]  }
 0x4d5   :  { %v5169_v19 = vpop.f32.mrf.mxu1  ;;  %v5547_v12 = vadd.f32 %v5539_v22, %v5441_v56 }
 0x4d6   :  { %v5559_v20 = vadd.f32 %v5551_v54, %v5379_v39  ;;  %v5394_v31 = vmul.f32 %v5266_v59, %v5169_v19  ;;  %v6897_v54 = vld [vmem:[%s8002_s8 + $0x10] sm:$0xff]   ;;  %v6899_v39 = vld [vmem:[%s8002_s8 + $0x8] sm:$0xff]  }
 0x4d7   :  { %v5171_v34 = vpop.f32.mrf.mxu1  ;;  %6715 = vmatpush3.bf16.msra.mxu1 %v6897_v54  ;;  %v8104_v19 = vld [vmem:[#allocation20_spill] sm:$0xff] }
 0x4d8   :  { %v5565_v32 = vpack.c.bf16 %v5559_v20, %v5558_v43  ;;  %v5552_v2 = vadd.f32 %v5544_v63, %v5394_v31  ;;  %v5395_v8 = vmul.f32 %v5267_v13, %v5171_v34  ;;  %v8105_v7 = vsub.s32 1, %v8104_v19 }
 0x4d9   :  { %v5173_v3 = vpop.f32.mrf.mxu1  ;;  %v8106_v9 = vsub.s32 0, %v8104_v19 }
 0x4da   :  { %v5410_v41 = vmul.f32 %v5282_v6, %v5173_v3  ;;  %5719 = vmatmul.mubr.bf16.gmra.mxu0 %v5565_v32  ;;  %v5560_v25 = vadd.f32 %v5552_v2, %v5395_v8  ;;  %v5593_v11 = vrot.slane %v5584_v38, %v8105_v7 }
 0x4db   :  { %v5175_v1 = vpop.f32.mrf.mxu1  ;;  %5728 = vmatprep.mubr.bf16.mxu0 %v8103_v29  ;;  %v5589_v43 = vrot.slane %v5584_v38, %v8106_v9 }
 0x4dc   :  { %v5553_v60 = vadd.f32 %v5545_v33, %v5410_v41  ;;  %v5411_v57 = vmul.f32 %v5283_v61, %v5175_v1 }
 0x4dd   :  { %v5179_v16 = vpop.f32.mrf.mxu1 }
 0x4de   :  { %v5561_v53 = vadd.f32 %v5553_v60, %v5411_v57  ;;  %v5426_v46 = vmul.f32 %v5298_v5, %v5179_v16 }
 0x4df   :  { %v5181_v51 = vpop.f32.mrf.mxu1 }
 0x4e0   :  { %v5566_v24 = vpack.c.bf16 %v5561_v53, %v5560_v25  ;;  %v5554_v27 = vadd.f32 %v5546_v48, %v5426_v46  ;;  %v5427_v10 = vmul.f32 %v5299_v36, %v5181_v51 }
 0x4e1   :  { %v5183_v23 = vpop.f32.mrf.mxu1 }
 0x4e2   :  { %v5442_v47 = vmul.f32 %v5314_v17, %v5183_v23  ;;  %5729 = vmatmul.mubr.bf16.gmra.mxu0 %v5566_v24  ;;  %v5562_v59 = vadd.f32 %v5554_v27, %v5427_v10 }
 0x4e3   :  { %v5185_v44 = vpop.f32.mrf.mxu1  ;;  %5738 = vmatprep.mubr.bf16.mxu0 %v8103_v29  ;;  %v6898_v29 = vld [vmem:[%s8002_s8 + $0x48] sm:$0xff]  }
 0x4e4   :  { %v5555_v28 = vadd.f32 %v5547_v12, %v5442_v47  ;;  %v5443_v49 = vmul.f32 %v5315_v26, %v5185_v44  ;;  %6716 = vmatprep.subr.bf16.mxu1 %v6898_v29 }
 0x4e5   :  { %6717 = vmatpush3.bf16.msra.mxu1 %v6899_v39 }
 0x4e6   :  { %v5563_v52 = vadd.f32 %v5555_v28, %v5443_v49  ;;  %6718 = vmatprep.subr.bf16.mxu1 %v6900_v55  ;;  %v7098_v55 = vmov 0.0  }
 0x4e7   :  { %6749 = vmatprep.subr.bf16.mxu0 %v7098_v55 }
 0x4e8   :  { %v5567_v50 = vpack.c.bf16 %v5563_v52, %v5562_v59 }
 0x4e9   :  { %6719 = vmatpush3.bf16.msra.mxu1 %v6901_v40 }
 0x4ea   :  { %5739 = vmatmul.mubr.bf16.gmra.mxu0 %v5567_v50 }
 0x4eb   :  { %6757 = vmatprep.mubr.msk.bf16.mxu0 %vm7099_vm2, %v7098_v55 }
 0x592   :  { %v5710_v35 = vpop.f32.mrf.mxu0 }
 0x593   :  { %v5711_v34 = vadd.f32 %v5710_v35, %v5589_v43 }
 0x594   :  { %v5712_v20 = vpop.f32.mrf.mxu0 }
 0x595   :  { %v5713_v18 = vadd.f32 %v5712_v20, %v5593_v11  ;;  %v5749_v14 = vmax.f32 %v5711_v34, 0.0 }
 0x596   :  { %v5714_v31 = vpop.f32.mrf.mxu0 }
 0x597   :  { %v5715_v58 = vadd.f32 %v5714_v31, %v5589_v43  ;;  %v5750_v32 = vmax.f32 %v5713_v18, 0.0 }
 0x598   :  { %v5716_v13 = vpop.f32.mrf.mxu0 }
 0x599   :  { %v5717_v6 = vadd.f32 %v5716_v13, %v5593_v11  ;;  %v5751_v63 = vmax.f32 %v5715_v58, 0.0 }
 0x59a   :  { %v5720_v42 = vpop.f32.mrf.mxu0 }
 0x59b   :  { %v5752_v37 = vmax.f32 %v5717_v6, 0.0  ;;  %v5765_v61 = vpack.c.bf16 %v5751_v63, %v5749_v14  ;;  %v5721_v41 = vadd.f32 %v5720_v42, %v5589_v43 }
 0x59c   :  { %v5722_v62 = vpop.f32.mrf.mxu0 }
 0x59d   :  { %v5766_v3 = vpack.c.bf16 %v5752_v37, %v5750_v32  ;;  %v5723_v2 = vadd.f32 %v5722_v62, %v5593_v11  ;;  %v5753_v0 = vmax.f32 %v5721_v41, 0.0 }
 0x59e   :  { %v5724_v33 = vpop.f32.mrf.mxu0 }
 0x59f   :  { %v5725_v8 = vadd.f32 %v5724_v33, %v5589_v43  ;;  %5933 = vmatprep.mubr.bf16.mxu1 %v5766_v3  ;;  %v5754_v5 = vmax.f32 %v5723_v2, 0.0 }
 0x5a0   :  { %v5726_v30 = vpop.f32.mrf.mxu0  ;;  %5934 = vmatmul.mubr.bf16.vlgmr.msra.gmra.mxu1 %v5765_v61 }
 0x5a1   :  { %v5727_v4 = vadd.f32 %v5726_v30, %v5593_v11  ;;  %v5755_v21 = vmax.f32 %v5725_v8, 0.0 }
 0x5a2   :  { %v5730_v1 = vpop.f32.mrf.mxu0 }
 0x5a3   :  { %v5756_v15 = vmax.f32 %v5727_v4, 0.0  ;;  %v5767_v22 = vpack.c.bf16 %v5755_v21, %v5753_v0  ;;  %v5731_v53 = vadd.f32 %v5730_v1, %v5589_v43  ;;  %v6902_v4 = vld [vmem:[#allocation12] sm:$0xff]   ;;  %v6701_v21 = vld [vmem:[#allocation13] ss:$0 sm:$0xff] }
 0x5a4   :  { %v5732_v60 = vpop.f32.mrf.mxu0 }
 0x5a5   :  { %v5768_v57 = vpack.c.bf16 %v5756_v15, %v5754_v5  ;;  %v5733_v56 = vadd.f32 %v5732_v60, %v5593_v11  ;;  %v5757_v23 = vmax.f32 %v5731_v53, 0.0 }
 0x5a6   :  { %v5734_v16 = vpop.f32.mrf.mxu0 }
 0x5a7   :  { %v5735_v25 = vadd.f32 %v5734_v16, %v5589_v43  ;;  %5941 = vmatprep.mubr.bf16.mxu1 %v5768_v57  ;;  %v5758_v48 = vmax.f32 %v5733_v56, 0.0 }
 0x5a8   :  { %v5736_v46 = vpop.f32.mrf.mxu0  ;;  %5942 = vmatmul.mubr.bf16.gmra.mxu1 %v5767_v22 }
 0x5a9   :  { %v5737_v51 = vadd.f32 %v5736_v46, %v5593_v11  ;;  %v5759_v36 = vmax.f32 %v5735_v25, 0.0 }
 0x5aa   :  { %v5740_v17 = vpop.f32.mrf.mxu0 }
 0x5ab   :  { %v5760_v24 = vmax.f32 %v5737_v51, 0.0  ;;  %v5769_v27 = vpack.c.bf16 %v5759_v36, %v5757_v23  ;;  %v5741_v28 = vadd.f32 %v5740_v17, %v5589_v43 }
 0x5ac   :  { %v5742_v26 = vpop.f32.mrf.mxu0 }
 0x5ad   :  { %v5770_v12 = vpack.c.bf16 %v5760_v24, %v5758_v48  ;;  %v5743_v47 = vadd.f32 %v5742_v26, %v5593_v11  ;;  %v5761_v54 = vmax.f32 %v5741_v28, 0.0 }
 0x5ae   :  { %v5744_v10 = vpop.f32.mrf.mxu0 }
 0x5af   :  { %v5745_v44 = vadd.f32 %v5744_v10, %v5589_v43  ;;  %5949 = vmatprep.mubr.bf16.mxu1 %v5770_v12  ;;  %v5762_v50 = vmax.f32 %v5743_v47, 0.0 }
 0x5b0   :  { %v5746_v49 = vpop.f32.mrf.mxu0  ;;  %5950 = vmatmul.mubr.bf16.gmra.mxu1 %v5769_v27 }
 0x5b1   :  { %v5747_v59 = vadd.f32 %v5746_v49, %v5593_v11  ;;  %v5763_v52 = vmax.f32 %v5745_v44, 0.0 }
 0x5b3   :  { %v5764_v45 = vmax.f32 %v5747_v59, 0.0  ;;  %v5771_v39 = vpack.c.bf16 %v5763_v52, %v5761_v54 }
 0x5b5   :  { %v5772_v29 = vpack.c.bf16 %v5764_v45, %v5762_v50 }
 0x5b7   :  { %5957 = vmatprep.mubr.bf16.mxu1 %v5772_v29 }
 0x5b8   :  { %5958 = vmatmul.mubr.bf16.gmra.mxu1 %v5771_v39 }
 0x660   :  { %v6720_v40 = vpop.f32.mrf.mxu1 }
 0x662   :  { %v6721_v38 = vpop.f32.mrf.mxu1 }
 0x663   :  { %v6722_v41 = vadd.f32 %v6721_v38, %v6720_v40 }
 0x664   :  { %v6723_v35 = vpop.f32.mrf.mxu1 }
 0x666   :  { %v6724_v19 = vpop.f32.mrf.mxu1 }
 0x667   :  { %v6725_v2 = vadd.f32 %v6724_v19, %v6723_v35 }
 0x668   :  { %v6726_v7 = vpop.f32.mrf.mxu1 }
 0x669   :  { %v5968_v30 = vpack.c.bf16 %v6725_v2, %v6722_v41 }
 0x66a   :  { %v6727_v9 = vpop.f32.mrf.mxu1 }
 0x66b   :  { %v6728_v33 = vadd.f32 %v6727_v9, %v6726_v7 }
 0x66c   :  { %v6729_v43 = vpop.f32.mrf.mxu1 }
 0x66e   :  { %v6730_v11 = vpop.f32.mrf.mxu1 }
 0x66f   :  { %v6731_v3 = vadd.f32 %v6730_v11, %v6729_v43 }
 0x670   :  { %v6732_v20 = vpop.f32.mrf.mxu1 }
 0x671   :  { %v5969_v8 = vpack.c.bf16 %v6731_v3, %v6728_v33 }
 0x672   :  { %v6733_v31 = vpop.f32.mrf.mxu1 }
 0x673   :  { %v6734_v62 = vadd.f32 %v6733_v31, %v6732_v20 }
 0x674   :  { %v6735_v18 = vpop.f32.mrf.mxu1 }
 0x676   :  { %v6736_v58 = vpop.f32.mrf.mxu1 }
 0x677   :  { %v6737_v37 = vadd.f32 %v6736_v58, %v6735_v18 }
 0x678   :  { %v6738_v34 = vpop.f32.mrf.mxu1 }
 0x679   :  { %v5970_v61 = vpack.c.bf16 %v6737_v37, %v6734_v62 }
 0x67a   :  { %v6739_v13 = vpop.f32.mrf.mxu1 }
 0x67b   :  { %v6740_v42 = vadd.f32 %v6739_v13, %v6738_v34 }
 0x67c   :  { %v6741_v6 = vpop.f32.mrf.mxu1 }
 0x67e   :  { %v6742_v63 = vpop.f32.mrf.mxu1 }
 0x67f   :  { %v6743_v32 = vadd.f32 %v6742_v63, %v6741_v6 }
 0x681   :  { %v5971_v14 = vpack.c.bf16 %v6743_v32, %v6740_v42 }
 0x683   :  { %6750 = vmatpush3.bf16.msra.mxu0 %v5971_v14 }
 0x684   :  { %6751 = vmatprep.subr.bf16.mxu0 %v7098_v55 }
 0x687   :  { %6752 = vmatpush3.bf16.msra.mxu0 %v5970_v61 }
 0x688   :  { %6753 = vmatprep.subr.bf16.mxu0 %v7098_v55 }
 0x68b   :  { %6754 = vmatpush3.bf16.msra.mxu0 %v5969_v8 }
 0x68c   :  { %6755 = vmatprep.subr.bf16.mxu0 %v7098_v55 }
 0x68f   :  { %6756 = vmatpush3.bf16.msra.mxu0 %v5968_v30 }
 0x692   :  { %6758 = vmatmul.mubr.msk.bf16.vlgmr.msra.gmra.mxu0 %vm474_vm0, %v6902_v4 }
 0x752   :  { %v6021_v1 = vpop.f32.mrf.mxu0 }
 0x753   :  { %v6022_v5 = vadd.f32 %v6701_v21, %v6021_v1 }
 0x754   :  { %v6759_v15 = vpop.f32.mrf.mxu0 }
 0x755   :  { %6052 = vst.msk [vmem:[%s8005_s11] sm:$0xff] %vm6051_vm3, %v6022_v5  ;;  %v6029_v0 = vsel %vm6028_vm4, %v6022_v5, -inf }
 0x756   :  { %6030 = vmax.xlane.f32.xlu0 %v6029_v0  ;;  %v6024_v60 = vpop.f32.mrf.mxu0 }
 0x757   :  { %v6025_v57 = vadd.f32 %v6701_v21, %v6024_v60 }
 0x758   :  { %v6760_v22 = vpop.f32.mrf.mxu0 }
 0x759   :  { %6053 = vst.msk [vmem:[%s8005_s11 + $0x8] sm:$0xff] %vm6051_vm3, %v6025_v57  ;;  %v6032_v16 = vsel %vm6028_vm4, %v6025_v57, -inf }
 0x75a   :  { %6033 = vmax.xlane.f32.xlu0 %v6032_v16 }
 0x7df   :  { %v6031_v56 = vpop.xlane.xlu0 %6030 }
 0x7e0   :  { %v6035_v25 = vsub.f32 %v6022_v5, %v6031_v56 }
 0x7e2   :  { %v6037_v53 = vmul.f32 1.442695, %v6035_v25 }
 0x7e3   :  { %v6034_v46 = vpop.xlane.xlu0 %6033 }
 0x7e4   :  { %6903 = vpow2.f32 %v6037_v53  ;;  %v6036_v51 = vsub.f32 %v6025_v57, %v6034_v46 }
 0x7e6   :  { %v6039_v36 = vmul.f32 1.442695, %v6036_v51 }
 0x7e8   :  { %6905 = vpow2.f32 %v6039_v36 }
 0x7f1   :  { %v6904_v17 = vpop.eup %6903 }
 0x7f2   :  { %v6041_v48 = vsel %vm6028_vm4, %v6904_v17, 0.0 }
 0x7f3   :  { %6042 = vadd.xlane.f32.xlu1 %v6041_v48 }
 0x7f5   :  { %v6906_v24 = vpop.eup %6905 }
 0x7f6   :  { %v6044_v23 = vsel %vm6028_vm4, %v6906_v24, 0.0 }
 0x7f7   :  { %6045 = vadd.xlane.f32.xlu1 %v6044_v23 }
 0x87c   :  { %v6043_v26 = vpop.xlane.xlu1 %6042 }
 0x87d   :  { %6907 = vrcp.f32 %v6043_v26 }
 0x880   :  { %v6046_v12 = vpop.xlane.xlu1 %6045 }
 0x881   :  { %6909 = vrcp.f32 %v6046_v12 }
 0x88a   :  { %v6908_v27 = vpop.eup %6907 }
 0x88b   :  { %v6048_v10 = vmul.f32 %v6908_v27, %v6904_v17 }
 0x88d   :  { %6054 = vst.msk [vmem:[%s8005_s11] sm:$0xff] %vm6028_vm4, %v6048_v10 }
 0x88e   :  { %v6910_v47 = vpop.eup %6909 }
 0x88f   :  { %v6050_v44 = vmul.f32 %v6910_v47, %v6906_v24 }
 0x891   :  { %6055 = vst.msk [vmem:[%s8005_s11 + $0x8] sm:$0xff] %vm6028_vm4, %v6050_v44 }
 0x892   :  { %6060 = vsyncpa [#allocation3], 1 }
 0x893   :  { %6061 = vsyncpa [#allocation5], 1 }
 0x894   :  { %6062 = vsyncpa [#allocation8], 1 }
 0x895   :  { %6063 = vsyncpa [#allocation11], 1 }
 0x896   :  { %6064 = vsyncpa [#allocation14], 1 }

</bundles_post_ra>
